<compile_context>
chip_gen: v7x
topology: tpu7x:2x2x1
jax: 0.10.0
libtpu: 0.0.40
codegen_flags: <defaults>
</compile_context>

<pallas_src>
import jax
import jax.numpy as jnp
from jax.experimental import pallas as pl
from jax.experimental.pallas import tpu as pltpu


def _vmem_spec():
    # All operands are tiny (<1 MiB total): keep whole arrays resident in VMEM.
    return pl.BlockSpec(memory_space=pltpu.MemorySpace.VMEM)


# ---------------------------------------------------------------------------
# Fused kernel: conv (im2col matmul) + BN + ReLU + maxpool + FC
# ---------------------------------------------------------------------------
def make_fused_kernel(eps, B, P, Cout):
    inv_n = 1.0 / float(P * 4 * B)     # = 1 / (N * H * W) per channel

    def kernel(patches_ref, w_ref, gamma_ref, beta_ref, wfc_ref, bfc_ref, out_ref):
        # ---- Conv2d as one im2col matmul on the MXU (bf16 operands, f32 acc).
        conv = jnp.dot(patches_ref[...], w_ref[...],
                       preferred_element_type=jnp.float32)        # (P*4*B, Cout)
        # Conv bias omitted: constant per-channel shift cancels under train-mode BN.

        # ---- BatchNorm2d (training mode), one-pass biased per-channel stats.
        s1 = jnp.sum(conv, axis=0, keepdims=True)                 # (1, Cout)
        s2 = jnp.sum(conv * conv, axis=0, keepdims=True)          # (1, Cout)
        mean = s1 * inv_n
        var = s2 * inv_n - mean * mean
        scale = jax.lax.rsqrt(var + eps) * gamma_ref[...]
        y = (conv - mean) * scale + beta_ref[...]
        y = jnp.maximum(y, 0.0)                                   # ReLU

        # ---- MaxPool2d(2,2): rows ordered (p, t, b); t = the 4 window taps.
        # (P*4*B, Cout) -> (P, 4*B, Cout) is a sublane-tile-aligned split.
        y3 = y.reshape(P, 4 * B, Cout)
        pooled = jnp.maximum(
            jnp.maximum(y3[:, 0 * B:1 * B, :], y3[:, 1 * B:2 * B, :]),
            jnp.maximum(y3[:, 2 * B:3 * B, :], y3[:, 3 * B:4 * B, :]))  # (P, B, Cout)

        # ---- Linear: flatten permutation pre-folded into wfc (P, Cout, latent).
        fc = jnp.einsum('pbc,pcl->pbl', pooled, wfc_ref[...],
                        preferred_element_type=jnp.float32)       # (P, B, latent)
        out_ref[...] = jnp.sum(fc, axis=0) + bfc_ref[...]         # (B, latent)

    return kernel


# ---------------------------------------------------------------------------
# Wrapper (trace-time glue: layout, padding, im2col, weight re-permutation)
# ---------------------------------------------------------------------------
def dummy_cnn_forward(x_nchw, w_conv, b_conv, gamma, beta, w_fc, b_fc, eps):
    del b_conv  # mathematically a no-op under train-mode BatchNorm (mean cancels)
    B, Cin, H, W = x_nchw.shape
    Cout, _, K, _ = w_conv.shape
    latent = w_fc.shape[0]
    pad = K // 2
    Hq, Wq = H // 2, W // 2
    P = Hq * Wq
    KC = K * K * Cin
    KCp = 128 * pl.cdiv(KC, 128)       # pad contraction dim 100 -> 128

    # NCHW -> NHWC, zero pad, im2col (tap order dy, dx, cin), pad K-dim to 128,
    # and order rows as (pool_pos p=(i,j), pool_tap t=(ph,pw), batch b).
    x = jnp.transpose(x_nchw, (0, 2, 3, 1)).astype(jnp.float32)
    xp = jnp.pad(x, ((0, 0), (pad, pad), (pad, pad), (0, 0)))
    cols = [xp[:, dy:dy + H, dx:dx + W, :] for dy in range(K) for dx in range(K)]
    pat = jnp.concatenate(cols, axis=-1)                          # (B,H,W,KC)
    pat = jnp.pad(pat, ((0, 0), (0, 0), (0, 0), (0, KCp - KC)))   # (B,H,W,KCp)
    pat = pat.reshape(B, Hq, 2, Wq, 2, KCp)                       # (b,i,ph,j,pw,k)
    pat = jnp.transpose(pat, (1, 3, 2, 4, 0, 5))                  # (i,j,ph,pw,b,k)
    patches = pat.reshape(P * 4 * B, KCp).astype(jnp.bfloat16)

    # Conv weight (Cout,Cin,K,K) -> (K*K*Cin, Cout), rows zero-padded to 128.
    w_mat = jnp.transpose(w_conv, (2, 3, 1, 0)).reshape(KC, Cout)
    w_mat = jnp.pad(w_mat, ((0, KCp - KC), (0, 0))).astype(jnp.bfloat16)

    # FC weight: fold PyTorch flatten order (c, i, j) into (p=i*Wq+j, c, l).
    wfc3 = jnp.transpose(w_fc.reshape(latent, Cout, Hq, Wq), (2, 3, 1, 0))
    wfc3 = wfc3.reshape(P, Cout, latent).astype(jnp.float32)

    kernel = make_fused_kernel(float(eps), B, P, Cout)
    return pl.pallas_call(
        kernel,
        out_shape=jax.ShapeDtypeStruct((B, latent), jnp.float32),
        in_specs=[_vmem_spec()] * 6,
        out_specs=_vmem_spec(),
    )(patches, w_mat,
      gamma.reshape(1, Cout).astype(jnp.float32),
      beta.reshape(1, Cout).astype(jnp.float32),
      wfc3,
      b_fc.reshape(1, latent).astype(jnp.float32))


# ---------------------------------------------------------------------------
# Pure-JAX reference (numerical sanity check only)
# ---------------------------------------------------------------------------
def reference_forward(x_nchw, w_conv, b_conv, gamma, beta, w_fc, b_fc, eps):
    conv = jax.lax.conv_general_dilated(
        x_nchw, w_conv, window_strides=(1, 1), padding=[(2, 2), (2, 2)],
        dimension_numbers=("NCHW", "OIHW", "NCHW"))
    conv = conv + b_conv[None, :, None, None]
    mean = jnp.mean(conv, axis=(0, 2, 3), keepdims=True)
    var = jnp.mean((conv - mean) ** 2, axis=(0, 2, 3), keepdims=True)
    y = (conv - mean) / jnp.sqrt(var + eps)
    y = y * gamma[None, :, None, None] + beta[None, :, None, None]
    y = jnp.maximum(y, 0.0)
    B, C, H, W = y.shape
    p = y.reshape(B, C, H // 2, 2, W // 2, 2).max(axis=(3, 5))
    flat = p.reshape(B, -1)
    return flat @ w_fc.T + b_fc


if __name__ == "__main__":
    # Module config: inputs_shape=(4, 16, 16), latent_size=32, num_layers=1
    B, Cin, H, W = 2, 4, 16, 16
    K, Cout, latent = 5, 32, 32
    eps = 1.0  # bn_eps=True is passed as BatchNorm eps -> float(True) == 1.0

    key = jax.random.PRNGKey(0)
    k1, k2, k3, k4, k5 = jax.random.split(key, 5)
    x = jax.random.normal(k1, (B, Cin, H, W), jnp.float32)
    w_conv = jax.random.normal(k2, (Cout, Cin, K, K), jnp.float32) * 0.1
    b_conv = jax.random.normal(k3, (Cout,), jnp.float32) * 0.1
    gamma = jnp.ones((Cout,), jnp.float32)    # BatchNorm2d affine default init
    beta = jnp.zeros((Cout,), jnp.float32)
    feat = Cout * (H // 2) * (W // 2)         # 32 * 8 * 8 = 2048
    w_fc = jax.random.normal(k4, (latent, feat), jnp.float32) * 0.02
    b_fc = jax.random.normal(k5, (latent,), jnp.float32) * 0.02

    out = dummy_cnn_forward(x, w_conv, b_conv, gamma, beta, w_fc, b_fc, eps)
    out = jax.block_until_ready(out)

    ref = reference_forward(x, w_conv, b_conv, gamma, beta, w_fc, b_fc, eps)
    assert out.shape == (B, latent)
    assert bool(jnp.all(jnp.isfinite(out)))
    assert bool(jnp.allclose(out, ref, atol=5e-2, rtol=5e-2)), "mismatch vs reference"

    print("KERNEL_OK")
</pallas_src>

<mosaic_0001>
module attributes {stable_mosaic.version = 11 : i64} {
  func.func @kernel(%arg0: memref<512x128xbf16, #tpu.memory_space<vmem>>, %arg1: memref<128x32xbf16, #tpu.memory_space<vmem>>, %arg2: memref<1x32xf32, #tpu.memory_space<vmem>>, %arg3: memref<1x32xf32, #tpu.memory_space<vmem>>, %arg4: memref<64x32x32xf32, #tpu.memory_space<vmem>>, %arg5: memref<1x32xf32, #tpu.memory_space<vmem>>, %arg6: memref<2x32xf32, #tpu.memory_space<vmem>>) attributes {dimension_semantics = [], scalar_prefetch = 0 : i64, scratch_operands = 0 : i64, tpu.core_type = #tpu.core_type<tc>} {
    %c0 = arith.constant 0 : index
    %c0_0 = arith.constant 0 : index
    %0 = vector.load %arg0[%c0, %c0_0] : memref<512x128xbf16, #tpu.memory_space<vmem>>, vector<512x128xbf16>
    %c0_1 = arith.constant 0 : index
    %c0_2 = arith.constant 0 : index
    %1 = vector.load %arg1[%c0_1, %c0_2] : memref<128x32xbf16, #tpu.memory_space<vmem>>, vector<128x32xbf16>
    %cst = arith.constant dense<0.000000e+00> : vector<512x32xf32>
    %2 = tpu.matmul %0, %1, %cst {dimension_numbers = #tpu.dot_dimension_numbers<[1], [0], [0], [1], [0, 0, 1, 1], [], []>} : vector<512x128xbf16>, vector<128x32xbf16>, vector<512x32xf32> -> vector<512x32xf32>
    %cst_3 = arith.constant dense<0.000000e+00> : vector<32xf32>
    %3 = vector.multi_reduction <add>, %2, %cst_3 [0] : vector<512x32xf32> to vector<32xf32>
    %4 = vector.shape_cast %3 : vector<32xf32> to vector<1x32xf32>
    %5 = arith.mulf %2, %2 : vector<512x32xf32>
    %cst_4 = arith.constant dense<0.000000e+00> : vector<32xf32>
    %6 = vector.multi_reduction <add>, %5, %cst_4 [0] : vector<512x32xf32> to vector<32xf32>
    %7 = vector.shape_cast %6 : vector<32xf32> to vector<1x32xf32>
    %cst_5 = arith.constant 0.001953125 : f32
    %8 = vector.broadcast %cst_5 : f32 to vector<1x32xf32>
    %9 = arith.mulf %4, %8 : vector<1x32xf32>
    %cst_6 = arith.constant 0.001953125 : f32
    %10 = vector.broadcast %cst_6 : f32 to vector<1x32xf32>
    %11 = arith.mulf %7, %10 : vector<1x32xf32>
    %12 = arith.mulf %9, %9 : vector<1x32xf32>
    %13 = arith.subf %11, %12 : vector<1x32xf32>
    %cst_7 = arith.constant 1.000000e+00 : f32
    %14 = vector.broadcast %cst_7 : f32 to vector<1x32xf32>
    %15 = arith.addf %13, %14 : vector<1x32xf32>
    %16 = math.rsqrt %15 : vector<1x32xf32>
    %c0_8 = arith.constant 0 : index
    %c0_9 = arith.constant 0 : index
    %17 = vector.load %arg2[%c0_8, %c0_9] : memref<1x32xf32, #tpu.memory_space<vmem>>, vector<1x32xf32>
    %18 = arith.mulf %16, %17 : vector<1x32xf32>
    %19 = vector.broadcast %9 : vector<1x32xf32> to vector<512x32xf32>
    %20 = arith.subf %2, %19 : vector<512x32xf32>
    %21 = vector.broadcast %18 : vector<1x32xf32> to vector<512x32xf32>
    %22 = arith.mulf %20, %21 : vector<512x32xf32>
    %c0_10 = arith.constant 0 : index
    %c0_11 = arith.constant 0 : index
    %23 = vector.load %arg3[%c0_10, %c0_11] : memref<1x32xf32, #tpu.memory_space<vmem>>, vector<1x32xf32>
    %24 = vector.broadcast %23 : vector<1x32xf32> to vector<512x32xf32>
    %25 = arith.addf %22, %24 : vector<512x32xf32>
    %cst_12 = arith.constant 0.000000e+00 : f32
    %26 = vector.broadcast %cst_12 : f32 to vector<512x32xf32>
    %27 = arith.maximumf %25, %26 : vector<512x32xf32>
    %28 = vector.shape_cast %27 : vector<512x32xf32> to vector<64x8x32xf32>
    %29 = vector.extract_strided_slice %28 {offsets = [0, 0, 0], sizes = [64, 2, 32], strides = [1, 1, 1]} : vector<64x8x32xf32> to vector<64x2x32xf32>
    %30 = vector.extract_strided_slice %28 {offsets = [0, 2, 0], sizes = [64, 2, 32], strides = [1, 1, 1]} : vector<64x8x32xf32> to vector<64x2x32xf32>
    %31 = arith.maximumf %29, %30 : vector<64x2x32xf32>
    %32 = vector.extract_strided_slice %28 {offsets = [0, 4, 0], sizes = [64, 2, 32], strides = [1, 1, 1]} : vector<64x8x32xf32> to vector<64x2x32xf32>
    %33 = vector.extract_strided_slice %28 {offsets = [0, 6, 0], sizes = [64, 2, 32], strides = [1, 1, 1]} : vector<64x8x32xf32> to vector<64x2x32xf32>
    %34 = arith.maximumf %32, %33 : vector<64x2x32xf32>
    %35 = arith.maximumf %31, %34 : vector<64x2x32xf32>
    %c0_13 = arith.constant 0 : index
    %c0_14 = arith.constant 0 : index
    %c0_15 = arith.constant 0 : index
    %36 = vector.load %arg4[%c0_13, %c0_14, %c0_15] : memref<64x32x32xf32, #tpu.memory_space<vmem>>, vector<64x32x32xf32>
    "tpu.trace_start"() <{level = 10 : i32, message = "pbc,pcl->pbl"}> : () -> ()
    %cst_16 = arith.constant dense<0.000000e+00> : vector<64x2x32xf32>
    %37 = tpu.matmul %35, %36, %cst_16 {dimension_numbers = #tpu.dot_dimension_numbers<[2], [1], [1], [2], [0, 0, 0, 1, 1, 2], [0], [0]>} : vector<64x2x32xf32>, vector<64x32x32xf32>, vector<64x2x32xf32> -> vector<64x2x32xf32>
    "tpu.trace_stop"() : () -> ()
    %cst_17 = arith.constant dense<0.000000e+00> : vector<2x32xf32>
    %38 = vector.multi_reduction <add>, %37, %cst_17 [0] : vector<64x2x32xf32> to vector<2x32xf32>
    %c0_18 = arith.constant 0 : index
    %c0_19 = arith.constant 0 : index
    %39 = vector.load %arg5[%c0_18, %c0_19] : memref<1x32xf32, #tpu.memory_space<vmem>>, vector<1x32xf32>
    %40 = vector.broadcast %39 : vector<1x32xf32> to vector<2x32xf32>
    %41 = arith.addf %38, %40 : vector<2x32xf32>
    %c0_20 = arith.constant 0 : index
    %c0_21 = arith.constant 0 : index
    %42 = vector.load %arg6[%c0_20, %c0_21] : memref<2x32xf32, #tpu.memory_space<vmem>>, vector<2x32xf32>
    tpu.vector_store %arg6[%c0_20, %c0_21], %41 {strides = array<i32>} : memref<2x32xf32, #tpu.memory_space<vmem>>, vector<2x32xf32>,
    return
  }
}

</mosaic_0001>

<bundles_post_ra>
// kernel: tpu_custom_call.1
= control target key start
LH: loop header
LB: loop body
LE: loop exit
PB: predicated region body
PF: predicated region fallthrough
CT: control target
= control target key end

     0   :  { %s11056_s0 = inlined_call_operand.vmem [shape: bf16[512,128], index: 0, kind: input, shape index: {}]   ;;  %s11057_s1 = inlined_call_operand.vmem [shape: bf16[128,32], index: 1, kind: input, shape index: {}]   ;;  %s11058_s2 = inlined_call_operand.vmem [shape: f32[1,32], index: 2, kind: input, shape index: {}]   ;;  %s11059_s3 = inlined_call_operand.vmem [shape: f32[1,32], index: 3, kind: input, shape index: {}]   ;;  %s11060_s4 = inlined_call_operand.vmem [shape: f32[64,32,32], index: 4, kind: input, shape index: {}]   ;;  %s11061_s5 = inlined_call_operand.vmem [shape: f32[1,32], index: 5, kind: input, shape index: {}]   ;;  %s11062_s6 = inlined_call_operand.hbm [shape: f32[2,32], index: 6, kind: output, shape index: {}]  }
   0x1   :  { %v8469_v0 = vld [vmem:[%s11057_s1] sm:$0xff]   ;;  %v8470_v1 = vld [vmem:[%s11057_s1 + $0x8] sm:$0xff]   ;;  %v8471_v2 = vld [vmem:[%s11057_s1 + $0x10] sm:$0xff]  }
   0x2   :  { %7297 = vmatprep.subr.bf16.mxu0 %v8469_v0  ;;  %v8472_v3 = vld [vmem:[%s11057_s1 + $0x18] sm:$0xff]   ;;  %v8477_v4 = vld [vmem:[%s11056_s0] sm:$0xff]   ;;  %v8474_v6 = vld [vmem:[%s11057_s1 + $0x28] sm:$0xff]  }
   0x3   :  { %7298 = vmatpush3.bf16.msra.mxu0 %v8469_v0  ;;  %7313 = vmatprep.mubr.bf16.mxu0 %v8477_v4  ;;  %v8473_v5 = vld [vmem:[%s11057_s1 + $0x20] sm:$0xff]   ;;  %v8475_v7 = vld [vmem:[%s11057_s1 + $0x30] sm:$0xff]   ;;  %v8476_v8 = vld [vmem:[%s11057_s1 + $0x38] sm:$0xff]  }
   0x4   :  { %7299 = vmatprep.subr.bf16.mxu0 %v8470_v1  ;;  %v8478_v9 = vld [vmem:[%s11056_s0 + $0x8] sm:$0xff]   ;;  %v8479_v10 = vld [vmem:[%s11056_s0 + $0x10] sm:$0xff]   ;;  %v8480_v11 = vld [vmem:[%s11056_s0 + $0x18] sm:$0xff]  }
   0x5   :  { %v8481_v12 = vld [vmem:[%s11056_s0 + $0x20] sm:$0xff]  }
   0x7   :  { %7300 = vmatpush3.bf16.msra.mxu0 %v8470_v1 }
   0x8   :  { %7301 = vmatprep.subr.bf16.mxu0 %v8471_v2 }
   0xb   :  { %7302 = vmatpush3.bf16.msra.mxu0 %v8471_v2 }
   0xc   :  { %7303 = vmatprep.subr.bf16.mxu0 %v8472_v3 }
   0xf   :  { %7304 = vmatpush3.bf16.msra.mxu0 %v8472_v3 }
  0x10   :  { %7305 = vmatprep.subr.bf16.mxu0 %v8473_v5 }
  0x13   :  { %7306 = vmatpush3.bf16.msra.mxu0 %v8473_v5 }
  0x14   :  { %7307 = vmatprep.subr.bf16.mxu0 %v8474_v6 }
  0x17   :  { %7308 = vmatpush3.bf16.msra.mxu0 %v8474_v6 }
  0x18   :  { %7309 = vmatprep.subr.bf16.mxu0 %v8475_v7 }
  0x1b   :  { %7310 = vmatpush3.bf16.msra.mxu0 %v8475_v7 }
  0x1c   :  { %7311 = vmatprep.subr.bf16.mxu0 %v8476_v8 }
  0x1f   :  { %7312 = vmatpush3.bf16.msra.mxu0 %v8476_v8 }
  0x22   :  { %7314 = vmatmul.mubr.bf16.vlgmr.msra.gmra.mrb[0].mxu0 %v8478_v9 }
  0x23   :  { %7317 = vmatprep.mubr.bf16.mxu0 %v8479_v10 }
  0x24   :  { %11 = vsyncpa [#allocation3], 0  ;;  %v8482_v13 = vld [vmem:[%s11056_s0 + $0x28] sm:$0xff]   ;;  %v8483_v14 = vld [vmem:[%s11056_s0 + $0x30] sm:$0xff]   ;;  %vm634_vm0 = vcmask 261120   ;;  %vm8536_vm1 = vmmov 0  }
  0x25   :  { %v8484_v15 = vld [vmem:[%s11056_s0 + $0x38] sm:$0xff]   ;;  %v8485_v16 = vld [vmem:[%s11056_s0 + $0x40] sm:$0xff]   ;;  %v8486_v17 = vld [vmem:[%s11056_s0 + $0x48] sm:$0xff]   ;;  %vm6680_vm2 = vcmask 254976   ;;  %s8538_s14 = smov [#allocation2]  }
  0x26   :  { %v8487_v18 = vld [vmem:[%s11056_s0 + $0x50] sm:$0xff]   ;;  %v8488_v19 = vld [vmem:[%s11056_s0 + $0x58] sm:$0xff]   ;;  %v8489_v20 = vld [vmem:[%s11056_s0 + $0x60] sm:$0xff]   ;;  %s6823_s15 = sshll.u32 %s8538_s14, 4  ;;  %s6824_s15 = int_to_ptr.vmem [resolvable:$true] %s6823_s15 }
  0x27   :  { %v8490_v21 = vld [vmem:[%s11056_s0 + $0x68] sm:$0xff]   ;;  %v8491_v22 = vld [vmem:[%s11056_s0 + $0x70] sm:$0xff]   ;;  %v8492_v23 = vld [vmem:[%s11056_s0 + $0x78] sm:$0xff]   ;;  %s8511_s16 = scalar_lea.vmem %s6824_s15, 32  ;;  %p8516_p1 = scmp.lt.s32.totalorder %s6824_s15, %s6824_s15 }
  0x28   :  { %v8493_v24 = vld [vmem:[%s11056_s0 + $0x80] sm:$0xff]   ;;  %v8494_v25 = vld [vmem:[%s11056_s0 + $0x88] sm:$0xff]   ;;  %v8495_v26 = vld [vmem:[%s11056_s0 + $0x90] sm:$0xff]   ;;  %p8512_p0 = scmp.ne.s32.totalorder %s6824_s15, %s8511_s16  ;;  %p8517_p2 = scmp.lt.s32.totalorder %s8511_s16, %s8511_s16 }
  0x29   :  { %v8496_v27 = vld [vmem:[%s11056_s0 + $0x98] sm:$0xff]   ;;  %v8497_v28 = vld [vmem:[%s11056_s0 + $0xa0] sm:$0xff]   ;;  %v8498_v29 = vld [vmem:[%s11056_s0 + $0xa8] sm:$0xff]  }
  0x2a   :  { %7318 = vmatmul.mubr.bf16.gmra.mrb[4].mxu0 %v8480_v11  ;;  %v8499_v30 = vld [vmem:[%s11056_s0 + $0xb0] sm:$0xff]   ;;  %v8500_v31 = vld [vmem:[%s11056_s0 + $0xb8] sm:$0xff]   ;;  %v8501_v32 = vld [vmem:[%s11056_s0 + $0xc0] sm:$0xff]   ;;  %p8518_p3 = por %p8517_p2, %p8516_p1 }
  0x2b   :  { %7321 = vmatprep.mubr.bf16.mxu0 %v8481_v12  ;;  %v8502_v33 = vld [vmem:[%s11056_s0 + $0xc8] sm:$0xff]   ;;  %v8503_v34 = vld [vmem:[%s11056_s0 + $0xd0] sm:$0xff]   ;;  %v8504_v35 = vld [vmem:[%s11056_s0 + $0xd8] sm:$0xff]  }
  0x2c   :  { %v8505_v36 = vld [vmem:[%s11056_s0 + $0xe0] sm:$0xff]   ;;  %v8506_v37 = vld [vmem:[%s11056_s0 + $0xe8] sm:$0xff]   ;;  %v8507_v38 = vld [vmem:[%s11056_s0 + $0xf0] sm:$0xff]   ;;  %p8519_p4 = pnand %p8518_p3, %p8512_p0 }
  0x2d   :  { %v8508_v39 = vld [vmem:[%s11056_s0 + $0xf8] sm:$0xff]  }
  0x32   :  { %7322 = vmatmul.mubr.bf16.gmra.mrb[8].mxu0 %v8482_v13 }
  0x33   :  { %7325 = vmatprep.mubr.bf16.mxu0 %v8483_v14 }
  0x3a   :  { %7326 = vmatmul.mubr.bf16.gmra.mrb[12].mxu0 %v8484_v15 }
  0x3b   :  { %7329 = vmatprep.mubr.bf16.mxu0 %v8485_v16 }
  0x42   :  { %7330 = vmatmul.mubr.bf16.gmra.mrb[16].mxu0 %v8486_v17 }
  0x43   :  { %7333 = vmatprep.mubr.bf16.mxu0 %v8487_v18 }
  0x4a   :  { %7334 = vmatmul.mubr.bf16.gmra.mrb[20].mxu0 %v8488_v19 }
  0x4b   :  { %7337 = vmatprep.mubr.bf16.mxu0 %v8489_v20 }
  0x52   :  { %7338 = vmatmul.mubr.bf16.gmra.mrb[24].mxu0 %v8490_v21 }
  0x53   :  { %7341 = vmatprep.mubr.bf16.mxu0 %v8491_v22 }
  0x5a   :  { %7342 = vmatmul.mubr.bf16.gmra.mrb[28].mxu0 %v8492_v23 }
  0x5b   :  { %7345 = vmatprep.mubr.bf16.mxu0 %v8493_v24 }
  0x62   :  { %7346 = vmatmul.mubr.bf16.gmra.mrb[32].mxu0 %v8494_v25 }
  0x63   :  { %7349 = vmatprep.mubr.bf16.mxu0 %v8495_v26 }
  0x6a   :  { %7350 = vmatmul.mubr.bf16.gmra.mrb[36].mxu0 %v8496_v27 }
  0x6b   :  { %7353 = vmatprep.mubr.bf16.mxu0 %v8497_v28 }
  0x72   :  { %7354 = vmatmul.mubr.bf16.gmra.mrb[40].mxu0 %v8498_v29 }
  0x73   :  { %7357 = vmatprep.mubr.bf16.mxu0 %v8499_v30 }
  0x7a   :  { %7358 = vmatmul.mubr.bf16.gmra.mrb[44].mxu0 %v8500_v31 }
  0x7b   :  { %7361 = vmatprep.mubr.bf16.mxu0 %v8501_v32 }
  0x82   :  { %7362 = vmatmul.mubr.bf16.gmra.mrb[48].mxu0 %v8502_v33 }
  0x83   :  { %7365 = vmatprep.mubr.bf16.mxu0 %v8503_v34 }
  0x8a   :  { %7366 = vmatmul.mubr.bf16.gmra.mrb[52].mxu0 %v8504_v35 }
  0x8b   :  { %7369 = vmatprep.mubr.bf16.mxu0 %v8505_v36 }
  0x92   :  { %7370 = vmatmul.mubr.bf16.gmra.mrb[56].mxu0 %v8506_v37 }
  0x93   :  { %7373 = vmatprep.mubr.bf16.mxu0 %v8507_v38 }
  0x9a   :  { %7374 = vmatmul.mubr.bf16.gmra.mrb[60].mxu0 %v8508_v39 }
  0xf5   :  { %v8694_v40 = vpop.f32.mrb[0].mxu0 }
  0xf6   :  { %v8696_v41 = vpop.f32.mrb[1].mxu0  ;;  %v770_v45 = vmul.f32 %v8694_v40, %v8694_v40  ;;  %v638_v50 = vsel %vm634_vm0, %v8694_v40, 0.0 }
  0xf7   :  { %v768_v42 = vmul.f32 %v8696_v41, %v8696_v41  ;;  %v8700_v43 = vpop.f32.mrb[2].mxu0  ;;  %v635_v46 = vsel %vm634_vm0, %v8696_v41, 0.0 }
  0xf8   :  { %v8702_v44 = vpop.f32.mrb[3].mxu0  ;;  %v771_v52 = vmul.f32 %v8700_v43, %v8700_v43  ;;  %v835_v56 = vsel %vm634_vm0, %v770_v45, 0.0  ;;  %v640_v57 = vsel %vm634_vm0, %v8700_v43, 0.0 }
  0xf9   :  { %v636_v47 = vsel %vm634_vm0, %v8702_v44, 0.0  ;;  %v769_v48 = vmul.f32 %v8702_v44, %v8702_v44  ;;  %v832_v51 = vsel %vm634_vm0, %v768_v42, 0.0 }
  0xfa   :  { %v637_v49 = vadd.f32 %v636_v47, %v635_v46  ;;  %v837_v62 = vsel %vm634_vm0, %v771_v52, 0.0 }
  0xfb   :  { %v833_v53 = vsel %vm634_vm0, %v769_v48, 0.0 }
  0xfc   :  { %v639_v54 = vadd.f32 %v638_v50, %v637_v49  ;;  %v834_v55 = vadd.f32 %v833_v53, %v832_v51 }
  0xfd   :  { %v8721_v58 = vpop.f32.mrb[4].mxu0 }
  0xfe   :  { %v836_v59 = vadd.f32 %v835_v56, %v834_v55  ;;  %v8723_v60 = vpop.f32.mrb[5].mxu0  ;;  %v641_v61 = vadd.f32 %v640_v57, %v639_v54  ;;  %v774_v5 = vmul.f32 %v8721_v58, %v8721_v58  ;;  %v646_v11 = vsel %vm634_vm0, %v8721_v58, 0.0 }
  0xff   :  { %v642_v63 = vsel %vm634_vm0, %v8723_v60, 0.0  ;;  %v772_v0 = vmul.f32 %v8723_v60, %v8723_v60  ;;  %v8730_v1 = vpop.f32.mrb[6].mxu0 }
 0x100   :  { %v643_v2 = vadd.f32 %v642_v63, %v641_v61  ;;  %v838_v3 = vadd.f32 %v837_v62, %v836_v59  ;;  %v8732_v4 = vpop.f32.mrb[7].mxu0  ;;  %v775_v12 = vmul.f32 %v8730_v1, %v8730_v1  ;;  %v843_v16 = vsel %vm634_vm0, %v774_v5, 0.0 }
 0x101   :  { %v839_v6 = vsel %vm634_vm0, %v772_v0, 0.0  ;;  %v644_v7 = vsel %vm634_vm0, %v8732_v4, 0.0  ;;  %v773_v8 = vmul.f32 %v8732_v4, %v8732_v4  ;;  %v648_v17 = vsel %vm634_vm0, %v8730_v1, 0.0 }
 0x102   :  { %v840_v9 = vadd.f32 %v839_v6, %v838_v3  ;;  %v645_v10 = vadd.f32 %v644_v7, %v643_v2  ;;  %v845_v22 = vsel %vm634_vm0, %v775_v12, 0.0 }
 0x103   :  { %v841_v13 = vsel %vm634_vm0, %v773_v8, 0.0 }
 0x104   :  { %v647_v14 = vadd.f32 %v646_v11, %v645_v10  ;;  %v842_v15 = vadd.f32 %v841_v13, %v840_v9 }
 0x105   :  { %v8749_v18 = vpop.f32.mrb[8].mxu0 }
 0x106   :  { %v844_v19 = vadd.f32 %v843_v16, %v842_v15  ;;  %v8751_v20 = vpop.f32.mrb[9].mxu0  ;;  %v649_v21 = vadd.f32 %v648_v17, %v647_v14  ;;  %v778_v29 = vmul.f32 %v8749_v18, %v8749_v18  ;;  %v654_v35 = vsel %vm634_vm0, %v8749_v18, 0.0 }
 0x107   :  { %v650_v23 = vsel %vm634_vm0, %v8751_v20, 0.0  ;;  %v776_v24 = vmul.f32 %v8751_v20, %v8751_v20  ;;  %v8758_v25 = vpop.f32.mrb[10].mxu0 }
 0x108   :  { %v651_v26 = vadd.f32 %v650_v23, %v649_v21  ;;  %v846_v27 = vadd.f32 %v845_v22, %v844_v19  ;;  %v8760_v28 = vpop.f32.mrb[11].mxu0  ;;  %v779_v36 = vmul.f32 %v8758_v25, %v8758_v25  ;;  %v851_v42 = vsel %vm634_vm0, %v778_v29, 0.0 }
 0x109   :  { %v847_v30 = vsel %vm634_vm0, %v776_v24, 0.0  ;;  %v652_v31 = vsel %vm634_vm0, %v8760_v28, 0.0  ;;  %v777_v32 = vmul.f32 %v8760_v28, %v8760_v28  ;;  %v656_v45 = vsel %vm634_vm0, %v8758_v25, 0.0 }
 0x10a   :  { %v848_v33 = vadd.f32 %v847_v30, %v846_v27  ;;  %v653_v34 = vadd.f32 %v652_v31, %v651_v26  ;;  %v853_v50 = vsel %vm634_vm0, %v779_v36, 0.0 }
 0x10b   :  { %v849_v37 = vsel %vm634_vm0, %v777_v32, 0.0 }
 0x10c   :  { %v655_v38 = vadd.f32 %v654_v35, %v653_v34  ;;  %v850_v39 = vadd.f32 %v849_v37, %v848_v33 }
 0x10d   :  { %v8777_v46 = vpop.f32.mrb[12].mxu0 }
 0x10e   :  { %v852_v47 = vadd.f32 %v851_v42, %v850_v39  ;;  %v8779_v48 = vpop.f32.mrb[13].mxu0  ;;  %v657_v49 = vadd.f32 %v656_v45, %v655_v38  ;;  %v782_v57 = vmul.f32 %v8777_v46, %v8777_v46  ;;  %v662_v2 = vsel %vm634_vm0, %v8777_v46, 0.0 }
 0x10f   :  { %v658_v51 = vsel %vm634_vm0, %v8779_v48, 0.0  ;;  %v780_v52 = vmul.f32 %v8779_v48, %v8779_v48  ;;  %v8786_v53 = vpop.f32.mrb[14].mxu0 }
 0x110   :  { %v659_v54 = vadd.f32 %v658_v51, %v657_v49  ;;  %v854_v55 = vadd.f32 %v853_v50, %v852_v47  ;;  %v8788_v56 = vpop.f32.mrb[15].mxu0  ;;  %v783_v3 = vmul.f32 %v8786_v53, %v8786_v53  ;;  %v859_v8 = vsel %vm634_vm0, %v782_v57, 0.0 }
 0x111   :  { %v855_v59 = vsel %vm634_vm0, %v780_v52, 0.0  ;;  %v660_v61 = vsel %vm634_vm0, %v8788_v56, 0.0  ;;  %v781_v62 = vmul.f32 %v8788_v56, %v8788_v56  ;;  %v664_v9 = vsel %vm634_vm0, %v8786_v53, 0.0 }
 0x112   :  { %v856_v63 = vadd.f32 %v855_v59, %v854_v55  ;;  %v661_v0 = vadd.f32 %v660_v61, %v659_v54  ;;  %v861_v14 = vsel %vm634_vm0, %v783_v3, 0.0 }
 0x113   :  { %v857_v5 = vsel %vm634_vm0, %v781_v62, 0.0 }
 0x114   :  { %v663_v6 = vadd.f32 %v662_v2, %v661_v0  ;;  %v858_v7 = vadd.f32 %v857_v5, %v856_v63 }
 0x115   :  { %v8805_v10 = vpop.f32.mrb[16].mxu0 }
 0x116   :  { %v860_v11 = vadd.f32 %v859_v8, %v858_v7  ;;  %v8807_v12 = vpop.f32.mrb[17].mxu0  ;;  %v665_v13 = vadd.f32 %v664_v9, %v663_v6  ;;  %v786_v23 = vmul.f32 %v8805_v10, %v8805_v10  ;;  %v670_v31 = vsel %vm634_vm0, %v8805_v10, 0.0 }
 0x117   :  { %v666_v15 = vsel %vm634_vm0, %v8807_v12, 0.0  ;;  %v784_v16 = vmul.f32 %v8807_v12, %v8807_v12  ;;  %v8814_v17 = vpop.f32.mrb[18].mxu0 }
 0x118   :  { %v667_v19 = vadd.f32 %v666_v15, %v665_v13  ;;  %v862_v21 = vadd.f32 %v861_v14, %v860_v11  ;;  %v8816_v22 = vpop.f32.mrb[19].mxu0  ;;  %v787_v32 = vmul.f32 %v8814_v17, %v8814_v17  ;;  %v867_v36 = vsel %vm634_vm0, %v786_v23, 0.0 }
 0x119   :  { %v863_v24 = vsel %vm634_vm0, %v784_v16, 0.0  ;;  %v668_v26 = vsel %vm634_vm0, %v8816_v22, 0.0  ;;  %v785_v27 = vmul.f32 %v8816_v22, %v8816_v22  ;;  %v672_v37 = vsel %vm634_vm0, %v8814_v17, 0.0 }
 0x11a   :  { %v864_v29 = vadd.f32 %v863_v24, %v862_v21  ;;  %v669_v30 = vadd.f32 %v668_v26, %v667_v19  ;;  %v869_v47 = vsel %vm634_vm0, %v787_v32, 0.0 }
 0x11b   :  { %v865_v33 = vsel %vm634_vm0, %v785_v27, 0.0 }
 0x11c   :  { %v671_v34 = vadd.f32 %v670_v31, %v669_v30  ;;  %v866_v35 = vadd.f32 %v865_v33, %v864_v29 }
 0x11d   :  { %v8833_v38 = vpop.f32.mrb[20].mxu0 }
 0x11e   :  { %v868_v39 = vadd.f32 %v867_v36, %v866_v35  ;;  %v8835_v42 = vpop.f32.mrb[21].mxu0  ;;  %v673_v45 = vadd.f32 %v672_v37, %v671_v34  ;;  %v790_v57 = vmul.f32 %v8833_v38, %v8833_v38  ;;  %v678_v2 = vsel %vm634_vm0, %v8833_v38, 0.0 }
 0x11f   :  { %v674_v49 = vsel %vm634_vm0, %v8835_v42, 0.0  ;;  %v788_v50 = vmul.f32 %v8835_v42, %v8835_v42  ;;  %v8842_v51 = vpop.f32.mrb[22].mxu0 }
 0x120   :  { %v675_v52 = vadd.f32 %v674_v49, %v673_v45  ;;  %v870_v54 = vadd.f32 %v869_v47, %v868_v39  ;;  %v8844_v55 = vpop.f32.mrb[23].mxu0  ;;  %v791_v3 = vmul.f32 %v8842_v51, %v8842_v51  ;;  %v875_v8 = vsel %vm634_vm0, %v790_v57, 0.0 }
 0x121   :  { %v871_v59 = vsel %vm634_vm0, %v788_v50, 0.0  ;;  %v676_v61 = vsel %vm634_vm0, %v8844_v55, 0.0  ;;  %v789_v62 = vmul.f32 %v8844_v55, %v8844_v55  ;;  %v680_v9 = vsel %vm634_vm0, %v8842_v51, 0.0 }
 0x122   :  { %v872_v63 = vadd.f32 %v871_v59, %v870_v54  ;;  %v677_v0 = vadd.f32 %v676_v61, %v675_v52  ;;  %v877_v16 = vsel %vm634_vm0, %v791_v3, 0.0 }
 0x123   :  { %v873_v5 = vsel %vm634_vm0, %v789_v62, 0.0 }
 0x124   :  { %v679_v6 = vadd.f32 %v678_v2, %v677_v0  ;;  %v874_v7 = vadd.f32 %v873_v5, %v872_v63 }
 0x125   :  { %v8861_v11 = vpop.f32.mrb[24].mxu0 }
 0x126   :  { %v876_v13 = vadd.f32 %v875_v8, %v874_v7  ;;  %v8863_v14 = vpop.f32.mrb[25].mxu0  ;;  %v681_v15 = vadd.f32 %v680_v9, %v679_v6  ;;  %v794_v29 = vmul.f32 %v8861_v11, %v8861_v11  ;;  %v686_v35 = vsel %vm634_vm0, %v8861_v11, 0.0 }
 0x127   :  { %v682_v19 = vsel %vm634_vm0, %v8863_v14, 0.0  ;;  %v792_v21 = vmul.f32 %v8863_v14, %v8863_v14  ;;  %v8870_v23 = vpop.f32.mrb[26].mxu0 }
 0x128   :  { %v683_v24 = vadd.f32 %v682_v19, %v681_v15  ;;  %v878_v26 = vadd.f32 %v877_v16, %v876_v13  ;;  %v8872_v27 = vpop.f32.mrb[27].mxu0  ;;  %v795_v36 = vmul.f32 %v8870_v23, %v8870_v23  ;;  %v883_v47 = vsel %vm634_vm0, %v794_v29, 0.0 }
 0x129   :  { %v879_v30 = vsel %vm634_vm0, %v792_v21, 0.0  ;;  %v684_v31 = vsel %vm634_vm0, %v8872_v27, 0.0  ;;  %v793_v32 = vmul.f32 %v8872_v27, %v8872_v27  ;;  %v688_v49 = vsel %vm634_vm0, %v8870_v23, 0.0 }
 0x12a   :  { %v880_v33 = vadd.f32 %v879_v30, %v878_v26  ;;  %v685_v34 = vadd.f32 %v684_v31, %v683_v24  ;;  %v885_v59 = vsel %vm634_vm0, %v795_v36, 0.0 }
 0x12b   :  { %v881_v37 = vsel %vm634_vm0, %v793_v32, 0.0 }
 0x12c   :  { %v687_v39 = vadd.f32 %v686_v35, %v685_v34  ;;  %v882_v45 = vadd.f32 %v881_v37, %v880_v33 }
 0x12d   :  { %v8889_v50 = vpop.f32.mrb[28].mxu0 }
 0x12e   :  { %v884_v52 = vadd.f32 %v883_v47, %v882_v45  ;;  %v8891_v54 = vpop.f32.mrb[29].mxu0  ;;  %v689_v57 = vadd.f32 %v688_v49, %v687_v39  ;;  %v798_v5 = vmul.f32 %v8889_v50, %v8889_v50  ;;  %v694_v15 = vsel %vm634_vm0, %v8889_v50, 0.0 }
 0x12f   :  { %v690_v61 = vsel %vm634_vm0, %v8891_v54, 0.0  ;;  %v796_v62 = vmul.f32 %v8891_v54, %v8891_v54  ;;  %v8898_v63 = vpop.f32.mrb[30].mxu0 }
 0x130   :  { %v691_v0 = vadd.f32 %v690_v61, %v689_v57  ;;  %v886_v2 = vadd.f32 %v885_v59, %v884_v52  ;;  %v8900_v3 = vpop.f32.mrb[31].mxu0  ;;  %v799_v16 = vmul.f32 %v8898_v63, %v8898_v63  ;;  %v891_v26 = vsel %vm634_vm0, %v798_v5, 0.0 }
 0x131   :  { %v887_v6 = vsel %vm634_vm0, %v796_v62, 0.0  ;;  %v692_v7 = vsel %vm634_vm0, %v8900_v3, 0.0  ;;  %v797_v8 = vmul.f32 %v8900_v3, %v8900_v3  ;;  %v696_v29 = vsel %vm634_vm0, %v8898_v63, 0.0 }
 0x132   :  { %v888_v9 = vadd.f32 %v887_v6, %v886_v2  ;;  %v693_v13 = vadd.f32 %v692_v7, %v691_v0  ;;  %v893_v34 = vsel %vm634_vm0, %v799_v16, 0.0 }
 0x133   :  { %v889_v19 = vsel %vm634_vm0, %v797_v8, 0.0 }
 0x134   :  { %v695_v21 = vadd.f32 %v694_v15, %v693_v13  ;;  %v890_v24 = vadd.f32 %v889_v19, %v888_v9 }
 0x135   :  { %v8917_v30 = vpop.f32.mrb[32].mxu0 }
 0x136   :  { %v892_v31 = vadd.f32 %v891_v26, %v890_v24  ;;  %v8919_v32 = vpop.f32.mrb[33].mxu0  ;;  %v697_v33 = vadd.f32 %v696_v29, %v695_v21  ;;  %v802_v49 = vmul.f32 %v8917_v30, %v8917_v30  ;;  %v702_v0 = vsel %vm634_vm0, %v8917_v30, 0.0 }
 0x137   :  { %v698_v35 = vsel %vm634_vm0, %v8919_v32, 0.0  ;;  %v800_v36 = vmul.f32 %v8919_v32, %v8919_v32  ;;  %v8926_v37 = vpop.f32.mrb[34].mxu0 }
 0x138   :  { %v699_v39 = vadd.f32 %v698_v35, %v697_v33  ;;  %v894_v45 = vadd.f32 %v893_v34, %v892_v31  ;;  %v8928_v47 = vpop.f32.mrb[35].mxu0  ;;  %v803_v2 = vmul.f32 %v8926_v37, %v8926_v37  ;;  %v899_v8 = vsel %vm634_vm0, %v802_v49, 0.0 }
 0x139   :  { %v895_v52 = vsel %vm634_vm0, %v800_v36, 0.0  ;;  %v700_v57 = vsel %vm634_vm0, %v8928_v47, 0.0  ;;  %v801_v59 = vmul.f32 %v8928_v47, %v8928_v47  ;;  %v704_v9 = vsel %vm634_vm0, %v8926_v37, 0.0 }
 0x13a   :  { %v896_v61 = vadd.f32 %v895_v52, %v894_v45  ;;  %v701_v62 = vadd.f32 %v700_v57, %v699_v39  ;;  %v901_v21 = vsel %vm634_vm0, %v803_v2, 0.0 }
 0x13b   :  { %v897_v5 = vsel %vm634_vm0, %v801_v59, 0.0 }
 0x13c   :  { %v703_v6 = vadd.f32 %v702_v0, %v701_v62  ;;  %v898_v7 = vadd.f32 %v897_v5, %v896_v61 }
 0x13d   :  { %v8945_v13 = vpop.f32.mrb[36].mxu0 }
 0x13e   :  { %v900_v15 = vadd.f32 %v899_v8, %v898_v7  ;;  %v8947_v16 = vpop.f32.mrb[37].mxu0  ;;  %v705_v19 = vadd.f32 %v704_v9, %v703_v6  ;;  %v806_v35 = vmul.f32 %v8945_v13, %v8945_v13  ;;  %v710_v57 = vsel %vm634_vm0, %v8945_v13, 0.0 }
 0x13f   :  { %v706_v24 = vsel %vm634_vm0, %v8947_v16, 0.0  ;;  %v804_v26 = vmul.f32 %v8947_v16, %v8947_v16  ;;  %v8954_v29 = vpop.f32.mrb[38].mxu0 }
 0x140   :  { %v707_v31 = vadd.f32 %v706_v24, %v705_v19  ;;  %v902_v33 = vadd.f32 %v901_v21, %v900_v15  ;;  %v8956_v34 = vpop.f32.mrb[39].mxu0  ;;  %v807_v59 = vmul.f32 %v8954_v29, %v8954_v29  ;;  %v907_v2 = vsel %vm634_vm0, %v806_v35, 0.0 }
 0x141   :  { %v903_v36 = vsel %vm634_vm0, %v804_v26, 0.0  ;;  %v708_v39 = vsel %vm634_vm0, %v8956_v34, 0.0  ;;  %v805_v45 = vmul.f32 %v8956_v34, %v8956_v34  ;;  %v712_v5 = vsel %vm634_vm0, %v8954_v29, 0.0 }
 0x142   :  { %v904_v49 = vadd.f32 %v903_v36, %v902_v33  ;;  %v709_v52 = vadd.f32 %v708_v39, %v707_v31  ;;  %v909_v15 = vsel %vm634_vm0, %v807_v59, 0.0 }
 0x143   :  { %v905_v61 = vsel %vm634_vm0, %v805_v45, 0.0 }
 0x144   :  { %v711_v62 = vadd.f32 %v710_v57, %v709_v52  ;;  %v906_v0 = vadd.f32 %v905_v61, %v904_v49 }
 0x145   :  { %v8973_v6 = vpop.f32.mrb[40].mxu0 }
 0x146   :  { %v908_v7 = vadd.f32 %v907_v2, %v906_v0  ;;  %v8975_v8 = vpop.f32.mrb[41].mxu0  ;;  %v713_v9 = vadd.f32 %v712_v5, %v711_v62  ;;  %v810_v35 = vmul.f32 %v8973_v6, %v8973_v6  ;;  %v718_v57 = vsel %vm634_vm0, %v8973_v6, 0.0 }
 0x147   :  { %v714_v19 = vsel %vm634_vm0, %v8975_v8, 0.0  ;;  %v808_v21 = vmul.f32 %v8975_v8, %v8975_v8  ;;  %v8982_v24 = vpop.f32.mrb[42].mxu0 }
 0x148   :  { %11105 = vst [vmem:[#allocation5_spill] sm:$0xff] %v8982_v24  ;;  %v715_v26 = vadd.f32 %v714_v19, %v713_v9  ;;  %v910_v31 = vadd.f32 %v909_v15, %v908_v7  ;;  %v8984_v33 = vpop.f32.mrb[43].mxu0  ;;  %v811_v59 = vmul.f32 %v8982_v24, %v8982_v24  ;;  %v915_v2 = vsel %vm634_vm0, %v810_v35, 0.0 }
 0x149   :  { %v911_v36 = vsel %vm634_vm0, %v808_v21, 0.0  ;;  %v716_v39 = vsel %vm634_vm0, %v8984_v33, 0.0  ;;  %v809_v45 = vmul.f32 %v8984_v33, %v8984_v33  ;;  %v720_v5 = vsel %vm634_vm0, %v8982_v24, 0.0 }
 0x14a   :  { %v912_v49 = vadd.f32 %v911_v36, %v910_v31  ;;  %v717_v52 = vadd.f32 %v716_v39, %v715_v26  ;;  %v917_v21 = vsel %vm634_vm0, %v811_v59, 0.0 }
 0x14b   :  { %v913_v61 = vsel %vm634_vm0, %v809_v45, 0.0 }
 0x14c   :  { %v719_v62 = vadd.f32 %v718_v57, %v717_v52  ;;  %v914_v0 = vadd.f32 %v913_v61, %v912_v49 }
 0x14d   :  { %v9001_v7 = vpop.f32.mrb[44].mxu0 }
 0x14e   :  { %11106 = vst [vmem:[#allocation6_spill] sm:$0xff] %v9001_v7  ;;  %v916_v9 = vadd.f32 %v915_v2, %v914_v0  ;;  %v9003_v15 = vpop.f32.mrb[45].mxu0  ;;  %v721_v19 = vadd.f32 %v720_v5, %v719_v62  ;;  %v814_v49 = vmul.f32 %v9001_v7, %v9001_v7  ;;  %v726_v0 = vsel %vm634_vm0, %v9001_v7, 0.0 }
 0x14f   :  { %11107 = vst [vmem:[#allocation7_spill] sm:$0xff] %v9003_v15  ;;  %v722_v26 = vsel %vm634_vm0, %v9003_v15, 0.0  ;;  %v812_v31 = vmul.f32 %v9003_v15, %v9003_v15  ;;  %v9010_v36 = vpop.f32.mrb[46].mxu0 }
 0x150   :  { %11108 = vst [vmem:[#allocation8_spill] sm:$0xff] %v9010_v36  ;;  %v723_v35 = vadd.f32 %v722_v26, %v721_v19  ;;  %v918_v39 = vadd.f32 %v917_v21, %v916_v9  ;;  %v9012_v45 = vpop.f32.mrb[47].mxu0  ;;  %v815_v2 = vmul.f32 %v9010_v36, %v9010_v36  ;;  %v923_v21 = vsel %vm634_vm0, %v814_v49, 0.0 }
 0x151   :  { %11109 = vst [vmem:[#allocation9_spill] sm:$0xff] %v9012_v45  ;;  %v919_v52 = vsel %vm634_vm0, %v812_v31, 0.0  ;;  %v724_v57 = vsel %vm634_vm0, %v9012_v45, 0.0  ;;  %v813_v59 = vmul.f32 %v9012_v45, %v9012_v45  ;;  %v728_v26 = vsel %vm634_vm0, %v9010_v36, 0.0 }
 0x152   :  { %v920_v61 = vadd.f32 %v919_v52, %v918_v39  ;;  %v725_v62 = vadd.f32 %v724_v57, %v723_v35  ;;  %v925_v52 = vsel %vm634_vm0, %v815_v2, 0.0 }
 0x153   :  { %v921_v5 = vsel %vm634_vm0, %v813_v59, 0.0 }
 0x154   :  { %v727_v9 = vadd.f32 %v726_v0, %v725_v62  ;;  %v922_v19 = vadd.f32 %v921_v5, %v920_v61 }
 0x155   :  { %v9029_v31 = vpop.f32.mrb[48].mxu0 }
 0x156   :  { %11110 = vst [vmem:[#allocation10_spill] sm:$0xff] %v9029_v31  ;;  %v924_v45 = vadd.f32 %v923_v21, %v922_v19  ;;  %v9031_v39 = vpop.f32.mrb[49].mxu0  ;;  %v729_v35 = vadd.f32 %v728_v26, %v727_v9  ;;  %v818_v5 = vmul.f32 %v9029_v31, %v9029_v31 }
 0x157   :  { %11111 = vst [vmem:[#allocation11_spill] sm:$0xff] %v9031_v39  ;;  %v730_v57 = vsel %vm634_vm0, %v9031_v39, 0.0  ;;  %v816_v59 = vmul.f32 %v9031_v39, %v9031_v39  ;;  %v9038_v61 = vpop.f32.mrb[50].mxu0  ;;  %v734_v39 = vsel %vm634_vm0, %v9029_v31, 0.0 }
 0x158   :  { %11112 = vst [vmem:[#allocation12_spill] sm:$0xff] %v9038_v61  ;;  %v731_v49 = vadd.f32 %v730_v57, %v729_v35  ;;  %v926_v62 = vadd.f32 %v925_v52, %v924_v45  ;;  %v9040_v0 = vpop.f32.mrb[51].mxu0  ;;  %v819_v45 = vmul.f32 %v9038_v61, %v9038_v61  ;;  %v736_v36 = vsel %vm634_vm0, %v9038_v61, 0.0 }
 0x159   :  { %11113 = vst [vmem:[#allocation13_spill] sm:$0xff] %v9040_v0  ;;  %v927_v19 = vsel %vm634_vm0, %v816_v59, 0.0  ;;  %v732_v2 = vsel %vm634_vm0, %v9040_v0, 0.0  ;;  %v817_v9 = vmul.f32 %v9040_v0, %v9040_v0  ;;  %v931_v59 = vsel %vm634_vm0, %v818_v5, 0.0 }
 0x15a   :  { %v928_v21 = vadd.f32 %v927_v19, %v926_v62  ;;  %v733_v26 = vadd.f32 %v732_v2, %v731_v49  ;;  %v933_v19 = vsel %vm634_vm0, %v819_v45, 0.0 }
 0x15b   :  { %v929_v35 = vsel %vm634_vm0, %v817_v9, 0.0 }
 0x15c   :  { %v735_v52 = vadd.f32 %v734_v39, %v733_v26  ;;  %v930_v57 = vadd.f32 %v929_v35, %v928_v21 }
 0x15d   :  { %v9057_v7 = vpop.f32.mrb[52].mxu0 }
 0x15e   :  { %11114 = vst [vmem:[#allocation14_spill] sm:$0xff] %v9057_v7  ;;  %v932_v0 = vadd.f32 %v931_v59, %v930_v57  ;;  %v9059_v62 = vpop.f32.mrb[53].mxu0  ;;  %v737_v49 = vadd.f32 %v736_v36, %v735_v52  ;;  %v822_v35 = vmul.f32 %v9057_v7, %v9057_v7 }
 0x15f   :  { %11115 = vst [vmem:[#allocation15_spill] sm:$0xff] %v9059_v62  ;;  %v738_v2 = vsel %vm634_vm0, %v9059_v62, 0.0  ;;  %v820_v39 = vmul.f32 %v9059_v62, %v9059_v62  ;;  %v9066_v9 = vpop.f32.mrb[54].mxu0  ;;  %v742_v62 = vsel %vm634_vm0, %v9057_v7, 0.0 }
 0x160   :  { %11116 = vst [vmem:[#allocation16_spill] sm:$0xff] %v9066_v9  ;;  %v739_v5 = vadd.f32 %v738_v2, %v737_v49  ;;  %v934_v21 = vadd.f32 %v933_v19, %v932_v0  ;;  %v9068_v26 = vpop.f32.mrb[55].mxu0  ;;  %v823_v0 = vmul.f32 %v9066_v9, %v9066_v9  ;;  %v744_v61 = vsel %vm634_vm0, %v9066_v9, 0.0 }
 0x161   :  { %11117 = vst [vmem:[#allocation17_spill] sm:$0xff] %v9068_v26  ;;  %v935_v57 = vsel %vm634_vm0, %v820_v39, 0.0  ;;  %v740_v36 = vsel %vm634_vm0, %v9068_v26, 0.0  ;;  %v821_v45 = vmul.f32 %v9068_v26, %v9068_v26  ;;  %v939_v39 = vsel %vm634_vm0, %v822_v35, 0.0 }
 0x162   :  { %v936_v52 = vadd.f32 %v935_v57, %v934_v21  ;;  %v741_v59 = vadd.f32 %v740_v36, %v739_v5  ;;  %v941_v57 = vsel %vm634_vm0, %v823_v0, 0.0 }
 0x163   :  { %v937_v49 = vsel %vm634_vm0, %v821_v45, 0.0 }
 0x164   :  { %v743_v19 = vadd.f32 %v742_v62, %v741_v59  ;;  %v938_v2 = vadd.f32 %v937_v49, %v936_v52 }
 0x165   :  { %v9085_v31 = vpop.f32.mrb[56].mxu0 }
 0x166   :  { %11118 = vst [vmem:[#allocation18_spill] sm:$0xff] %v9085_v31  ;;  %v940_v26 = vadd.f32 %v939_v39, %v938_v2  ;;  %v9087_v21 = vpop.f32.mrb[57].mxu0  ;;  %v745_v5 = vadd.f32 %v744_v61, %v743_v19  ;;  %v826_v49 = vmul.f32 %v9085_v31, %v9085_v31 }
 0x167   :  { %11119 = vst [vmem:[#allocation19_spill] sm:$0xff] %v9087_v21  ;;  %v746_v36 = vsel %vm634_vm0, %v9087_v21, 0.0  ;;  %v824_v62 = vmul.f32 %v9087_v21, %v9087_v21  ;;  %v9094_v45 = vpop.f32.mrb[58].mxu0  ;;  %v750_v21 = vsel %vm634_vm0, %v9085_v31, 0.0 }
 0x168   :  { %11120 = vst [vmem:[#allocation20_spill] sm:$0xff] %v9094_v45  ;;  %v747_v35 = vadd.f32 %v746_v36, %v745_v5  ;;  %v942_v52 = vadd.f32 %v941_v57, %v940_v26  ;;  %v9096_v59 = vpop.f32.mrb[59].mxu0  ;;  %v827_v26 = vmul.f32 %v9094_v45, %v9094_v45  ;;  %v752_v9 = vsel %vm634_vm0, %v9094_v45, 0.0 }
 0x169   :  { %11121 = vst [vmem:[#allocation21_spill] sm:$0xff] %v9096_v59  ;;  %v943_v2 = vsel %vm634_vm0, %v824_v62, 0.0  ;;  %v748_v61 = vsel %vm634_vm0, %v9096_v59, 0.0  ;;  %v825_v0 = vmul.f32 %v9096_v59, %v9096_v59  ;;  %v947_v62 = vsel %vm634_vm0, %v826_v49, 0.0 }
 0x16a   :  { %v944_v19 = vadd.f32 %v943_v2, %v942_v52  ;;  %v749_v39 = vadd.f32 %v748_v61, %v747_v35  ;;  %v949_v2 = vsel %vm634_vm0, %v827_v26, 0.0  ;;  %v11101_v45 = vmov 0.0|0.0  }
 0x16b   :  { %v945_v5 = vsel %vm634_vm0, %v825_v0, 0.0  ;;  %8081 = vmatprep.subr.bf16.mxu1 %v11101_v45  ;;  %8195 = vmatprep.subr.bf16.mxu0 %v11101_v45 }
 0x16c   :  { %v751_v57 = vadd.f32 %v750_v21, %v749_v39  ;;  %v946_v36 = vadd.f32 %v945_v5, %v944_v19 }
 0x16d   :  { %v9113_v7 = vpop.f32.mrb[60].mxu0 }
 0x16e   :  { %11122 = vst [vmem:[#allocation22_spill] sm:$0xff] %v9113_v7  ;;  %v948_v59 = vadd.f32 %v947_v62, %v946_v36  ;;  %v9115_v52 = vpop.f32.mrb[61].mxu0  ;;  %v753_v35 = vadd.f32 %v752_v9, %v751_v57  ;;  %v830_v5 = vmul.f32 %v9113_v7, %v9113_v7 }
 0x16f   :  { %11123 = vst [vmem:[#allocation23_spill] sm:$0xff] %v9115_v52  ;;  %v754_v61 = vsel %vm634_vm0, %v9115_v52, 0.0  ;;  %v828_v21 = vmul.f32 %v9115_v52, %v9115_v52  ;;  %v9122_v0 = vpop.f32.mrb[62].mxu0  ;;  %v758_v52 = vsel %vm634_vm0, %v9113_v7, 0.0 }
 0x170   :  { %v755_v49 = vadd.f32 %v754_v61, %v753_v35  ;;  %v950_v19 = vadd.f32 %v949_v2, %v948_v59  ;;  %v9124_v39 = vpop.f32.mrb[63].mxu0  ;;  %v831_v59 = vmul.f32 %v9122_v0, %v9122_v0  ;;  %v1752_v2 = vld [vmem:[%s11060_s4] sm:$0xff]  ;;  %v1753_v61 = vld [vmem:[%s11060_s4 + $0x8] sm:$0xff]  ;;  %v760_v7 = vsel %vm634_vm0, %v9122_v0, 0.0 }
 0x171   :  { %v951_v36 = vsel %vm634_vm0, %v828_v21, 0.0  ;;  %v756_v9 = vsel %vm634_vm0, %v9124_v39, 0.0  ;;  %v829_v26 = vmul.f32 %v9124_v39, %v9124_v39  ;;  %v1828_v21 = vld [vmem:[%s11060_s4 + $0x260] sm:$0xff] }
 0x172   :  { %v952_v57 = vadd.f32 %v951_v36, %v950_v19  ;;  %v757_v62 = vadd.f32 %v756_v9, %v755_v49  ;;  %v8082_v36 = vpack.c.bf16 %v1753_v61, %v1752_v2  ;;  %v1829_v9 = vld [vmem:[%s11060_s4 + $0x268] sm:$0xff] }
 0x173   :  { %v953_v35 = vsel %vm634_vm0, %v829_v26, 0.0  ;;  %v955_v26 = vsel %vm634_vm0, %v830_v5, 0.0  ;;  %v8196_v31 = vpack.c.bf16 %v1829_v9, %v1828_v21  ;;  %v1754_v5 = vld [vmem:[%s11060_s4 + $0x10] sm:$0xff] }
 0x174   :  { %v759_v49 = vadd.f32 %v758_v52, %v757_v62  ;;  %v954_v19 = vadd.f32 %v953_v35, %v952_v57  ;;  %8083 = vmatpush3.bf16.msra.mxu1 %v8082_v36  ;;  %v957_v52 = vsel %vm634_vm0, %v831_v59, 0.0  ;;  %v1755_v57 = vld [vmem:[%s11060_s4 + $0x18] sm:$0xff]  ;;  %v1830_v62 = vld [vmem:[%s11060_s4 + $0x270] sm:$0xff] }
 0x175   :  { %8197 = vmatpush3.bf16.msra.mxu0 %v8196_v31  ;;  %8084 = vmatprep.subr.bf16.mxu1 %v11101_v45  ;;  %v8085_v59 = vpack.c.bf16 %v1755_v57, %v1754_v5  ;;  %v1831_v31 = vld [vmem:[%s11060_s4 + $0x278] sm:$0xff] }
 0x176   :  { %v761_v15 = vadd.f32 %v760_v7, %v759_v49  ;;  %v956_v24 = vadd.f32 %v955_v26, %v954_v19  ;;  %8198 = vmatprep.subr.bf16.mxu0 %v11101_v45  ;;  %v8199_v2 = vpack.c.bf16 %v1831_v31, %v1830_v62  ;;  %v11103_v49 = vmov 0.0  }
 0x177   :  { %7385 = vmatprep.mubr.msk.f32.mxu1 %vm8536_vm1, %v11103_v49  ;;  %7594 = vmatprep.mubr.msk.f32.mxu0 %vm8536_vm1, %v11103_v49  ;;  %v11141_v49 = vld [vmem:[#allocation23_spill] sm:$0xff] }
 0x178   :  { %v762_v7 = vrot.slane %v761_v15, 4  ;;  %v958_v35 = vadd.f32 %v957_v52, %v956_v24  ;;  %8086 = vmatpush3.bf16.msra.mxu1 %v8085_v59  ;;  %v1037_v24 = vlaneseq }
 0x179   :  { %8200 = vmatpush3.bf16.msra.mxu0 %v8199_v2  ;;  %8087 = vmatprep.subr.bf16.mxu1 %v11101_v45 }
 0x17a   :  { %v763_v61 = vadd.f32 %v762_v7, %v761_v15  ;;  %v959_v21 = vrot.slane %v958_v35, 4  ;;  %8207 = vmatprep.subr.bf16.mxu0 %v11101_v45  ;;  %v9176_v5 = vshrl.u32 %v1037_v24, 7 }
 0x17c   :  { %v764_v19 = vrot.slane %v763_v61, 2  ;;  %v960_v36 = vadd.f32 %v959_v21, %v958_v35  ;;  %v11139_v21 = vld [vmem:[#allocation18_spill] sm:$0xff]  ;;  %v11140_v35 = vld [vmem:[#allocation20_spill] sm:$0xff] }
 0x17e   :  { %v765_v9 = vadd.f32 %v764_v19, %v763_v61  ;;  %v961_v15 = vrot.slane %v960_v36, 2  ;;  %v11136_v19 = vld [vmem:[#allocation16_spill] sm:$0xff]  ;;  %v11138_v61 = vld [vmem:[#allocation21_spill] sm:$0xff] }
 0x180   :  { %v766_v26 = vrot.slane %v765_v9, 1  ;;  %v962_v52 = vadd.f32 %v961_v15, %v960_v36  ;;  %v11201_v36 = vld [vmem:[#allocation7_spill] sm:$0xff] }
 0x182   :  { %v767_v57 = vadd.f32 %v766_v26, %v765_v9  ;;  %v963_v62 = vrot.slane %v962_v52, 1  ;;  %v9321_v26 = vld [vmem:[%s11059_s3] ss:$0 sm:$0xff] }
 0x184   :  { %v964_v7 = vadd.f32 %v963_v62, %v962_v52  ;;  %v9178_v59 = vmul.f32 0.001953125, %v767_v57  ;;  %v11124_v62 = vld [vmem:[#allocation5_spill] sm:$0xff]  ;;  %v11142_v52 = vld [vmem:[#allocation22_spill] sm:$0xff] }
 0x186   :  { %v966_v31 = vmul.f32 0.001953125, %v964_v7  ;;  %v967_v2 = vmul.f32 %v9178_v59, %v9178_v59  ;;  %v11144_v9 = vsub.f32 %v9124_v39, %v9178_v59  ;;  %v11149_v39 = vsub.f32 %v8700_v43, %v9178_v59 }
 0x188   :  { %v968_v15 = vsub.f32 %v966_v31, %v967_v2 }
 0x18a   :  { %v969_v2 = vadd.f32 1.0, %v968_v15  ;;  %v971_v15 = vld [vmem:[%s11058_s2] sm:$0x1] }
 0x18c   :  { %8509 = vrsqrt.f32 %v969_v2  ;;  %v11143_v2 = vsub.s32 0, %v9176_v5  ;;  %v11146_v5 = vsub.f32 %v8702_v44, %v9178_v59 }
 0x196   :  { %v8510_v7 = vpop.eup %8509 }
 0x197   :  { %v972_v57 = vmul.f32 %v8510_v7, %v971_v15  ;;  %v11145_v7 = vsub.f32 %v8696_v41, %v9178_v59 }
 0x199   :  { %v9316_v31 = vrot.slane %v972_v57, %v11143_v2  ;;  %v11147_v2 = vsub.f32 %v8694_v40, %v9178_v59 }
 0x19b   :  { %v1102_v24 = vmul.f32 %v9316_v31, %v11144_v9  ;;  %v9331_v15 = vmul.f32 %v9316_v31, %v11145_v7  ;;  %v9337_v57 = vmul.f32 %v9316_v31, %v11146_v5  ;;  %v9343_v45 = vmul.f32 %v9316_v31, %v11147_v2 }
 0x19c   :  { %v9349_v41 = vmul.f32 %v9316_v31, %v11149_v39  ;;  %v11151_v9 = vsub.f32 %v8723_v60, %v9178_v59  ;;  %v11153_v7 = vsub.f32 %v8732_v4, %v9178_v59  ;;  %v11155_v5 = vsub.f32 %v8721_v58, %v9178_v59 }
 0x19d   :  { %11148 = vst [vmem:[#allocation5_spill] sm:$0xff] %v9343_v45  ;;  %v9370_v2 = vadd.f32 %v9321_v26, %v1102_v24  ;;  %v11158_v60 = vsub.f32 %v8730_v1, %v9178_v59  ;;  %v11160_v4 = vsub.f32 %v8751_v20, %v9178_v59  ;;  %v11161_v58 = vsub.f32 %v8760_v28, %v9178_v59 }
 0x19e   :  { %11150 = vst [vmem:[#allocation16_spill] sm:$0xff] %v9349_v41  ;;  %v9355_v44 = vmul.f32 %v9316_v31, %v11151_v9  ;;  %v9361_v40 = vmul.f32 %v9316_v31, %v11153_v7  ;;  %v9367_v43 = vmul.f32 %v9316_v31, %v11155_v5  ;;  %v11162_v24 = vsub.f32 %v8749_v18, %v9178_v59  ;;  %v11221_v41 = vld [vmem:[#allocation14_spill] sm:$0xff] }
 0x19f   :  { %11157 = vst [vmem:[#allocation23_spill] sm:$0xff] %v9370_v2  ;;  %v9376_v39 = vmul.f32 %v9316_v31, %v11158_v60  ;;  %v1049_v9 = vmul.f32 %v9316_v31, %v11160_v4  ;;  %v1050_v7 = vmul.f32 %v9316_v31, %v11161_v58  ;;  %v11163_v1 = vsub.f32 %v8758_v25, %v9178_v59  ;;  %v11203_v2 = vld [vmem:[#allocation9_spill] sm:$0xff] }
 0x1a0   :  { %11152 = vst [vmem:[#allocation21_spill] sm:$0xff] %v9355_v44  ;;  %11154 = vst [vmem:[#allocation18_spill] sm:$0xff] %v9361_v40  ;;  %v1051_v5 = vmul.f32 %v9316_v31, %v11162_v24  ;;  %v11164_v20 = vsub.f32 %v8779_v48, %v9178_v59  ;;  %v11165_v28 = vsub.f32 %v8788_v56, %v9178_v59  ;;  %v11213_v40 = vld [vmem:[#allocation10_spill] sm:$0xff]  ;;  %v11217_v44 = vld [vmem:[#allocation15_spill] sm:$0xff] }
 0x1a1   :  { %11156 = vst [vmem:[#allocation20_spill] sm:$0xff] %v9367_v43  ;;  %11159 = vst [vmem:[#allocation22_spill] sm:$0xff] %v9376_v39  ;;  %v1052_v60 = vmul.f32 %v9316_v31, %v11163_v1  ;;  %v11166_v18 = vsub.f32 %v8777_v46, %v9178_v59  ;;  %v11167_v25 = vsub.f32 %v8786_v53, %v9178_v59  ;;  %v11205_v39 = vld [vmem:[#allocation6_spill] sm:$0xff]  ;;  %v11209_v43 = vld [vmem:[#allocation11_spill] sm:$0xff] }
 0x1a2   :  { %v1053_v4 = vmul.f32 %v9316_v31, %v11164_v20  ;;  %v1054_v58 = vmul.f32 %v9316_v31, %v11165_v28  ;;  %v11168_v48 = vsub.f32 %v8807_v12, %v9178_v59  ;;  %v11169_v56 = vsub.f32 %v8816_v22, %v9178_v59 }
 0x1a3   :  { %v1055_v24 = vmul.f32 %v9316_v31, %v11166_v18  ;;  %v1056_v1 = vmul.f32 %v9316_v31, %v11167_v25  ;;  %v11170_v46 = vsub.f32 %v8805_v10, %v9178_v59  ;;  %v11171_v53 = vsub.f32 %v8814_v17, %v9178_v59 }
 0x1a4   :  { %v1057_v20 = vmul.f32 %v9316_v31, %v11168_v48  ;;  %v1058_v28 = vmul.f32 %v9316_v31, %v11169_v56  ;;  %v11172_v12 = vsub.f32 %v8835_v42, %v9178_v59  ;;  %v11173_v22 = vsub.f32 %v8844_v55, %v9178_v59 }
 0x1a5   :  { %v1059_v18 = vmul.f32 %v9316_v31, %v11170_v46  ;;  %v9426_v25 = vmul.f32 %v9316_v31, %v11171_v53  ;;  %v11174_v10 = vsub.f32 %v8833_v38, %v9178_v59  ;;  %v11175_v17 = vsub.f32 %v8842_v51, %v9178_v59 }
 0x1a6   :  { %v1061_v48 = vmul.f32 %v9316_v31, %v11172_v12  ;;  %v9436_v56 = vmul.f32 %v9316_v31, %v11173_v22  ;;  %v11176_v42 = vsub.f32 %v8863_v14, %v9178_v59  ;;  %v11177_v55 = vsub.f32 %v8872_v27, %v9178_v59 }
 0x1a7   :  { %v1063_v46 = vmul.f32 %v9316_v31, %v11174_v10  ;;  %v9446_v53 = vmul.f32 %v9316_v31, %v11175_v17  ;;  %v11179_v38 = vsub.f32 %v8861_v11, %v9178_v59  ;;  %v11180_v51 = vsub.f32 %v8870_v23, %v9178_v59 }
 0x1a8   :  { %v1065_v12 = vmul.f32 %v9316_v31, %v11176_v42  ;;  %v9456_v22 = vmul.f32 %v9316_v31, %v11177_v55  ;;  %v11182_v14 = vsub.f32 %v8891_v54, %v9178_v59  ;;  %v11183_v27 = vsub.f32 %v8900_v3, %v9178_v59 }
 0x1a9   :  { %v1067_v10 = vmul.f32 %v9316_v31, %v11179_v38  ;;  %v9466_v17 = vmul.f32 %v9316_v31, %v11180_v51  ;;  %v11185_v11 = vsub.f32 %v8889_v50, %v9178_v59  ;;  %v11186_v23 = vsub.f32 %v8898_v63, %v9178_v59 }
 0x1aa   :  { %11178 = vst [vmem:[#allocation24_spill] sm:$0xff] %v9456_v22  ;;  %v1069_v42 = vmul.f32 %v9316_v31, %v11182_v14  ;;  %v9476_v55 = vmul.f32 %v9316_v31, %v11183_v27  ;;  %v11188_v54 = vsub.f32 %v8919_v32, %v9178_v59  ;;  %v11189_v3 = vsub.f32 %v8928_v47, %v9178_v59  ;;  %v11224_v22 = vld [vmem:[#allocation19_spill] sm:$0xff] }
 0x1ab   :  { %11181 = vst [vmem:[#allocation25_spill] sm:$0xff] %v9466_v17  ;;  %v1071_v38 = vmul.f32 %v9316_v31, %v11185_v11  ;;  %v9486_v51 = vmul.f32 %v9316_v31, %v11186_v23  ;;  %v11191_v50 = vsub.f32 %v8917_v30, %v9178_v59  ;;  %v11192_v63 = vsub.f32 %v8926_v37, %v9178_v59  ;;  %v11219_v17 = vld [vmem:[#allocation17_spill] sm:$0xff] }
 0x1ac   :  { %11184 = vst [vmem:[#allocation26_spill] sm:$0xff] %v9476_v55  ;;  %v1073_v14 = vmul.f32 %v9316_v31, %v11188_v54  ;;  %v9496_v27 = vmul.f32 %v9316_v31, %v11189_v3  ;;  %v11193_v32 = vsub.f32 %v8947_v16, %v9178_v59  ;;  %v11194_v47 = vsub.f32 %v8956_v34, %v9178_v59  ;;  %v11215_v55 = vld [vmem:[#allocation12_spill] sm:$0xff] }
 0x1ad   :  { %11187 = vst [vmem:[#allocation27_spill] sm:$0xff] %v9486_v51  ;;  %v1075_v11 = vmul.f32 %v9316_v31, %v11191_v50  ;;  %v1076_v23 = vmul.f32 %v9316_v31, %v11192_v63  ;;  %v11195_v30 = vsub.f32 %v8945_v13, %v9178_v59  ;;  %v11196_v37 = vsub.f32 %v8954_v29, %v9178_v59  ;;  %v11211_v51 = vld [vmem:[#allocation13_spill] sm:$0xff] }
 0x1ae   :  { %11190 = vst [vmem:[#allocation28_spill] sm:$0xff] %v9496_v27  ;;  %v1077_v54 = vmul.f32 %v9316_v31, %v11193_v32  ;;  %v1078_v3 = vmul.f32 %v9316_v31, %v11194_v47  ;;  %v11197_v16 = vsub.f32 %v8975_v8, %v9178_v59  ;;  %v11198_v34 = vsub.f32 %v8984_v33, %v9178_v59  ;;  %v11207_v27 = vld [vmem:[#allocation8_spill] sm:$0xff] }
 0x1af   :  { %v1079_v50 = vmul.f32 %v9316_v31, %v11195_v30  ;;  %v1080_v63 = vmul.f32 %v9316_v31, %v11196_v37  ;;  %v11199_v13 = vsub.f32 %v8973_v6, %v9178_v59  ;;  %v11200_v29 = vsub.f32 %v11124_v62, %v9178_v59 }
 0x1b0   :  { %v1081_v32 = vmul.f32 %v9316_v31, %v11197_v16  ;;  %v1082_v47 = vmul.f32 %v9316_v31, %v11198_v34  ;;  %v11202_v8 = vsub.f32 %v11201_v36, %v9178_v59  ;;  %v11204_v33 = vsub.f32 %v11203_v2, %v9178_v59 }
 0x1b1   :  { %v1083_v30 = vmul.f32 %v9316_v31, %v11199_v13  ;;  %v1084_v37 = vmul.f32 %v9316_v31, %v11200_v29  ;;  %v11206_v6 = vsub.f32 %v11205_v39, %v9178_v59  ;;  %v11208_v62 = vsub.f32 %v11207_v27, %v9178_v59 }
 0x1b2   :  { %v1085_v16 = vmul.f32 %v9316_v31, %v11202_v8  ;;  %v1086_v34 = vmul.f32 %v9316_v31, %v11204_v33  ;;  %v11210_v36 = vsub.f32 %v11209_v43, %v9178_v59  ;;  %v11212_v2 = vsub.f32 %v11211_v51, %v9178_v59 }
 0x1b3   :  { %v1087_v13 = vmul.f32 %v9316_v31, %v11206_v6  ;;  %v1088_v29 = vmul.f32 %v9316_v31, %v11208_v62  ;;  %v11214_v39 = vsub.f32 %v11213_v40, %v9178_v59  ;;  %v11216_v27 = vsub.f32 %v11215_v55, %v9178_v59 }
 0x1b4   :  { %v1089_v8 = vmul.f32 %v9316_v31, %v11210_v36  ;;  %v1090_v33 = vmul.f32 %v9316_v31, %v11212_v2  ;;  %v11218_v43 = vsub.f32 %v11217_v44, %v9178_v59  ;;  %v11220_v51 = vsub.f32 %v11219_v17, %v9178_v59 }
 0x1b5   :  { %v1091_v6 = vmul.f32 %v9316_v31, %v11214_v39  ;;  %v1092_v62 = vmul.f32 %v9316_v31, %v11216_v27  ;;  %v11222_v40 = vsub.f32 %v11221_v41, %v9178_v59  ;;  %v11223_v55 = vsub.f32 %v11136_v19, %v9178_v59 }
 0x1b6   :  { %v1093_v36 = vmul.f32 %v9316_v31, %v11218_v43  ;;  %v1094_v2 = vmul.f32 %v9316_v31, %v11220_v51  ;;  %v11225_v44 = vsub.f32 %v11224_v22, %v9178_v59  ;;  %v11226_v17 = vsub.f32 %v11138_v61, %v9178_v59 }
 0x1b7   :  { %v1095_v39 = vmul.f32 %v9316_v31, %v11222_v40  ;;  %v1096_v27 = vmul.f32 %v9316_v31, %v11223_v55  ;;  %v11227_v41 = vsub.f32 %v11139_v21, %v9178_v59  ;;  %v11228_v19 = vsub.f32 %v11140_v35, %v9178_v59 }
 0x1b8   :  { %v1097_v43 = vmul.f32 %v9316_v31, %v11225_v44  ;;  %v1098_v51 = vmul.f32 %v9316_v31, %v11226_v17  ;;  %v11229_v22 = vsub.f32 %v11141_v49, %v9178_v59  ;;  %v11230_v61 = vsub.f32 %v11142_v52, %v9178_v59 }
 0x1b9   :  { %v1099_v40 = vmul.f32 %v9316_v31, %v11227_v41  ;;  %v1100_v55 = vmul.f32 %v9316_v31, %v11228_v19  ;;  %v11231_v21 = vsub.f32 %v9122_v0, %v9178_v59  ;;  %v9615_v45 = vadd.f32 %v9321_v26, %v1049_v9 }
 0x1ba   :  { %v1101_v44 = vmul.f32 %v9316_v31, %v11229_v22  ;;  %v1103_v17 = vmul.f32 %v9316_v31, %v11230_v61  ;;  %v9618_v35 = vadd.f32 %v9321_v26, %v1050_v7  ;;  %v9621_v49 = vadd.f32 %v9321_v26, %v1051_v5 }
 0x1bb   :  { %v1104_v41 = vmul.f32 %v9316_v31, %v11231_v21  ;;  %v9624_v19 = vadd.f32 %v9321_v26, %v1052_v60  ;;  %v9627_v52 = vadd.f32 %v9321_v26, %v1053_v4  ;;  %v9630_v22 = vadd.f32 %v9321_v26, %v1054_v58 }
 0x1bc   :  { %v9633_v0 = vadd.f32 %v9321_v26, %v1055_v24  ;;  %v9636_v59 = vadd.f32 %v9321_v26, %v1056_v1  ;;  %v9639_v31 = vadd.f32 %v9321_v26, %v1057_v20  ;;  %v9642_v9 = vadd.f32 %v9321_v26, %v1058_v28 }
 0x1bd   :  { %v9645_v7 = vadd.f32 %v9321_v26, %v1059_v18  ;;  %v9648_v5 = vadd.f32 %v9321_v26, %v1061_v48  ;;  %v9651_v60 = vadd.f32 %v9321_v26, %v1063_v46  ;;  %v9654_v4 = vadd.f32 %v9321_v26, %v1065_v12 }
 0x1be   :  { %v9657_v58 = vadd.f32 %v9321_v26, %v1067_v10  ;;  %v9660_v24 = vadd.f32 %v9321_v26, %v1069_v42  ;;  %v9663_v1 = vadd.f32 %v9321_v26, %v1071_v38  ;;  %v9666_v20 = vadd.f32 %v9321_v26, %v1073_v14 }
 0x1bf   :  { %v9669_v28 = vadd.f32 %v9321_v26, %v1075_v11  ;;  %v9672_v18 = vadd.f32 %v9321_v26, %v1076_v23  ;;  %v9675_v48 = vadd.f32 %v9321_v26, %v1077_v54  ;;  %v9678_v46 = vadd.f32 %v9321_v26, %v1078_v3 }
 0x1c0   :  { %v9681_v12 = vadd.f32 %v9321_v26, %v1079_v50  ;;  %v9684_v10 = vadd.f32 %v9321_v26, %v1080_v63  ;;  %v9687_v42 = vadd.f32 %v9321_v26, %v1081_v32  ;;  %v9690_v38 = vadd.f32 %v9321_v26, %v1082_v47 }
 0x1c1   :  { %v9693_v14 = vadd.f32 %v9321_v26, %v1083_v30  ;;  %v9696_v11 = vadd.f32 %v9321_v26, %v1084_v37  ;;  %v9699_v23 = vadd.f32 %v9321_v26, %v1085_v16  ;;  %v9702_v54 = vadd.f32 %v9321_v26, %v1086_v34 }
 0x1c2   :  { %v9705_v3 = vadd.f32 %v9321_v26, %v1087_v13  ;;  %v9708_v50 = vadd.f32 %v9321_v26, %v1088_v29  ;;  %v9711_v63 = vadd.f32 %v9321_v26, %v1089_v8  ;;  %v9714_v32 = vadd.f32 %v9321_v26, %v1090_v33 }
 0x1c3   :  { %11232 = vst [vmem:[#allocation7_spill] sm:$0xff] %v9699_v23  ;;  %v9717_v47 = vadd.f32 %v9321_v26, %v1091_v6  ;;  %v9720_v30 = vadd.f32 %v9321_v26, %v1092_v62  ;;  %v9723_v37 = vadd.f32 %v9321_v26, %v1093_v36  ;;  %v9726_v16 = vadd.f32 %v9321_v26, %v1094_v2 }
 0x1c4   :  { %11233 = vst [vmem:[#allocation9_spill] sm:$0xff] %v9705_v3  ;;  %11234 = vst [vmem:[#allocation6_spill] sm:$0xff] %v9711_v63  ;;  %v9729_v34 = vadd.f32 %v9321_v26, %v1095_v39  ;;  %v9732_v13 = vadd.f32 %v9321_v26, %v1096_v27  ;;  %v9735_v29 = vadd.f32 %v9321_v26, %v1097_v43  ;;  %v11245_v3 = vmov 0.0|0.0  }
 0x1c5   :  { %11235 = vst [vmem:[#allocation8_spill] sm:$0xff] %v9717_v47  ;;  %11236 = vst [vmem:[#allocation11_spill] sm:$0xff] %v9723_v37  ;;  %v9738_v8 = vadd.f32 %v9321_v26, %v1098_v51  ;;  %v9741_v33 = vadd.f32 %v9321_v26, %v1099_v40  ;;  %v9744_v6 = vadd.f32 %v9321_v26, %v1100_v55 }
 0x1c6   :  { %11237 = vst [vmem:[#allocation13_spill] sm:$0xff] %v9729_v34  ;;  %11238 = vst [vmem:[#allocation10_spill] sm:$0xff] %v9735_v29  ;;  %v9747_v62 = vadd.f32 %v9321_v26, %v1101_v44  ;;  %v9750_v36 = vadd.f32 %v9321_v26, %v1103_v17  ;;  %v9753_v2 = vadd.f32 %v9321_v26, %v1104_v41  ;;  %v1757_v29 = vld [vmem:[%s11060_s4 + $0x28] sm:$0xff]  ;;  %v1838_v34 = vld [vmem:[%s11060_s4 + $0x2b0] sm:$0xff] }
 0x1c7   :  { %11239 = vst [vmem:[#allocation12_spill] sm:$0xff] %v9741_v33  ;;  %v1131_v39 = vadd.f32 %v9321_v26, %v9426_v25  ;;  %v1112_v43 = vadd.f32 %v9321_v26, %v9331_v15  ;;  %v1133_v51 = vadd.f32 %v9321_v26, %v9436_v56  ;;  %v1113_v55 = vadd.f32 %v9321_v26, %v9337_v57  ;;  %v1836_v15 = vld [vmem:[%s11060_s4 + $0x2a0] sm:$0xff]  ;;  %v1837_v56 = vld [vmem:[%s11060_s4 + $0x2a8] sm:$0xff] }
 0x1c8   :  { %11240 = vst [vmem:[#allocation15_spill] sm:$0xff] %v9747_v62  ;;  %11241 = vst [vmem:[#allocation17_spill] sm:$0xff] %v9750_v36  ;;  %v1135_v21 = vadd.f32 %v9321_v26, %v9446_v53  ;;  %v11242_v62 = vld [vmem:[#allocation5_spill] sm:$0xff] }
 0x1c9   :  { %v1195_v27 = vmax.f32 %v1131_v39, 0.0  ;;  %v1176_v44 = vmax.f32 %v1112_v43, 0.0  ;;  %v1197_v61 = vmax.f32 %v1133_v51, 0.0  ;;  %v1177_v41 = vmax.f32 %v1113_v55, 0.0  ;;  %v1756_v53 = vld [vmem:[%s11060_s4 + $0x20] sm:$0xff] }
 0x1ca   :  { %v1114_v57 = vadd.f32 %v9321_v26, %v11242_v62  ;;  %v1199_v43 = vmax.f32 %v1135_v21, 0.0  ;;  %v1839_v62 = vld [vmem:[%s11060_s4 + $0x2b8] sm:$0xff] }
 0x1cb   :  { %v1323_v40 = vrot.slane %v1195_v27, 2  ;;  %v1304_v36 = vrot.slane %v1176_v44, 2  ;;  %v1325_v25 = vrot.slane %v1197_v61, 2  ;;  %v1305_v51 = vrot.slane %v1177_v41, 2 }
 0x1cd   :  { %v1451_v17 = vmax.f32 %v1195_v27, %v1323_v40  ;;  %v8208_v27 = vpack.c.bf16 %v1837_v56, %v1836_v15  ;;  %v1453_v40 = vmax.f32 %v1197_v61, %v1325_v25  ;;  %v1432_v33 = vmax.f32 %v1176_v44, %v1304_v36  ;;  %v11243_v15 = vld [vmem:[#allocation24_spill] sm:$0xff]  ;;  %v1758_v44 = vld [vmem:[%s11060_s4 + $0x30] sm:$0xff] }
 0x1ce   :  { %v1137_v61 = vadd.f32 %v9321_v26, %v11243_v15  ;;  %v8088_v36 = vpack.c.bf16 %v1757_v29, %v1756_v53  ;;  %v8211_v25 = vpack.c.bf16 %v1839_v62, %v1838_v34  ;;  %v1327_v56 = vrot.slane %v1199_v43, 2  ;;  %v1844_v29 = vld [vmem:[%s11060_s4 + $0x2e0] sm:$0xff]  ;;  %v1845_v34 = vld [vmem:[%s11060_s4 + $0x2e8] sm:$0xff] }
 0x1cf   :  { %v1579_v39 = vrot.slane %v1451_v17, 4  ;;  %v1560_v21 = vrot.slane %v1432_v33, 4  ;;  %v1433_v37 = vmax.f32 %v1177_v41, %v1305_v51  ;;  %v1581_v47 = vrot.slane %v1453_v40, 4  ;;  %v11246_v53 = vld [vmem:[#allocation16_spill] sm:$0xff] }
 0x1d0   :  { %v9806_v41 = vadd.f32 %v9321_v26, %v11246_v53  ;;  %v1760_v51 = vld [vmem:[%s11060_s4 + $0x40] sm:$0xff] }
 0x1d1   :  { %v1707_v55 = vmax.f32 %v1451_v17, %v1579_v39  ;;  %v1178_v17 = vmax.f32 %v1114_v57, 0.0  ;;  %v11244_v39 = vmov 0.0   ;;  %v1688_v63 = vmax.f32 %v1432_v33, %v1560_v21  ;;  %v1759_v57 = vld [vmem:[%s11060_s4 + $0x38] sm:$0xff] }
 0x1d2   :  { %v1201_v33 = vmax.f32 %v1137_v61, 0.0  ;;  %v1455_v21 = vmax.f32 %v1199_v43, %v1327_v56  ;;  %v1561_v15 = vrot.slane %v1433_v37, 4  ;;  %v1761_v61 = vld [vmem:[%s11060_s4 + $0x48] sm:$0xff]  ;;  %v1762_v56 = vld [vmem:[%s11060_s4 + $0x50] sm:$0xff] }
 0x1d3   :  { %7595 = vmatmul.mubr.msk.f32.vlgmr.msra.gmra.mrb[64].mxu0 %vm634_vm0, %v1707_v55  ;;  %7386 = vmatmul.mubr.msk.f32.vlgmr.msra.gmra.mrb[0].mxu1 %vm634_vm0, %v1688_v63  ;;  %v8220_v55 = vpack.c.bf16 %v1845_v34, %v1844_v29  ;;  %v1306_v62 = vrot.slane %v1178_v17, 2  ;;  %v1709_v63 = vmax.f32 %v1453_v40, %v1581_v47  ;;  %v11247_v43 = vld [vmem:[#allocation25_spill] sm:$0xff]  ;;  %v1179_v47 = vmax.f32 %v9806_v41, 0.0  ;;  %v1763_v41 = vld [vmem:[%s11060_s4 + $0x58] sm:$0xff] }
 0x1d4   :  { %8209 = vmatpush3.bf16.msra.mxu0 %v8208_v27  ;;  %7616 = vmatprep.mubr.msk.f32.mxu0 %vm8536_vm1, %v11244_v39  ;;  %v8091_v27 = vpack.c.bf16 %v1759_v57, %v1758_v44  ;;  %v1847_v44 = vld [vmem:[%s11060_s4 + $0x2f8] sm:$0xff]  ;;  %v8094_v40 = vpack.c.bf16 %v1761_v61, %v1760_v51  ;;  %v1329_v29 = vrot.slane %v1201_v33, 2  ;;  %v1583_v53 = vrot.slane %v1455_v21, 4  ;;  %v1853_v51 = vld [vmem:[%s11060_s4 + $0x328] sm:$0xff] }
 0x1d5   :  { %8210 = vmatprep.subr.bf16.mxu0 %v11245_v3  ;;  %8089 = vmatpush3.bf16.msra.mxu1 %v8088_v36  ;;  %v1846_v36 = vld [vmem:[%s11060_s4 + $0x2f0] sm:$0xff]  ;;  %v1434_v34 = vmax.f32 %v1178_v17, %v1306_v62  ;;  %v1689_v23 = vmax.f32 %v1433_v37, %v1561_v15  ;;  %v11248_v37 = vld [vmem:[#allocation21_spill] sm:$0xff]  ;;  %v8097_v62 = vpack.c.bf16 %v1763_v41, %v1762_v56  ;;  %v1307_v61 = vrot.slane %v1179_v47, 2 }
 0x1d6   :  { %8090 = vmatprep.subr.bf16.mxu1 %v11245_v3  ;;  %7396 = vmatprep.mubr.msk.f32.mxu1 %vm8536_vm1, %v11244_v39  ;;  %v8223_v57 = vpack.c.bf16 %v1847_v44, %v1846_v36  ;;  %v9849_v17 = vadd.f32 %v9321_v26, %v11248_v37  ;;  %v1764_v15 = vld [vmem:[%s11060_s4 + $0x60] sm:$0xff]  ;;  %v1457_v36 = vmax.f32 %v1201_v33, %v1329_v29  ;;  %v11249_v33 = vld [vmem:[#allocation26_spill] sm:$0xff] }
 0x1d7   :  { %v1562_v44 = vrot.slane %v1434_v34, 4  ;;  %v9871_v56 = vadd.f32 %v9321_v26, %v11249_v33  ;;  %v1766_v29 = vld [vmem:[%s11060_s4 + $0x70] sm:$0xff] }
 0x1d8   :  { %8212 = vmatpush3.bf16.msra.mxu0 %v8211_v25  ;;  %v9827_v25 = vadd.f32 %v9321_v26, %v11247_v43  ;;  %v1765_v43 = vld [vmem:[%s11060_s4 + $0x68] sm:$0xff] }
 0x1d9   :  { %8219 = vmatprep.subr.bf16.mxu0 %v11245_v3  ;;  %8092 = vmatpush3.bf16.msra.mxu1 %v8091_v27  ;;  %v1852_v27 = vld [vmem:[%s11060_s4 + $0x320] sm:$0xff]  ;;  %v1690_v37 = vmax.f32 %v1434_v34, %v1562_v44 }
 0x1da   :  { %8093 = vmatprep.subr.bf16.mxu1 %v11245_v3  ;;  %v1768_v44 = vld [vmem:[%s11060_s4 + $0x80] sm:$0xff] }
 0x1db   :  { %7617 = vmatmul.mubr.msk.f32.vlgmr.msra.gmra.mrb[66].mxu0 %vm634_vm0, %v1709_v63  ;;  %v8232_v63 = vpack.c.bf16 %v1853_v51, %v1852_v27  ;;  %v1435_v27 = vmax.f32 %v1179_v47, %v1307_v61  ;;  %v1585_v51 = vrot.slane %v1457_v36, 4  ;;  %v11250_v47 = vld [vmem:[#allocation18_spill] sm:$0xff] }
 0x1dc   :  { %8221 = vmatpush3.bf16.msra.mxu0 %v8220_v55  ;;  %7638 = vmatprep.mubr.msk.f32.mxu0 %vm8536_vm1, %v11244_v39  ;;  %v1203_v55 = vmax.f32 %v9827_v25, 0.0  ;;  %v1854_v25 = vld [vmem:[%s11060_s4 + $0x330] sm:$0xff]  ;;  %v9893_v34 = vadd.f32 %v9321_v26, %v11250_v47 }
 0x1dd   :  { %8222 = vmatprep.subr.bf16.mxu0 %v11245_v3  ;;  %7397 = vmatmul.mubr.msk.f32.vlgmr.msra.gmra.mrb[2].mxu1 %vm634_vm0, %v1689_v23  ;;  %v1711_v23 = vmax.f32 %v1455_v21, %v1583_v53  ;;  %v1180_v21 = vmax.f32 %v9849_v17, 0.0  ;;  %v1767_v17 = vld [vmem:[%s11060_s4 + $0x78] sm:$0xff]  ;;  %v1713_v33 = vmax.f32 %v1457_v36, %v1585_v51  ;;  %v1770_v51 = vld [vmem:[%s11060_s4 + $0x90] sm:$0xff] }
 0x1de   :  { %8095 = vmatpush3.bf16.msra.mxu1 %v8094_v40  ;;  %7407 = vmatprep.mubr.msk.f32.mxu1 %vm8536_vm1, %v11244_v39  ;;  %v1855_v40 = vld [vmem:[%s11060_s4 + $0x338] sm:$0xff]  ;;  %v1331_v41 = vrot.slane %v1203_v55, 2  ;;  %v8103_v61 = vpack.c.bf16 %v1767_v17, %v1766_v29  ;;  %v1181_v36 = vmax.f32 %v9893_v34, 0.0 }
 0x1df   :  { %8096 = vmatprep.subr.bf16.mxu1 %v11245_v3  ;;  %v8235_v53 = vpack.c.bf16 %v1855_v40, %v1854_v25  ;;  %v1563_v40 = vrot.slane %v1435_v27, 4  ;;  %v1863_v29 = vld [vmem:[%s11060_s4 + $0x378] sm:$0xff] }
 0x1e0   :  { %8224 = vmatpush3.bf16.msra.mxu0 %v8223_v57  ;;  %v8100_v57 = vpack.c.bf16 %v1765_v43, %v1764_v15  ;;  %v1861_v15 = vld [vmem:[%s11060_s4 + $0x368] sm:$0xff]  ;;  %v1308_v43 = vrot.slane %v1180_v21, 2  ;;  %v1459_v25 = vmax.f32 %v1203_v55, %v1331_v41  ;;  %v11251_v55 = vld [vmem:[#allocation27_spill] sm:$0xff] }
 0x1e1   :  { %8231 = vmatprep.subr.bf16.mxu0 %v11245_v3  ;;  %v1691_v47 = vmax.f32 %v1435_v27, %v1563_v40  ;;  %v1771_v34 = vld [vmem:[%s11060_s4 + $0x98] sm:$0xff]  ;;  %v1772_v40 = vld [vmem:[%s11060_s4 + $0xa0] sm:$0xff] }
 0x1e2   :  { %8098 = vmatpush3.bf16.msra.mxu1 %v8097_v62  ;;  %v1860_v62 = vld [vmem:[%s11060_s4 + $0x360] sm:$0xff] }
 0x1e3   :  { %7639 = vmatmul.mubr.msk.f32.vlgmr.msra.gmra.mrb[68].mxu0 %vm634_vm0, %v1711_v23  ;;  %8099 = vmatprep.subr.bf16.mxu1 %v11245_v3  ;;  %v8244_v23 = vpack.c.bf16 %v1861_v15, %v1860_v62  ;;  %v1436_v62 = vmax.f32 %v1180_v21, %v1308_v43  ;;  %v1587_v15 = vrot.slane %v1459_v25, 4  ;;  %v11252_v21 = vld [vmem:[#allocation20_spill] sm:$0xff]  ;;  %v8109_v43 = vpack.c.bf16 %v1771_v34, %v1770_v51 }
 0x1e4   :  { %8233 = vmatpush3.bf16.msra.mxu0 %v8232_v63  ;;  %7660 = vmatprep.mubr.msk.f32.mxu0 %vm8536_vm1, %v11244_v39  ;;  %v1205_v63 = vmax.f32 %v9871_v56, 0.0  ;;  %v1769_v56 = vld [vmem:[%s11060_s4 + $0x88] sm:$0xff]  ;;  %v1118_v27 = vadd.f32 %v9321_v26, %v11252_v21  ;;  %v1871_v51 = vld [vmem:[%s11060_s4 + $0x3b8] sm:$0xff] }
 0x1e5   :  { %8234 = vmatprep.subr.bf16.mxu0 %v11245_v3  ;;  %7408 = vmatmul.mubr.msk.f32.vlgmr.msra.gmra.mrb[4].mxu1 %vm634_vm0, %v1690_v37  ;;  %v8106_v41 = vpack.c.bf16 %v1769_v56, %v1768_v44  ;;  %v1869_v44 = vld [vmem:[%s11060_s4 + $0x3a8] sm:$0xff]  ;;  %v1309_v56 = vrot.slane %v1181_v36, 2 }
 0x1e6   :  { %8101 = vmatpush3.bf16.msra.mxu1 %v8100_v57  ;;  %7418 = vmatprep.mubr.msk.f32.mxu1 %vm8536_vm1, %v11244_v39  ;;  %v1862_v57 = vld [vmem:[%s11060_s4 + $0x370] sm:$0xff]  ;;  %v1333_v17 = vrot.slane %v1205_v63, 2 }
 0x1e7   :  { %8102 = vmatprep.subr.bf16.mxu1 %v11245_v3  ;;  %v8247_v37 = vpack.c.bf16 %v1863_v29, %v1862_v57  ;;  %v1564_v29 = vrot.slane %v1436_v62, 4 }
 0x1e8   :  { %8236 = vmatpush3.bf16.msra.mxu0 %v8235_v53  ;;  %v9915_v53 = vadd.f32 %v9321_v26, %v11251_v55  ;;  %v1461_v57 = vmax.f32 %v1205_v63, %v1333_v17  ;;  %v1715_v55 = vmax.f32 %v1459_v25, %v1587_v15  ;;  %v11253_v63 = vld [vmem:[#allocation28_spill] sm:$0xff]  ;;  %v1182_v25 = vmax.f32 %v1118_v27, 0.0  ;;  %v1774_v15 = vld [vmem:[%s11060_s4 + $0xb0] sm:$0xff] }
 0x1e9   :  { %8243 = vmatprep.subr.bf16.mxu0 %v11245_v3  ;;  %v1692_v21 = vmax.f32 %v1436_v62, %v1564_v29  ;;  %v1775_v27 = vld [vmem:[%s11060_s4 + $0xb8] sm:$0xff]  ;;  %v1776_v29 = vld [vmem:[%s11060_s4 + $0xc0] sm:$0xff] }
 0x1ea   :  { %8104 = vmatpush3.bf16.msra.mxu1 %v8103_v61  ;;  %v1868_v61 = vld [vmem:[%s11060_s4 + $0x3a0] sm:$0xff] }
 0x1eb   :  { %7661 = vmatmul.mubr.msk.f32.vlgmr.msra.gmra.mrb[70].mxu0 %vm634_vm0, %v1713_v33  ;;  %8105 = vmatprep.subr.bf16.mxu1 %v11245_v3  ;;  %v8256_v33 = vpack.c.bf16 %v1869_v44, %v1868_v61  ;;  %v1437_v61 = vmax.f32 %v1181_v36, %v1309_v56  ;;  %v1589_v44 = vrot.slane %v1461_v57, 4  ;;  %v11254_v36 = vld [vmem:[#allocation22_spill] sm:$0xff]  ;;  %v8115_v56 = vpack.c.bf16 %v1775_v27, %v1774_v15 }
 0x1ec   :  { %8245 = vmatpush3.bf16.msra.mxu0 %v8244_v23  ;;  %7682 = vmatprep.mubr.msk.f32.mxu0 %vm8536_vm1, %v11244_v39  ;;  %v1207_v23 = vmax.f32 %v9915_v53, 0.0  ;;  %v1773_v53 = vld [vmem:[%s11060_s4 + $0xa8] sm:$0xff]  ;;  %v1119_v62 = vadd.f32 %v9321_v26, %v11254_v36 }
 0x1ed   :  { %8246 = vmatprep.subr.bf16.mxu0 %v11245_v3  ;;  %7419 = vmatmul.mubr.msk.f32.vlgmr.msra.gmra.mrb[6].mxu1 %vm634_vm0, %v1691_v47  ;;  %v8112_v17 = vpack.c.bf16 %v1773_v53, %v1772_v40  ;;  %v1877_v40 = vld [vmem:[%s11060_s4 + $0x3e8] sm:$0xff]  ;;  %v1310_v53 = vrot.slane %v1182_v25, 2 }
 0x1ee   :  { %8107 = vmatpush3.bf16.msra.mxu1 %v8106_v41  ;;  %7429 = vmatprep.mubr.msk.f32.mxu1 %vm8536_vm1, %v11244_v39  ;;  %v1870_v41 = vld [vmem:[%s11060_s4 + $0x3b0] sm:$0xff]  ;;  %v1335_v34 = vrot.slane %v1207_v23, 2  ;;  %v1885_v36 = vld [vmem:[%s11060_s4 + $0x428] sm:$0xff] }
 0x1ef   :  { %8108 = vmatprep.subr.bf16.mxu1 %v11245_v3  ;;  %v8259_v47 = vpack.c.bf16 %v1871_v51, %v1870_v41  ;;  %v1565_v51 = vrot.slane %v1437_v61, 4 }
 0x1f0   :  { %8248 = vmatpush3.bf16.msra.mxu0 %v8247_v37  ;;  %v1145_v37 = vadd.f32 %v9321_v26, %v11253_v63  ;;  %v1463_v41 = vmax.f32 %v1207_v23, %v1335_v34  ;;  %v1717_v63 = vmax.f32 %v1461_v57, %v1589_v44  ;;  %v1777_v26 = vld [vmem:[%s11060_s4 + $0xc8] sm:$0xff]  ;;  %v1183_v23 = vmax.f32 %v1119_v62, 0.0  ;;  %v1778_v57 = vld [vmem:[%s11060_s4 + $0xd0] sm:$0xff]  ;;  %v1780_v62 = vld [vmem:[%s11060_s4 + $0xe0] sm:$0xff] }
 0x1f1   :  { %8255 = vmatprep.subr.bf16.mxu0 %v11245_v3  ;;  %v8118_v15 = vpack.c.bf16 %v1777_v26, %v1776_v29  ;;  %v1438_v44 = vmax.f32 %v1182_v25, %v1310_v53  ;;  %v1693_v27 = vmax.f32 %v1437_v61, %v1565_v51  ;;  %v1211_v25 = vmax.f32 %v9672_v18, 0.0  ;;  %v1781_v18 = vld [vmem:[%s11060_s4 + $0xe8] sm:$0xff]  ;;  %v1887_v26 = vld [vmem:[%s11060_s4 + $0x438] sm:$0xff] }
 0x1f2   :  { %8110 = vmatpush3.bf16.msra.mxu1 %v8109_v43  ;;  %v1876_v43 = vld [vmem:[%s11060_s4 + $0x3e0] sm:$0xff]  ;;  %v1311_v29 = vrot.slane %v1183_v23, 2 }
 0x1f3   :  { %7683 = vmatmul.mubr.msk.f32.vlgmr.msra.gmra.mrb[72].mxu0 %vm634_vm0, %v1715_v55  ;;  %8111 = vmatprep.subr.bf16.mxu1 %v11245_v3  ;;  %v8268_v55 = vpack.c.bf16 %v1877_v40, %v1876_v43  ;;  %v1779_v43 = vld [vmem:[%s11060_s4 + $0xd8] sm:$0xff]  ;;  %v1884_v40 = vld [vmem:[%s11060_s4 + $0x420] sm:$0xff]  ;;  %v1566_v53 = vrot.slane %v1438_v44, 4 }
 0x1f4   :  { %8257 = vmatpush3.bf16.msra.mxu0 %v8256_v33  ;;  %7704 = vmatprep.mubr.msk.f32.mxu0 %vm8536_vm1, %v11244_v39  ;;  %v1209_v33 = vmax.f32 %v1145_v37, 0.0  ;;  %v1878_v37 = vld [vmem:[%s11060_s4 + $0x3f0] sm:$0xff]  ;;  %v8121_v61 = vpack.c.bf16 %v1779_v43, %v1778_v57  ;;  %v1439_v57 = vmax.f32 %v1183_v23, %v1311_v29  ;;  %v1213_v23 = vmax.f32 %v9678_v46, 0.0  ;;  %v1784_v43 = vld [vmem:[%s11060_s4 + $0x100] sm:$0xff]  ;;  %v1785_v46 = vld [vmem:[%s11060_s4 + $0x108] sm:$0xff] }
 0x1f5   :  { %8258 = vmatprep.subr.bf16.mxu0 %v11245_v3  ;;  %7430 = vmatmul.mubr.msk.f32.vlgmr.msra.gmra.mrb[8].mxu1 %vm634_vm0, %v1692_v21  ;;  %v1591_v21 = vrot.slane %v1463_v41, 4  ;;  %v1894_v29 = vld [vmem:[%s11060_s4 + $0x470] sm:$0xff] }
 0x1f6   :  { %8113 = vmatpush3.bf16.msra.mxu1 %v8112_v17  ;;  %7440 = vmatprep.mubr.msk.f32.mxu1 %vm8536_vm1, %v11244_v39  ;;  %v1879_v17 = vld [vmem:[%s11060_s4 + $0x3f8] sm:$0xff]  ;;  %v1337_v34 = vrot.slane %v1209_v33, 2 }
 0x1f7   :  { %8114 = vmatprep.subr.bf16.mxu1 %v11245_v3  ;;  %v1719_v51 = vmax.f32 %v1463_v41, %v1591_v21  ;;  %v8124_v41 = vpack.c.bf16 %v1781_v18, %v1780_v62  ;;  %v1892_v21 = vld [vmem:[%s11060_s4 + $0x460] sm:$0xff]  ;;  %v1567_v62 = vrot.slane %v1439_v57, 4 }
 0x1f8   :  { %8260 = vmatpush3.bf16.msra.mxu0 %v8259_v47  ;;  %v8271_v47 = vpack.c.bf16 %v1879_v17, %v1878_v37  ;;  %v1782_v37 = vld [vmem:[%s11060_s4 + $0xf0] sm:$0xff] }
 0x1f9   :  { %8267 = vmatprep.subr.bf16.mxu0 %v11245_v3 }
 0x1fa   :  { %8116 = vmatpush3.bf16.msra.mxu1 %v8115_v56  ;;  %v8280_v56 = vpack.c.bf16 %v1885_v36, %v1884_v40 }
 0x1fb   :  { %7705 = vmatmul.mubr.msk.f32.vlgmr.msra.gmra.mrb[74].mxu0 %vm634_vm0, %v1717_v63  ;;  %8117 = vmatprep.subr.bf16.mxu1 %v11245_v3  ;;  %v1886_v63 = vld [vmem:[%s11060_s4 + $0x430] sm:$0xff] }
 0x1fc   :  { %8269 = vmatpush3.bf16.msra.mxu0 %v8268_v55  ;;  %7726 = vmatprep.mubr.msk.f32.mxu0 %vm8536_vm1, %v11244_v39  ;;  %v1465_v55 = vmax.f32 %v1209_v33, %v1337_v34  ;;  %v1184_v33 = vmax.f32 %v9615_v45, 0.0  ;;  %v8283_v17 = vpack.c.bf16 %v1887_v26, %v1886_v63  ;;  %v1694_v34 = vmax.f32 %v1438_v44, %v1566_v53  ;;  %v1783_v45 = vld [vmem:[%s11060_s4 + $0xf8] sm:$0xff] }
 0x1fd   :  { %8270 = vmatprep.subr.bf16.mxu0 %v11245_v3  ;;  %7441 = vmatmul.mubr.msk.f32.vlgmr.msra.gmra.mrb[10].mxu1 %vm634_vm0, %v1693_v27  ;;  %v1893_v27 = vld [vmem:[%s11060_s4 + $0x468] sm:$0xff]  ;;  %v8127_v44 = vpack.c.bf16 %v1783_v45, %v1782_v37  ;;  %v1895_v53 = vld [vmem:[%s11060_s4 + $0x478] sm:$0xff]  ;;  %v1341_v63 = vrot.slane %v1213_v23, 2  ;;  %v1695_v37 = vmax.f32 %v1439_v57, %v1567_v62 }
 0x1fe   :  { %8119 = vmatpush3.bf16.msra.mxu1 %v8118_v15  ;;  %7451 = vmatprep.mubr.msk.f32.mxu1 %vm8536_vm1, %v11244_v39  ;;  %v1339_v15 = vrot.slane %v1211_v25, 2  ;;  %v8292_v40 = vpack.c.bf16 %v1893_v27, %v1892_v21  ;;  %v1312_v36 = vrot.slane %v1184_v33, 2  ;;  %v8295_v18 = vpack.c.bf16 %v1895_v53, %v1894_v29 }
 0x1ff   :  { %8120 = vmatprep.subr.bf16.mxu1 %v11245_v3  ;;  %v1469_v21 = vmax.f32 %v1213_v23, %v1341_v63  ;;  %v1186_v23 = vmax.f32 %v9621_v49, 0.0  ;;  %v1791_v49 = vld [vmem:[%s11060_s4 + $0x138] sm:$0xff]  ;;  %v1792_v63 = vld [vmem:[%s11060_s4 + $0x140] sm:$0xff] }
 0x200   :  { %8272 = vmatpush3.bf16.msra.mxu0 %v8271_v47  ;;  %v1593_v47 = vrot.slane %v1465_v55, 4  ;;  %v1440_v26 = vmax.f32 %v1184_v33, %v1312_v36  ;;  %v1215_v33 = vmax.f32 %v9684_v10, 0.0  ;;  %v1789_v10 = vld [vmem:[%s11060_s4 + $0x128] sm:$0xff] }
 0x201   :  { %8279 = vmatprep.subr.bf16.mxu0 %v11245_v3  ;;  %v1597_v29 = vrot.slane %v1469_v21, 4 }
 0x202   :  { %8122 = vmatpush3.bf16.msra.mxu1 %v8121_v61  ;;  %v1467_v61 = vmax.f32 %v1211_v25, %v1339_v15  ;;  %v1185_v25 = vmax.f32 %v9618_v35, 0.0  ;;  %v1787_v35 = vld [vmem:[%s11060_s4 + $0x118] sm:$0xff]  ;;  %v1901_v15 = vld [vmem:[%s11060_s4 + $0x4a8] sm:$0xff]  ;;  %v1568_v27 = vrot.slane %v1440_v26, 4 }
 0x203   :  { %7727 = vmatmul.mubr.msk.f32.vlgmr.msra.gmra.mrb[76].mxu0 %vm634_vm0, %v1719_v51  ;;  %8123 = vmatprep.subr.bf16.mxu1 %v11245_v3  ;;  %v1786_v51 = vld [vmem:[%s11060_s4 + $0x110] sm:$0xff] }
 0x204   :  { %8281 = vmatpush3.bf16.msra.mxu0 %v8280_v56  ;;  %7748 = vmatprep.mubr.msk.f32.mxu0 %vm8536_vm1, %v11244_v39  ;;  %v1721_v56 = vmax.f32 %v1465_v55, %v1593_v47  ;;  %v8130_v55 = vpack.c.bf16 %v1785_v46, %v1784_v43  ;;  %v8133_v57 = vpack.c.bf16 %v1787_v35, %v1786_v51  ;;  %v1788_v47 = vld [vmem:[%s11060_s4 + $0x120] sm:$0xff]  ;;  %v1313_v45 = vrot.slane %v1185_v25, 2  ;;  %v1902_v43 = vld [vmem:[%s11060_s4 + $0x4b0] sm:$0xff]  ;;  %v1909_v51 = vld [vmem:[%s11060_s4 + $0x4e8] sm:$0xff] }
 0x205   :  { %8282 = vmatprep.subr.bf16.mxu0 %v11245_v3  ;;  %7452 = vmatmul.mubr.msk.f32.vlgmr.msra.gmra.mrb[12].mxu1 %vm634_vm0, %v1694_v34  ;;  %v8136_v36 = vpack.c.bf16 %v1789_v10, %v1788_v47  ;;  %v1696_v53 = vmax.f32 %v1440_v26, %v1568_v27 }
 0x206   :  { %8125 = vmatpush3.bf16.msra.mxu1 %v8124_v41  ;;  %7462 = vmatprep.mubr.msk.f32.mxu1 %vm8536_vm1, %v11244_v39  ;;  %v1595_v41 = vrot.slane %v1467_v61, 4  ;;  %v1441_v46 = vmax.f32 %v1185_v25, %v1313_v45  ;;  %v1217_v25 = vmax.f32 %v9690_v38, 0.0  ;;  %v1793_v38 = vld [vmem:[%s11060_s4 + $0x148] sm:$0xff] }
 0x207   :  { %8126 = vmatprep.subr.bf16.mxu1 %v11245_v3  ;;  %v8142_v47 = vpack.c.bf16 %v1793_v38, %v1792_v63  ;;  %v1925_v38 = vld [vmem:[%s11060_s4 + $0x568] sm:$0xff] }
 0x208   :  { %8284 = vmatpush3.bf16.msra.mxu0 %v8283_v17  ;;  %v1900_v17 = vld [vmem:[%s11060_s4 + $0x4a0] sm:$0xff]  ;;  %v1569_v35 = vrot.slane %v1441_v46, 4 }
 0x209   :  { %8291 = vmatprep.subr.bf16.mxu0 %v11245_v3  ;;  %v8304_v34 = vpack.c.bf16 %v1901_v15, %v1900_v17  ;;  %v1725_v17 = vmax.f32 %v1469_v21, %v1597_v29  ;;  %v1910_v15 = vld [vmem:[%s11060_s4 + $0x4f0] sm:$0xff]  ;;  %v1345_v21 = vrot.slane %v1217_v25, 2 }
 0x20a   :  { %8128 = vmatpush3.bf16.msra.mxu1 %v8127_v44  ;;  %v1723_v44 = vmax.f32 %v1467_v61, %v1595_v41  ;;  %v1790_v61 = vld [vmem:[%s11060_s4 + $0x130] sm:$0xff]  ;;  %v1314_v41 = vrot.slane %v1186_v23, 2  ;;  %v1697_v10 = vmax.f32 %v1441_v46, %v1569_v35 }
 0x20b   :  { %7749 = vmatmul.mubr.msk.f32.vlgmr.msra.gmra.mrb[78].mxu0 %vm634_vm0, %v1721_v56  ;;  %8129 = vmatprep.subr.bf16.mxu1 %v11245_v3  ;;  %v1343_v56 = vrot.slane %v1215_v33, 2  ;;  %v1473_v46 = vmax.f32 %v1217_v25, %v1345_v21 }
 0x20c   :  { %8293 = vmatpush3.bf16.msra.mxu0 %v8292_v40  ;;  %7770 = vmatprep.mubr.msk.f32.mxu0 %vm8536_vm1, %v11244_v39  ;;  %v1903_v40 = vld [vmem:[%s11060_s4 + $0x4b8] sm:$0xff]  ;;  %v1442_v27 = vmax.f32 %v1186_v23, %v1314_v41  ;;  %v1219_v23 = vmax.f32 %v9696_v11, 0.0  ;;  %v1797_v11 = vld [vmem:[%s11060_s4 + $0x168] sm:$0xff] }
 0x20d   :  { %8294 = vmatprep.subr.bf16.mxu0 %v11245_v3  ;;  %7463 = vmatmul.mubr.msk.f32.vlgmr.msra.gmra.mrb[14].mxu1 %vm634_vm0, %v1695_v37  ;;  %v8307_v62 = vpack.c.bf16 %v1903_v40, %v1902_v43  ;;  %v1471_v37 = vmax.f32 %v1215_v33, %v1343_v56  ;;  %v1187_v33 = vmax.f32 %v9624_v19, 0.0  ;;  %v1795_v19 = vld [vmem:[%s11060_s4 + $0x158] sm:$0xff]  ;;  %v1916_v43 = vld [vmem:[%s11060_s4 + $0x520] sm:$0xff]  ;;  %v1917_v40 = vld [vmem:[%s11060_s4 + $0x528] sm:$0xff] }
 0x20e   :  { %8131 = vmatpush3.bf16.msra.mxu1 %v8130_v55  ;;  %7473 = vmatprep.mubr.msk.f32.mxu1 %vm8536_vm1, %v11244_v39  ;;  %v1908_v55 = vld [vmem:[%s11060_s4 + $0x4e0] sm:$0xff]  ;;  %v1570_v29 = vrot.slane %v1442_v27, 4 }
 0x20f   :  { %8132 = vmatprep.subr.bf16.mxu1 %v11245_v3  ;;  %v8316_v26 = vpack.c.bf16 %v1909_v51, %v1908_v55  ;;  %v1315_v56 = vrot.slane %v1187_v33, 2  ;;  %v1919_v55 = vld [vmem:[%s11060_s4 + $0x538] sm:$0xff]  ;;  %v1188_v51 = vmax.f32 %v9627_v52, 0.0 }
 0x210   :  { %8296 = vmatpush3.bf16.msra.mxu0 %v8295_v18  ;;  %v8139_v18 = vpack.c.bf16 %v1791_v49, %v1790_v61  ;;  %v1796_v61 = vld [vmem:[%s11060_s4 + $0x160] sm:$0xff]  ;;  %v1918_v49 = vld [vmem:[%s11060_s4 + $0x530] sm:$0xff]  ;;  %v1698_v35 = vmax.f32 %v1442_v27, %v1570_v29  ;;  %v1799_v52 = vld [vmem:[%s11060_s4 + $0x178] sm:$0xff] }
 0x211   :  { %8303 = vmatprep.subr.bf16.mxu0 %v11245_v3  ;;  %v8148_v25 = vpack.c.bf16 %v1797_v11, %v1796_v61  ;;  %v8331_v63 = vpack.c.bf16 %v1919_v55, %v1918_v49  ;;  %v1443_v41 = vmax.f32 %v1187_v33, %v1315_v56  ;;  %v1800_v33 = vld [vmem:[%s11060_s4 + $0x180] sm:$0xff]  ;;  %v1933_v29 = vld [vmem:[%s11060_s4 + $0x5a8] sm:$0xff] }
 0x212   :  { %8134 = vmatpush3.bf16.msra.mxu1 %v8133_v57  ;;  %v1911_v57 = vld [vmem:[%s11060_s4 + $0x4f8] sm:$0xff]  ;;  %v1804_v49 = vld [vmem:[%s11060_s4 + $0x1a0] sm:$0xff] }
 0x213   :  { %7771 = vmatmul.mubr.msk.f32.vlgmr.msra.gmra.mrb[80].mxu0 %vm634_vm0, %v1723_v44  ;;  %8135 = vmatprep.subr.bf16.mxu1 %v11245_v3  ;;  %v8319_v45 = vpack.c.bf16 %v1911_v57, %v1910_v15  ;;  %v1599_v44 = vrot.slane %v1471_v37, 4  ;;  %v1221_v15 = vmax.f32 %v9702_v54, 0.0  ;;  %v1571_v21 = vrot.slane %v1443_v41, 4  ;;  %v1801_v54 = vld [vmem:[%s11060_s4 + $0x188] sm:$0xff] }
 0x214   :  { %8305 = vmatpush3.bf16.msra.mxu0 %v8304_v34  ;;  %7792 = vmatprep.mubr.msk.f32.mxu0 %vm8536_vm1, %v11244_v39  ;;  %v1794_v34 = vld [vmem:[%s11060_s4 + $0x150] sm:$0xff] }
 0x215   :  { %8306 = vmatprep.subr.bf16.mxu0 %v11245_v3  ;;  %7474 = vmatmul.mubr.msk.f32.vlgmr.msra.gmra.mrb[16].mxu1 %vm634_vm0, %v1696_v53  ;;  %v1727_v53 = vmax.f32 %v1471_v37, %v1599_v44  ;;  %v1601_v37 = vrot.slane %v1473_v46, 4  ;;  %v1926_v44 = vld [vmem:[%s11060_s4 + $0x570] sm:$0xff]  ;;  %v1699_v56 = vmax.f32 %v1443_v41, %v1571_v21  ;;  %v1935_v41 = vld [vmem:[%s11060_s4 + $0x5b8] sm:$0xff] }
 0x216   :  { %8137 = vmatpush3.bf16.msra.mxu1 %v8136_v36  ;;  %7484 = vmatprep.mubr.msk.f32.mxu1 %vm8536_vm1, %v11244_v39  ;;  %v8145_v36 = vpack.c.bf16 %v1795_v19, %v1794_v34  ;;  %v1316_v34 = vrot.slane %v1188_v51, 2  ;;  %v1189_v19 = vmax.f32 %v9630_v22, 0.0  ;;  %v1803_v22 = vld [vmem:[%s11060_s4 + $0x198] sm:$0xff] }
 0x217   :  { %8138 = vmatprep.subr.bf16.mxu1 %v11245_v3  ;;  %v1729_v27 = vmax.f32 %v1473_v46, %v1601_v37  ;;  %v1932_v46 = vld [vmem:[%s11060_s4 + $0x5a0] sm:$0xff]  ;;  %v1190_v37 = vmax.f32 %v9633_v0, 0.0  ;;  %v1807_v0 = vld [vmem:[%s11060_s4 + $0x1b8] sm:$0xff] }
 0x218   :  { %8308 = vmatpush3.bf16.msra.mxu0 %v8307_v62  ;;  %v8328_v62 = vpack.c.bf16 %v1917_v40, %v1916_v43  ;;  %v8154_v43 = vpack.c.bf16 %v1801_v54, %v1800_v33  ;;  %v1802_v40 = vld [vmem:[%s11060_s4 + $0x190] sm:$0xff]  ;;  %v1444_v61 = vmax.f32 %v1188_v51, %v1316_v34  ;;  %v8352_v55 = vpack.c.bf16 %v1933_v29, %v1932_v46  ;;  %v1941_v34 = vld [vmem:[%s11060_s4 + $0x5e8] sm:$0xff] }
 0x219   :  { %8315 = vmatprep.subr.bf16.mxu0 %v11245_v3  ;;  %v8157_v11 = vpack.c.bf16 %v1803_v22, %v1802_v40  ;;  %v1317_v51 = vrot.slane %v1189_v19, 2  ;;  %v1942_v40 = vld [vmem:[%s11060_s4 + $0x5f0] sm:$0xff] }
 0x21a   :  { %8140 = vmatpush3.bf16.msra.mxu1 %v8139_v18  ;;  %v1798_v18 = vld [vmem:[%s11060_s4 + $0x170] sm:$0xff] }
 0x21b   :  { %7793 = vmatmul.mubr.msk.f32.vlgmr.msra.gmra.mrb[82].mxu0 %vm634_vm0, %v1725_v17  ;;  %8141 = vmatprep.subr.bf16.mxu1 %v11245_v3  ;;  %v1924_v17 = vld [vmem:[%s11060_s4 + $0x560] sm:$0xff]  ;;  %v8151_v57 = vpack.c.bf16 %v1799_v52, %v1798_v18  ;;  %v1572_v18 = vrot.slane %v1444_v61, 4  ;;  %v1806_v52 = vld [vmem:[%s11060_s4 + $0x1b0] sm:$0xff] }
 0x21c   :  { %8317 = vmatpush3.bf16.msra.mxu0 %v8316_v26  ;;  %7814 = vmatprep.mubr.msk.f32.mxu0 %vm8536_vm1, %v11244_v39  ;;  %v1347_v26 = vrot.slane %v1219_v23, 2  ;;  %v8163_v21 = vpack.c.bf16 %v1807_v0, %v1806_v52  ;;  %v1192_v52 = vmax.f32 %v9639_v31, 0.0  ;;  %v1815_v31 = vld [vmem:[%s11060_s4 + $0x1f8] sm:$0xff] }
 0x21d   :  { %8318 = vmatprep.subr.bf16.mxu0 %v11245_v3  ;;  %7485 = vmatmul.mubr.msk.f32.vlgmr.msra.gmra.mrb[18].mxu1 %vm634_vm0, %v1697_v10  ;;  %v1927_v10 = vld [vmem:[%s11060_s4 + $0x578] sm:$0xff]  ;;  %v1700_v33 = vmax.f32 %v1444_v61, %v1572_v18 }
 0x21e   :  { %8143 = vmatpush3.bf16.msra.mxu1 %v8142_v47  ;;  %7495 = vmatprep.mubr.msk.f32.mxu1 %vm8536_vm1, %v11244_v39  ;;  %v8340_v47 = vpack.c.bf16 %v1925_v38, %v1924_v17 }
 0x21f   :  { %8144 = vmatprep.subr.bf16.mxu1 %v11245_v3 }
 0x220   :  { %8320 = vmatpush3.bf16.msra.mxu0 %v8319_v45  ;;  %v1475_v45 = vmax.f32 %v1219_v23, %v1347_v26  ;;  %v8343_v23 = vpack.c.bf16 %v1927_v10, %v1926_v44  ;;  %v1934_v26 = vld [vmem:[%s11060_s4 + $0x5b0] sm:$0xff]  ;;  %v1318_v44 = vrot.slane %v1190_v37, 2 }
 0x221   :  { %8327 = vmatprep.subr.bf16.mxu0 %v11245_v3  ;;  %v8355_v17 = vpack.c.bf16 %v1935_v41, %v1934_v26 }
 0x222   :  { %8146 = vmatpush3.bf16.msra.mxu1 %v8145_v36  ;;  %v1349_v36 = vrot.slane %v1221_v15, 2  ;;  %v1446_v46 = vmax.f32 %v1190_v37, %v1318_v44  ;;  %v1950_v37 = vld [vmem:[%s11060_s4 + $0x630] sm:$0xff] }
 0x223   :  { %7815 = vmatmul.mubr.msk.f32.vlgmr.msra.gmra.mrb[84].mxu0 %vm634_vm0, %v1727_v53  ;;  %8147 = vmatprep.subr.bf16.mxu1 %v11245_v3  ;;  %v1223_v53 = vmax.f32 %v9708_v50, 0.0  ;;  %v1805_v50 = vld [vmem:[%s11060_s4 + $0x1a8] sm:$0xff] }
 0x224   :  { %8329 = vmatpush3.bf16.msra.mxu0 %v8328_v62  ;;  %7836 = vmatprep.mubr.msk.f32.mxu0 %vm8536_vm1, %v11244_v39  ;;  %v1603_v62 = vrot.slane %v1475_v45, 4  ;;  %v1574_v26 = vrot.slane %v1446_v46, 4 }
 0x225   :  { %8330 = vmatprep.subr.bf16.mxu0 %v11245_v3  ;;  %7496 = vmatmul.mubr.msk.f32.vlgmr.msra.gmra.mrb[20].mxu1 %vm634_vm0, %v1698_v35  ;;  %v8160_v35 = vpack.c.bf16 %v1805_v50, %v1804_v49  ;;  %v1351_v38 = vrot.slane %v1223_v53, 2  ;;  %v1949_v49 = vld [vmem:[%s11060_s4 + $0x628] sm:$0xff] }
 0x226   :  { %8149 = vmatpush3.bf16.msra.mxu1 %v8148_v25  ;;  %7506 = vmatprep.mubr.msk.f32.mxu1 %vm8536_vm1, %v11244_v39  ;;  %v1477_v25 = vmax.f32 %v1221_v15, %v1349_v36  ;;  %v1445_v15 = vmax.f32 %v1189_v19, %v1317_v51  ;;  %v1191_v36 = vmax.f32 %v9636_v59, 0.0  ;;  %v1811_v59 = vld [vmem:[%s11060_s4 + $0x1d8] sm:$0xff] }
 0x227   :  { %8150 = vmatprep.subr.bf16.mxu1 %v11245_v3  ;;  %v1479_v10 = vmax.f32 %v1223_v53, %v1351_v38  ;;  %v1814_v38 = vld [vmem:[%s11060_s4 + $0x1f0] sm:$0xff] }
 0x228   :  { %8332 = vmatpush3.bf16.msra.mxu0 %v8331_v63  ;;  %v1731_v63 = vmax.f32 %v1475_v45, %v1603_v62  ;;  %v1225_v45 = vmax.f32 %v9714_v32, 0.0  ;;  %v1573_v19 = vrot.slane %v1445_v15, 4  ;;  %v1809_v32 = vld [vmem:[%s11060_s4 + $0x1c8] sm:$0xff]  ;;  %v1810_v62 = vld [vmem:[%s11060_s4 + $0x1d0] sm:$0xff] }
 0x229   :  { %8339 = vmatprep.subr.bf16.mxu0 %v11245_v3  ;;  %v1607_v29 = vrot.slane %v1479_v10, 4  ;;  %v8169_v51 = vpack.c.bf16 %v1811_v59, %v1810_v62  ;;  %v1818_v62 = vld [vmem:[%s11060_s4 + $0x210] sm:$0xff]  ;;  %v1964_v59 = vld [vmem:[%s11060_s4 + $0x6a0] sm:$0xff] }
 0x22a   :  { %8152 = vmatpush3.bf16.msra.mxu1 %v8151_v57  ;;  %v1605_v57 = vrot.slane %v1477_v25, 4  ;;  %v1353_v22 = vrot.slane %v1225_v45, 2  ;;  %v1701_v53 = vmax.f32 %v1445_v15, %v1573_v19 }
 0x22b   :  { %7837 = vmatmul.mubr.msk.f32.vlgmr.msra.gmra.mrb[86].mxu0 %vm634_vm0, %v1729_v27  ;;  %8153 = vmatprep.subr.bf16.mxu1 %v11245_v3  ;;  %v1808_v27 = vld [vmem:[%s11060_s4 + $0x1c0] sm:$0xff]  ;;  %v1735_v41 = vmax.f32 %v1479_v10, %v1607_v29  ;;  %v1320_v10 = vrot.slane %v1192_v52, 2 }
 0x22c   :  { %8341 = vmatpush3.bf16.msra.mxu0 %v8340_v47  ;;  %7858 = vmatprep.mubr.msk.f32.mxu0 %vm8536_vm1, %v11244_v39  ;;  %v1940_v47 = vld [vmem:[%s11060_s4 + $0x5e0] sm:$0xff]  ;;  %v8166_v61 = vpack.c.bf16 %v1809_v32, %v1808_v27  ;;  %v1481_v50 = vmax.f32 %v1225_v45, %v1353_v22  ;;  %v1957_v45 = vld [vmem:[%s11060_s4 + $0x668] sm:$0xff]  ;;  %v8175_v27 = vpack.c.bf16 %v1815_v31, %v1814_v38  ;;  %v1233_v31 = vmax.f32 %v9738_v8, 0.0 }
 0x22d   :  { %8342 = vmatprep.subr.bf16.mxu0 %v11245_v3  ;;  %7507 = vmatmul.mubr.msk.f32.vlgmr.msra.gmra.mrb[22].mxu1 %vm634_vm0, %v1699_v56  ;;  %v8364_v54 = vpack.c.bf16 %v1941_v34, %v1940_v47  ;;  %v1702_v47 = vmax.f32 %v1446_v46, %v1574_v26  ;;  %v1956_v34 = vld [vmem:[%s11060_s4 + $0x660] sm:$0xff]  ;;  %v1448_v46 = vmax.f32 %v1192_v52, %v1320_v10  ;;  %v1822_v52 = vld [vmem:[%s11060_s4 + $0x230] sm:$0xff]  ;;  %v1825_v8 = vld [vmem:[%s11060_s4 + $0x248] sm:$0xff] }
 0x22e   :  { %8155 = vmatpush3.bf16.msra.mxu1 %v8154_v43  ;;  %7517 = vmatprep.mubr.msk.f32.mxu1 %vm8536_vm1, %v11244_v39  ;;  %v1733_v43 = vmax.f32 %v1477_v25, %v1605_v57  ;;  %v1812_v25 = vld [vmem:[%s11060_s4 + $0x1e0] sm:$0xff]  ;;  %v1609_v0 = vrot.slane %v1481_v50, 4  ;;  %v8388_v44 = vpack.c.bf16 %v1957_v45, %v1956_v34 }
 0x22f   :  { %8156 = vmatprep.subr.bf16.mxu1 %v11245_v3  ;;  %v1824_v45 = vld [vmem:[%s11060_s4 + $0x240] sm:$0xff] }
 0x230   :  { %8344 = vmatpush3.bf16.msra.mxu0 %v8343_v23  ;;  %v1943_v23 = vld [vmem:[%s11060_s4 + $0x5f8] sm:$0xff]  ;;  %v1737_v32 = vmax.f32 %v1481_v50, %v1609_v0  ;;  %v1576_v50 = vrot.slane %v1448_v46, 4  ;;  %v1972_v0 = vld [vmem:[%s11060_s4 + $0x6e0] sm:$0xff] }
 0x231   :  { %8351 = vmatprep.subr.bf16.mxu0 %v11245_v3  ;;  %v8367_v56 = vpack.c.bf16 %v1943_v23, %v1942_v40  ;;  %v1958_v40 = vld [vmem:[%s11060_s4 + $0x670] sm:$0xff]  ;;  %v1959_v23 = vld [vmem:[%s11060_s4 + $0x678] sm:$0xff] }
 0x232   :  { %8158 = vmatpush3.bf16.msra.mxu1 %v8157_v11  ;;  %v1948_v11 = vld [vmem:[%s11060_s4 + $0x620] sm:$0xff] }
 0x233   :  { %7859 = vmatmul.mubr.msk.f32.vlgmr.msra.gmra.mrb[88].mxu0 %vm634_vm0, %v1731_v63  ;;  %8159 = vmatprep.subr.bf16.mxu1 %v11245_v3  ;;  %v8376_v18 = vpack.c.bf16 %v1949_v49, %v1948_v11  ;;  %v1319_v63 = vrot.slane %v1191_v36, 2  ;;  %v1965_v11 = vld [vmem:[%s11060_s4 + $0x6a8] sm:$0xff]  ;;  %v1231_v49 = vmax.f32 %v9732_v13, 0.0 }
 0x234   :  { %8353 = vmatpush3.bf16.msra.mxu0 %v8352_v55  ;;  %7880 = vmatprep.mubr.msk.f32.mxu0 %vm8536_vm1, %v11244_v39  ;;  %v1227_v55 = vmax.f32 %v9720_v30, 0.0  ;;  %v1813_v30 = vld [vmem:[%s11060_s4 + $0x1e8] sm:$0xff] }
 0x235   :  { %8354 = vmatprep.subr.bf16.mxu0 %v11245_v3  ;;  %7518 = vmatmul.mubr.msk.f32.vlgmr.msra.gmra.mrb[24].mxu1 %vm634_vm0, %v1700_v33  ;;  %v1447_v33 = vmax.f32 %v1191_v36, %v1319_v63  ;;  %v1193_v36 = vmax.f32 %v9642_v9, 0.0  ;;  %v1819_v9 = vld [vmem:[%s11060_s4 + $0x218] sm:$0xff]  ;;  %v1821_v13 = vld [vmem:[%s11060_s4 + $0x228] sm:$0xff]  ;;  %v1359_v38 = vrot.slane %v1231_v49, 2 }
 0x236   :  { %8161 = vmatpush3.bf16.msra.mxu1 %v8160_v35  ;;  %7528 = vmatprep.mubr.msk.f32.mxu1 %vm8536_vm1, %v11244_v39  ;;  %v1951_v35 = vld [vmem:[%s11060_s4 + $0x638] sm:$0xff]  ;;  %v1355_v57 = vrot.slane %v1227_v55, 2 }
 0x237   :  { %8162 = vmatprep.subr.bf16.mxu1 %v11245_v3  ;;  %v8379_v15 = vpack.c.bf16 %v1951_v35, %v1950_v37  ;;  %v1194_v37 = vmax.f32 %v9645_v7, 0.0  ;;  %v1823_v7 = vld [vmem:[%s11060_s4 + $0x238] sm:$0xff] }
 0x238   :  { %8356 = vmatpush3.bf16.msra.mxu0 %v8355_v17  ;;  %v8172_v17 = vpack.c.bf16 %v1813_v30, %v1812_v25  ;;  %v1483_v19 = vmax.f32 %v1227_v55, %v1355_v57  ;;  %v8181_v55 = vpack.c.bf16 %v1819_v9, %v1818_v62  ;;  %v8400_v25 = vpack.c.bf16 %v1965_v11, %v1964_v59  ;;  %v1967_v30 = vld [vmem:[%s11060_s4 + $0x6b8] sm:$0xff]  ;;  %v1832_v9 = vld [vmem:[%s11060_s4 + $0x280] sm:$0xff] }
 0x239   :  { %8363 = vmatprep.subr.bf16.mxu0 %v11245_v3  ;;  %v8187_v34 = vpack.c.bf16 %v1823_v7, %v1822_v52  ;;  %v1988_v52 = vld [vmem:[%s11060_s4 + $0x760] sm:$0xff] }
 0x23a   :  { %8164 = vmatpush3.bf16.msra.mxu1 %v8163_v21  ;;  %v1229_v21 = vmax.f32 %v9726_v16, 0.0  ;;  %v1817_v16 = vld [vmem:[%s11060_s4 + $0x208] sm:$0xff]  ;;  %v1611_v29 = vrot.slane %v1483_v19, 4 }
 0x23b   :  { %7881 = vmatmul.mubr.msk.f32.vlgmr.msra.gmra.mrb[90].mxu0 %vm634_vm0, %v1733_v43  ;;  %8165 = vmatprep.subr.bf16.mxu1 %v11245_v3  ;;  %v1575_v43 = vrot.slane %v1447_v33, 4 }
 0x23c   :  { %8365 = vmatpush3.bf16.msra.mxu0 %v8364_v54  ;;  %7902 = vmatprep.mubr.msk.f32.mxu0 %vm8536_vm1, %v11244_v39  ;;  %v1816_v54 = vld [vmem:[%s11060_s4 + $0x200] sm:$0xff]  ;;  %v1357_v22 = vrot.slane %v1229_v21, 2  ;;  %v1739_v26 = vmax.f32 %v1483_v19, %v1611_v29  ;;  %v1974_v19 = vld [vmem:[%s11060_s4 + $0x6f0] sm:$0xff]  ;;  %v1235_v29 = vmax.f32 %v9744_v6, 0.0  ;;  %v1833_v6 = vld [vmem:[%s11060_s4 + $0x288] sm:$0xff] }
 0x23d   :  { %8366 = vmatprep.subr.bf16.mxu0 %v11245_v3  ;;  %7529 = vmatmul.mubr.msk.f32.vlgmr.msra.gmra.mrb[26].mxu1 %vm634_vm0, %v1701_v53  ;;  %v1703_v53 = vmax.f32 %v1447_v33, %v1575_v43  ;;  %v1704_v33 = vmax.f32 %v1448_v46, %v1576_v50  ;;  %v1975_v43 = vld [vmem:[%s11060_s4 + $0x6f8] sm:$0xff]  ;;  %v1981_v46 = vld [vmem:[%s11060_s4 + $0x728] sm:$0xff]  ;;  %v8202_v50 = vpack.c.bf16 %v1833_v6, %v1832_v9  ;;  %v1998_v9 = vld [vmem:[%s11060_s4 + $0x7b0] sm:$0xff] }
 0x23e   :  { %8167 = vmatpush3.bf16.msra.mxu1 %v8166_v61  ;;  %7539 = vmatprep.mubr.msk.f32.mxu1 %vm8536_vm1, %v11244_v39  ;;  %v8178_v61 = vpack.c.bf16 %v1817_v16, %v1816_v54  ;;  %v1485_v63 = vmax.f32 %v1229_v21, %v1357_v22  ;;  %v1487_v54 = vmax.f32 %v1231_v49, %v1359_v38  ;;  %v1980_v22 = vld [vmem:[%s11060_s4 + $0x720] sm:$0xff]  ;;  %v11255_v38 = vld [vmem:[#allocation23_spill] sm:$0xff] }
 0x23f   :  { %8168 = vmatprep.subr.bf16.mxu1 %v11245_v3  ;;  %v8190_v16 = vpack.c.bf16 %v1825_v8, %v1824_v45  ;;  %v8424_v59 = vpack.c.bf16 %v1981_v46, %v1980_v22  ;;  %v1841_v45 = vld [vmem:[%s11060_s4 + $0x2c8] sm:$0xff] }
 0x240   :  { %8368 = vmatpush3.bf16.msra.mxu0 %v8367_v56  ;;  %v8391_v56 = vpack.c.bf16 %v1959_v23, %v1958_v40  ;;  %v1613_v57 = vrot.slane %v1485_v63, 4  ;;  %v1826_v40 = vld [vmem:[%s11060_s4 + $0x250] sm:$0xff]  ;;  %v8415_v23 = vpack.c.bf16 %v1975_v43, %v1974_v19  ;;  %v1615_v62 = vrot.slane %v1487_v54, 4 }
 0x241   :  { %8375 = vmatprep.subr.bf16.mxu0 %v11245_v3  ;;  %v1200_v19 = vmax.f32 %v9654_v4, 0.0 }
 0x242   :  { %8170 = vmatpush3.bf16.msra.mxu1 %v8169_v51  ;;  %v1820_v51 = vld [vmem:[%s11060_s4 + $0x220] sm:$0xff]  ;;  %v1741_v10 = vmax.f32 %v1485_v63, %v1613_v57  ;;  %v1198_v63 = vmax.f32 %v9651_v60, 0.0  ;;  %v1835_v60 = vld [vmem:[%s11060_s4 + $0x298] sm:$0xff] }
 0x243   :  { %7903 = vmatmul.mubr.msk.f32.vlgmr.msra.gmra.mrb[92].mxu0 %vm634_vm0, %v1735_v41  ;;  %8171 = vmatprep.subr.bf16.mxu1 %v11245_v3  ;;  %v1966_v41 = vld [vmem:[%s11060_s4 + $0x6b0] sm:$0xff]  ;;  %v8184_v35 = vpack.c.bf16 %v1821_v13, %v1820_v51  ;;  %v1743_v51 = vmax.f32 %v1487_v54, %v1615_v62  ;;  %v1848_v62 = vld [vmem:[%s11060_s4 + $0x300] sm:$0xff]  ;;  %v1328_v22 = vrot.slane %v1200_v19, 2 }
 0x244   :  { %8377 = vmatpush3.bf16.msra.mxu0 %v8376_v18  ;;  %7924 = vmatprep.mubr.msk.f32.mxu0 %vm8536_vm1, %v11244_v39  ;;  %v1321_v18 = vrot.slane %v1193_v36, 2 }
 0x245   :  { %8378 = vmatprep.subr.bf16.mxu0 %v11245_v3  ;;  %7540 = vmatmul.mubr.msk.f32.vlgmr.msra.gmra.mrb[28].mxu1 %vm634_vm0, %v1702_v47  ;;  %v1973_v47 = vld [vmem:[%s11060_s4 + $0x6e8] sm:$0xff] }
 0x246   :  { %8173 = vmatpush3.bf16.msra.mxu1 %v8172_v17  ;;  %7550 = vmatprep.mubr.msk.f32.mxu1 %vm8536_vm1, %v11244_v39  ;;  %v8403_v17 = vpack.c.bf16 %v1967_v30, %v1966_v41  ;;  %v8412_v21 = vpack.c.bf16 %v1973_v47, %v1972_v0  ;;  %v1363_v41 = vrot.slane %v1235_v29, 2  ;;  %v1326_v0 = vrot.slane %v1198_v63, 2 }
 0x247   :  { %8174 = vmatprep.subr.bf16.mxu1 %v11245_v3 }
 0x248   :  { %8380 = vmatpush3.bf16.msra.mxu0 %v8379_v15  ;;  %v1449_v15 = vmax.f32 %v1193_v36, %v1321_v18  ;;  %v1361_v36 = vrot.slane %v1233_v31, 2  ;;  %v1983_v18 = vld [vmem:[%s11060_s4 + $0x738] sm:$0xff]  ;;  %v1491_v47 = vmax.f32 %v1235_v29, %v1363_v41  ;;  %v1454_v43 = vmax.f32 %v1198_v63, %v1326_v0 }
 0x249   :  { %8387 = vmatprep.subr.bf16.mxu0 %v11245_v3  ;;  %v1851_v63 = vld [vmem:[%s11060_s4 + $0x318] sm:$0xff] }
 0x24a   :  { %8176 = vmatpush3.bf16.msra.mxu1 %v8175_v27  ;;  %v1322_v27 = vrot.slane %v1194_v37, 2  ;;  %v1489_v49 = vmax.f32 %v1233_v31, %v1361_v36  ;;  %v1997_v36 = vld [vmem:[%s11060_s4 + $0x7a8] sm:$0xff]  ;;  %v1582_v46 = vrot.slane %v1454_v43, 4 }
 0x24b   :  { %7925 = vmatmul.mubr.msk.f32.vlgmr.msra.gmra.mrb[94].mxu0 %vm634_vm0, %v1737_v32  ;;  %8177 = vmatprep.subr.bf16.mxu1 %v11245_v3  ;;  %v1196_v32 = vmax.f32 %v9648_v5, 0.0  ;;  %v1827_v5 = vld [vmem:[%s11060_s4 + $0x258] sm:$0xff] }
 0x24c   :  { %8389 = vmatpush3.bf16.msra.mxu0 %v8388_v44  ;;  %7946 = vmatprep.mubr.msk.f32.mxu0 %vm8536_vm1, %v11244_v39  ;;  %v1577_v44 = vrot.slane %v1449_v15, 4 }
 0x24d   :  { %8390 = vmatprep.subr.bf16.mxu0 %v11245_v3  ;;  %7551 = vmatmul.mubr.msk.f32.vlgmr.msra.gmra.mrb[30].mxu1 %vm634_vm0, %v1703_v53  ;;  %v8193_v53 = vpack.c.bf16 %v1827_v5, %v1826_v40  ;;  %v1324_v11 = vrot.slane %v1196_v32, 2  ;;  %v1843_v40 = vld [vmem:[%s11060_s4 + $0x2d8] sm:$0xff]  ;;  %v1239_v5 = vmax.f32 %v9753_v2, 0.0 }
 0x24e   :  { %8179 = vmatpush3.bf16.msra.mxu1 %v8178_v61  ;;  %7561 = vmatprep.mubr.msk.f32.mxu1 %vm8536_vm1, %v11244_v39  ;;  %v1450_v61 = vmax.f32 %v1194_v37, %v1322_v27  ;;  %v1617_v37 = vrot.slane %v1489_v49, 4  ;;  %v1991_v27 = vld [vmem:[%s11060_s4 + $0x778] sm:$0xff] }
 0x24f   :  { %8180 = vmatprep.subr.bf16.mxu1 %v11245_v3  ;;  %v1452_v30 = vmax.f32 %v1196_v32, %v1324_v11  ;;  %v1619_v32 = vrot.slane %v1491_v47, 4  ;;  %v1999_v2 = vld [vmem:[%s11060_s4 + $0x7b8] sm:$0xff]  ;;  %v1367_v6 = vrot.slane %v1239_v5, 2 }
 0x250   :  { %8392 = vmatpush3.bf16.msra.mxu0 %v8391_v56  ;;  %v1705_v56 = vmax.f32 %v1449_v15, %v1577_v44  ;;  %v1237_v15 = vmax.f32 %v11255_v38, 0.0  ;;  %v2007_v38 = vld [vmem:[%s11060_s4 + $0x7f8] sm:$0xff] }
 0x251   :  { %8399 = vmatprep.subr.bf16.mxu0 %v11245_v3  ;;  %v1580_v31 = vrot.slane %v1452_v30, 4  ;;  %v1747_v29 = vmax.f32 %v1491_v47, %v1619_v32  ;;  %v1866_v32 = vld [vmem:[%s11060_s4 + $0x390] sm:$0xff] }
 0x252   :  { %8182 = vmatpush3.bf16.msra.mxu1 %v8181_v55  ;;  %v1578_v55 = vrot.slane %v1450_v61, 4  ;;  %v1365_v54 = vrot.slane %v1237_v15, 2 }
 0x253   :  { %7947 = vmatmul.mubr.msk.f32.vlgmr.msra.gmra.mrb[96].mxu0 %vm634_vm0, %v1739_v26  ;;  %8183 = vmatprep.subr.bf16.mxu1 %v11245_v3  ;;  %v1834_v26 = vld [vmem:[%s11060_s4 + $0x290] sm:$0xff] }
 0x254   :  { %8401 = vmatpush3.bf16.msra.mxu0 %v8400_v25  ;;  %7968 = vmatprep.mubr.msk.f32.mxu0 %vm8536_vm1, %v11244_v39  ;;  %v1982_v25 = vld [vmem:[%s11060_s4 + $0x730] sm:$0xff]  ;;  %v8205_v57 = vpack.c.bf16 %v1835_v60, %v1834_v26  ;;  %v1493_v4 = vmax.f32 %v1237_v15, %v1365_v54  ;;  %v2005_v26 = vld [vmem:[%s11060_s4 + $0x7e8] sm:$0xff]  ;;  %v1864_v54 = vld [vmem:[%s11060_s4 + $0x380] sm:$0xff] }
 0x255   :  { %8402 = vmatprep.subr.bf16.mxu0 %v11245_v3  ;;  %7562 = vmatmul.mubr.msk.f32.vlgmr.msra.gmra.mrb[32].mxu1 %vm634_vm0, %v1704_v33  ;;  %v8427_v13 = vpack.c.bf16 %v1983_v18, %v1982_v25  ;;  %v1840_v33 = vld [vmem:[%s11060_s4 + $0x2c0] sm:$0xff]  ;;  %v1456_v25 = vmax.f32 %v1200_v19, %v1328_v22  ;;  %v1710_v18 = vmax.f32 %v1454_v43, %v1582_v46  ;;  %v1874_v22 = vld [vmem:[%s11060_s4 + $0x3d0] sm:$0xff]  ;;  %v1875_v46 = vld [vmem:[%s11060_s4 + $0x3d8] sm:$0xff] }
 0x256   :  { %8185 = vmatpush3.bf16.msra.mxu1 %v8184_v35  ;;  %7572 = vmatprep.mubr.msk.f32.mxu1 %vm8536_vm1, %v11244_v39  ;;  %v1706_v35 = vmax.f32 %v1450_v61, %v1578_v55  ;;  %v8214_v44 = vpack.c.bf16 %v1841_v45, %v1840_v33  ;;  %v8451_v55 = vpack.c.bf16 %v1999_v2, %v1998_v9  ;;  %v1204_v33 = vmax.f32 %v9660_v24, 0.0  ;;  %v1880_v9 = vld [vmem:[%s11060_s4 + $0x400] sm:$0xff]  ;;  %v1881_v2 = vld [vmem:[%s11060_s4 + $0x408] sm:$0xff] }
 0x257   :  { %8186 = vmatprep.subr.bf16.mxu1 %v11245_v3 }
 0x258   :  { %8404 = vmatpush3.bf16.msra.mxu0 %v8403_v17  ;;  %v1989_v17 = vld [vmem:[%s11060_s4 + $0x768] sm:$0xff]  ;;  %v1332_v45 = vrot.slane %v1204_v33, 2 }
 0x259   :  { %8411 = vmatprep.subr.bf16.mxu0 %v11245_v3  ;;  %v8436_v7 = vpack.c.bf16 %v1989_v17, %v1988_v52  ;;  %v1857_v52 = vld [vmem:[%s11060_s4 + $0x348] sm:$0xff]  ;;  %v2006_v17 = vld [vmem:[%s11060_s4 + $0x7f0] sm:$0xff] }
 0x25a   :  { %8188 = vmatpush3.bf16.msra.mxu1 %v8187_v34  ;;  %v1745_v34 = vmax.f32 %v1489_v49, %v1617_v37  ;;  %v1850_v49 = vld [vmem:[%s11060_s4 + $0x310] sm:$0xff]  ;;  %v1495_v37 = vmax.f32 %v1239_v5, %v1367_v6  ;;  %v1460_v19 = vmax.f32 %v1204_v33, %v1332_v45  ;;  %v1883_v6 = vld [vmem:[%s11060_s4 + $0x418] sm:$0xff]  ;;  %v1904_v45 = vld [vmem:[%s11060_s4 + $0x4c0] sm:$0xff] }
 0x25b   :  { %7969 = vmatmul.mubr.msk.f32.vlgmr.msra.gmra.mrb[98].mxu0 %vm634_vm0, %v1741_v10  ;;  %8189 = vmatprep.subr.bf16.mxu1 %v11245_v3  ;;  %v1842_v10 = vld [vmem:[%s11060_s4 + $0x2d0] sm:$0xff] }
 0x25c   :  { %8413 = vmatpush3.bf16.msra.mxu0 %v8412_v21  ;;  %7990 = vmatprep.mubr.msk.f32.mxu0 %vm8536_vm1, %v11244_v39  ;;  %v1990_v21 = vld [vmem:[%s11060_s4 + $0x770] sm:$0xff]  ;;  %v8217_v61 = vpack.c.bf16 %v1843_v40, %v1842_v10  ;;  %v1623_v0 = vrot.slane %v1495_v37, 4 }
 0x25d   :  { %8414 = vmatprep.subr.bf16.mxu0 %v11245_v3  ;;  %7573 = vmatmul.mubr.msk.f32.vlgmr.msra.gmra.mrb[34].mxu1 %vm634_vm0, %v1705_v56  ;;  %v8439_v8 = vpack.c.bf16 %v1991_v27, %v1990_v21 }
 0x25e   :  { %8191 = vmatpush3.bf16.msra.mxu1 %v8190_v16  ;;  %7583 = vmatprep.mubr.msk.f32.mxu1 %vm8536_vm1, %v11244_v39  ;;  %v1708_v16 = vmax.f32 %v1452_v30, %v1580_v31  ;;  %v1858_v31 = vld [vmem:[%s11060_s4 + $0x350] sm:$0xff]  ;;  %v1751_v27 = vmax.f32 %v1495_v37, %v1623_v0  ;;  %v1891_v37 = vld [vmem:[%s11060_s4 + $0x458] sm:$0xff] }
 0x25f   :  { %8192 = vmatprep.subr.bf16.mxu1 %v11245_v3  ;;  %v1899_v0 = vld [vmem:[%s11060_s4 + $0x498] sm:$0xff] }
 0x260   :  { %8416 = vmatpush3.bf16.msra.mxu0 %v8415_v23  ;;  %v1996_v23 = vld [vmem:[%s11060_s4 + $0x7a0] sm:$0xff] }
 0x261   :  { %8423 = vmatprep.subr.bf16.mxu0 %v11245_v3  ;;  %v8448_v56 = vpack.c.bf16 %v1997_v36, %v1996_v23  ;;  %v1588_v23 = vrot.slane %v1460_v19, 4  ;;  %v1872_v36 = vld [vmem:[%s11060_s4 + $0x3c0] sm:$0xff] }
 0x262   :  { %8194 = vmatpush3.bf16.msra.mxu1 %v8193_v53  ;;  %v1849_v53 = vld [vmem:[%s11060_s4 + $0x308] sm:$0xff] }
 0x263   :  { %7991 = vmatmul.mubr.msk.f32.vlgmr.msra.gmra.mrb[100].mxu0 %vm634_vm0, %v1743_v51  ;;  %8201 = vmatprep.subr.bf16.mxu1 %v11245_v3  ;;  %v8226_v11 = vpack.c.bf16 %v1849_v53, %v1848_v62  ;;  %v1202_v51 = vmax.f32 %v9657_v58, 0.0  ;;  %v8229_v58 = vpack.c.bf16 %v1851_v63, %v1850_v49  ;;  %v1208_v62 = vmax.f32 %v9666_v20, 0.0  ;;  %v1888_v63 = vld [vmem:[%s11060_s4 + $0x440] sm:$0xff] }
 0x264   :  { %8425 = vmatpush3.bf16.msra.mxu0 %v8424_v59  ;;  %8012 = vmatprep.mubr.msk.f32.mxu0 %vm8536_vm1, %v11244_v39  ;;  %v1621_v59 = vrot.slane %v1493_v4, 4  ;;  %v1716_v5 = vmax.f32 %v1460_v19, %v1588_v23 }
 0x265   :  { %8426 = vmatprep.subr.bf16.mxu0 %v11245_v3  ;;  %7584 = vmatmul.mubr.msk.f32.vlgmr.msra.gmra.mrb[36].mxu1 %vm634_vm0, %v1706_v35  ;;  %v1330_v30 = vrot.slane %v1202_v51, 2  ;;  %v1584_v35 = vrot.slane %v1456_v25, 4  ;;  %v1336_v20 = vrot.slane %v1208_v62, 2 }
 0x266   :  { %8203 = vmatpush3.bf16.msra.mxu1 %v8202_v50  ;;  %7605 = vmatprep.mubr.msk.f32.mxu1 %vm8536_vm1, %v11244_v39  ;;  %v2004_v50 = vld [vmem:[%s11060_s4 + $0x7e0] sm:$0xff]  ;;  %v1749_v60 = vmax.f32 %v1493_v4, %v1621_v59  ;;  %v1873_v4 = vld [vmem:[%s11060_s4 + $0x3c8] sm:$0xff]  ;;  %v8274_v59 = vpack.c.bf16 %v1881_v2, %v1880_v9  ;;  %v1914_v9 = vld [vmem:[%s11060_s4 + $0x510] sm:$0xff] }
 0x267   :  { %8204 = vmatprep.subr.bf16.mxu1 %v11245_v3  ;;  %v8460_v41 = vpack.c.bf16 %v2005_v26, %v2004_v50  ;;  %v1712_v47 = vmax.f32 %v1456_v25, %v1584_v35  ;;  %v1464_v49 = vmax.f32 %v1208_v62, %v1336_v20  ;;  %v1889_v50 = vld [vmem:[%s11060_s4 + $0x448] sm:$0xff]  ;;  %v1915_v2 = vld [vmem:[%s11060_s4 + $0x518] sm:$0xff] }
 0x268   :  { %8428 = vmatpush3.bf16.msra.mxu0 %v8427_v13  ;;  %v1856_v13 = vld [vmem:[%s11060_s4 + $0x340] sm:$0xff]  ;;  %v8286_v26 = vpack.c.bf16 %v1889_v50, %v1888_v63 }
 0x269   :  { %8435 = vmatprep.subr.bf16.mxu0 %v11245_v3  ;;  %v8238_v15 = vpack.c.bf16 %v1857_v52, %v1856_v13  ;;  %v1896_v52 = vld [vmem:[%s11060_s4 + $0x480] sm:$0xff] }
 0x26a   :  { %8206 = vmatpush3.bf16.msra.mxu1 %v8205_v57  ;;  %v8463_v57 = vpack.c.bf16 %v2007_v38, %v2006_v17  ;;  %v1897_v17 = vld [vmem:[%s11060_s4 + $0x488] sm:$0xff] }
 0x26b   :  { %8013 = vmatmul.mubr.msk.f32.vlgmr.msra.gmra.mrb[102].mxu0 %vm634_vm0, %v1745_v34  ;;  %8213 = vmatprep.subr.bf16.mxu1 %v11245_v3  ;;  %v1859_v34 = vld [vmem:[%s11060_s4 + $0x358] sm:$0xff]  ;;  %v8298_v38 = vpack.c.bf16 %v1897_v17, %v1896_v52 }
 0x26c   :  { %8437 = vmatpush3.bf16.msra.mxu0 %v8436_v7  ;;  %8034 = vmatprep.mubr.msk.f32.mxu0 %vm8536_vm1, %v11244_v39  ;;  %v1458_v7 = vmax.f32 %v1202_v51, %v1330_v30  ;;  %v8241_v24 = vpack.c.bf16 %v1859_v34, %v1858_v31  ;;  %v1882_v51 = vld [vmem:[%s11060_s4 + $0x410] sm:$0xff] }
 0x26d   :  { %8438 = vmatprep.subr.bf16.mxu0 %v11245_v3  ;;  %7606 = vmatmul.mubr.msk.f32.vlgmr.msra.gmra.mrb[38].mxu1 %vm634_vm0, %v1708_v16  ;;  %v1867_v16 = vld [vmem:[%s11060_s4 + $0x398] sm:$0xff]  ;;  %v8277_v25 = vpack.c.bf16 %v1883_v6, %v1882_v51  ;;  %v1890_v30 = vld [vmem:[%s11060_s4 + $0x450] sm:$0xff]  ;;  %v1920_v51 = vld [vmem:[%s11060_s4 + $0x540] sm:$0xff] }
 0x26e   :  { %8215 = vmatpush3.bf16.msra.mxu1 %v8214_v44  ;;  %7627 = vmatprep.mubr.msk.f32.mxu1 %vm8536_vm1, %v11244_v39  ;;  %v1586_v21 = vrot.slane %v1458_v7, 4  ;;  %v1865_v44 = vld [vmem:[%s11060_s4 + $0x388] sm:$0xff]  ;;  %v8253_v40 = vpack.c.bf16 %v1867_v16, %v1866_v32  ;;  %v8289_v35 = vpack.c.bf16 %v1891_v37, %v1890_v30  ;;  %v1907_v32 = vld [vmem:[%s11060_s4 + $0x4d8] sm:$0xff]  ;;  %v1922_v30 = vld [vmem:[%s11060_s4 + $0x550] sm:$0xff] }
 0x26f   :  { %8216 = vmatprep.subr.bf16.mxu1 %v11245_v3  ;;  %v8250_v10 = vpack.c.bf16 %v1865_v44, %v1864_v54  ;;  %v1921_v6 = vld [vmem:[%s11060_s4 + $0x548] sm:$0xff]  ;;  %v1923_v37 = vld [vmem:[%s11060_s4 + $0x558] sm:$0xff] }
 0x270   :  { %8440 = vmatpush3.bf16.msra.mxu0 %v8439_v8  ;;  %v1206_v8 = vmax.f32 %v9663_v1, 0.0  ;;  %v1714_v43 = vmax.f32 %v1458_v7, %v1586_v21  ;;  %v1898_v7 = vld [vmem:[%s11060_s4 + $0x490] sm:$0xff]  ;;  %v1905_v21 = vld [vmem:[%s11060_s4 + $0x4c8] sm:$0xff]  ;;  %v8334_v50 = vpack.c.bf16 %v1921_v6, %v1920_v51 }
 0x271   :  { %8447 = vmatprep.subr.bf16.mxu0 %v11245_v3  ;;  %v8301_v34 = vpack.c.bf16 %v1899_v0, %v1898_v7  ;;  %v8310_v44 = vpack.c.bf16 %v1905_v21, %v1904_v45  ;;  %v1930_v21 = vld [vmem:[%s11060_s4 + $0x590] sm:$0xff] }
 0x272   :  { %8218 = vmatpush3.bf16.msra.mxu1 %v8217_v61  ;;  %v1334_v1 = vrot.slane %v1206_v8, 2  ;;  %v8262_v61 = vpack.c.bf16 %v1873_v4, %v1872_v36  ;;  %v1912_v36 = vld [vmem:[%s11060_s4 + $0x500] sm:$0xff]  ;;  %v1913_v4 = vld [vmem:[%s11060_s4 + $0x508] sm:$0xff] }
 0x273   :  { %8035 = vmatmul.mubr.msk.f32.vlgmr.msra.gmra.mrb[104].mxu0 %vm634_vm0, %v1747_v29  ;;  %8225 = vmatprep.subr.bf16.mxu1 %v11245_v3  ;;  %v8265_v29 = vpack.c.bf16 %v1875_v46, %v1874_v22  ;;  %v8322_v46 = vpack.c.bf16 %v1913_v4, %v1912_v36  ;;  %v11258_v4 = vld [vmem:[#allocation6_spill] sm:$0xff] }
 0x274   :  { %8449 = vmatpush3.bf16.msra.mxu0 %v8448_v56  ;;  %8056 = vmatprep.mubr.msk.f32.mxu0 %vm8536_vm1, %v11244_v39  ;;  %v1462_v56 = vmax.f32 %v1206_v8, %v1334_v1 }
 0x275   :  { %8450 = vmatprep.subr.bf16.mxu0 %v11245_v3  ;;  %7628 = vmatmul.mubr.msk.f32.vlgmr.msra.gmra.mrb[40].mxu1 %vm634_vm0, %v1710_v18  ;;  %v1592_v18 = vrot.slane %v1464_v49, 4 }
 0x276   :  { %8227 = vmatpush3.bf16.msra.mxu1 %v8226_v11  ;;  %7649 = vmatprep.mubr.msk.f32.mxu1 %vm8536_vm1, %v11244_v39  ;;  %v1590_v53 = vrot.slane %v1462_v56, 4  ;;  %v1210_v11 = vmax.f32 %v9669_v28, 0.0 }
 0x277   :  { %8228 = vmatprep.subr.bf16.mxu1 %v11245_v3 }
 0x278   :  { %8452 = vmatpush3.bf16.msra.mxu0 %v8451_v55  ;;  %v1718_v55 = vmax.f32 %v1462_v56, %v1590_v53  ;;  %v1338_v28 = vrot.slane %v1210_v11, 2 }
 0x279   :  { %8459 = vmatprep.subr.bf16.mxu0 %v11245_v3 }
 0x27a   :  { %8230 = vmatpush3.bf16.msra.mxu1 %v8229_v58  ;;  %v1212_v58 = vmax.f32 %v9675_v48, 0.0  ;;  %v1466_v13 = vmax.f32 %v1210_v11, %v1338_v28 }
 0x27b   :  { %8057 = vmatmul.mubr.msk.f32.vlgmr.msra.gmra.mrb[106].mxu0 %vm634_vm0, %v1749_v60  ;;  %8237 = vmatprep.subr.bf16.mxu1 %v11245_v3 }
 0x27c   :  { %8461 = vmatpush3.bf16.msra.mxu0 %v8460_v41  ;;  %8078 = vmatprep.mubr.msk.f32.mxu0 %vm8536_vm1, %v11244_v39  ;;  %v1720_v41 = vmax.f32 %v1464_v49, %v1592_v18  ;;  %v1340_v48 = vrot.slane %v1212_v58, 2  ;;  %v1594_v60 = vrot.slane %v1466_v13, 4  ;;  %v8325_v49 = vpack.c.bf16 %v1915_v2, %v1914_v9  ;;  %v1944_v2 = vld [vmem:[%s11060_s4 + $0x600] sm:$0xff] }
 0x27d   :  { %8462 = vmatprep.subr.bf16.mxu0 %v11245_v3  ;;  %7650 = vmatmul.mubr.msk.f32.vlgmr.msra.gmra.mrb[42].mxu1 %vm634_vm0, %v1712_v47 }
 0x27e   :  { %8239 = vmatpush3.bf16.msra.mxu1 %v8238_v15  ;;  %7671 = vmatprep.mubr.msk.f32.mxu1 %vm8536_vm1, %v11244_v39  ;;  %v1214_v15 = vmax.f32 %v9681_v12, 0.0  ;;  %v1722_v33 = vmax.f32 %v1466_v13, %v1594_v60  ;;  %v8337_v60 = vpack.c.bf16 %v1923_v37, %v1922_v30 }
 0x27f   :  { %8240 = vmatprep.subr.bf16.mxu1 %v11245_v3 }
 0x280   :  { %8464 = vmatpush3.bf16.msra.mxu0 %v8463_v57  ;;  %v1468_v57 = vmax.f32 %v1212_v58, %v1340_v48  ;;  %v1342_v12 = vrot.slane %v1214_v15, 2 }
 0x282   :  { %8242 = vmatpush3.bf16.msra.mxu1 %v8241_v24  ;;  %v1596_v24 = vrot.slane %v1468_v57, 4  ;;  %v1470_v8 = vmax.f32 %v1214_v15, %v1342_v12  ;;  %v1929_v15 = vld [vmem:[%s11060_s4 + $0x588] sm:$0xff] }
 0x283   :  { %8079 = vmatmul.mubr.msk.f32.vlgmr.msra.gmra.mrb[108].mxu0 %vm634_vm0, %v1751_v27  ;;  %8249 = vmatprep.subr.bf16.mxu1 %v11245_v3 }
 0x284   :  { %v1724_v19 = vmax.f32 %v1468_v57, %v1596_v24  ;;  %v1598_v23 = vrot.slane %v1470_v8, 4 }
 0x285   :  { %7672 = vmatmul.mubr.msk.f32.vlgmr.msra.gmra.mrb[44].mxu1 %vm634_vm0, %v1714_v43  ;;  %v1906_v43 = vld [vmem:[%s11060_s4 + $0x4d0] sm:$0xff] }
 0x286   :  { %8251 = vmatpush3.bf16.msra.mxu1 %v8250_v10  ;;  %7693 = vmatprep.mubr.msk.f32.mxu1 %vm8536_vm1, %v11244_v39  ;;  %v1216_v10 = vmax.f32 %v9687_v42, 0.0  ;;  %v8313_v42 = vpack.c.bf16 %v1907_v32, %v1906_v43  ;;  %v1726_v53 = vmax.f32 %v1470_v8, %v1598_v23  ;;  %v1936_v43 = vld [vmem:[%s11060_s4 + $0x5c0] sm:$0xff]  ;;  %v1937_v32 = vld [vmem:[%s11060_s4 + $0x5c8] sm:$0xff] }
 0x287   :  { %8252 = vmatprep.subr.bf16.mxu1 %v11245_v3  ;;  %v8358_v36 = vpack.c.bf16 %v1937_v32, %v1936_v43 }
 0x288   :  { %v1344_v1 = vrot.slane %v1216_v10, 2 }
 0x28a   :  { %8254 = vmatpush3.bf16.msra.mxu1 %v8253_v40  ;;  %v1472_v20 = vmax.f32 %v1216_v10, %v1344_v1 }
 0x28b   :  { %8261 = vmatprep.subr.bf16.mxu1 %v11245_v3 }
 0x28d   :  { %7694 = vmatmul.mubr.msk.f32.vlgmr.msra.gmra.mrb[46].mxu1 %vm634_vm0, %v1716_v5 }
 0x28e   :  { %8263 = vmatpush3.bf16.msra.mxu1 %v8262_v61  ;;  %7715 = vmatprep.mubr.msk.f32.mxu1 %vm8536_vm1, %v11244_v39 }
 0x28f   :  { %8264 = vmatprep.subr.bf16.mxu1 %v11245_v3 }
 0x292   :  { %8266 = vmatpush3.bf16.msra.mxu1 %v8265_v29  ;;  %v1218_v29 = vmax.f32 %v9693_v14, 0.0 }
 0x293   :  { %8273 = vmatprep.subr.bf16.mxu1 %v11245_v3 }
 0x294   :  { %v1346_v14 = vrot.slane %v1218_v29, 2 }
 0x295   :  { %7716 = vmatmul.mubr.msk.f32.vlgmr.msra.gmra.mrb[48].mxu1 %vm634_vm0, %v1718_v55  ;;  %v1600_v55 = vrot.slane %v1472_v20, 4 }
 0x296   :  { %8275 = vmatpush3.bf16.msra.mxu1 %v8274_v59  ;;  %7737 = vmatprep.mubr.msk.f32.mxu1 %vm8536_vm1, %v11244_v39  ;;  %v1474_v13 = vmax.f32 %v1218_v29, %v1346_v14 }
 0x297   :  { %8276 = vmatprep.subr.bf16.mxu1 %v11245_v3 }
 0x298   :  { %v1602_v17 = vrot.slane %v1474_v13, 4 }
 0x29a   :  { %8278 = vmatpush3.bf16.msra.mxu1 %v8277_v25  ;;  %v1730_v45 = vmax.f32 %v1474_v13, %v1602_v17 }
 0x29b   :  { %8285 = vmatprep.subr.bf16.mxu1 %v11245_v3 }
 0x29d   :  { %7738 = vmatmul.mubr.msk.f32.vlgmr.msra.gmra.mrb[50].mxu1 %vm634_vm0, %v1720_v41  ;;  %v1728_v41 = vmax.f32 %v1472_v20, %v1600_v55 }
 0x29e   :  { %8287 = vmatpush3.bf16.msra.mxu1 %v8286_v26  ;;  %7759 = vmatprep.mubr.msk.f32.mxu1 %vm8536_vm1, %v11244_v39  ;;  %v11256_v26 = vld [vmem:[#allocation7_spill] sm:$0xff] }
 0x29f   :  { %8288 = vmatprep.subr.bf16.mxu1 %v11245_v3  ;;  %v1220_v58 = vmax.f32 %v11256_v26, 0.0  ;;  %v1947_v26 = vld [vmem:[%s11060_s4 + $0x618] sm:$0xff] }
 0x2a1   :  { %v1348_v52 = vrot.slane %v1220_v58, 2 }
 0x2a2   :  { %8290 = vmatpush3.bf16.msra.mxu1 %v8289_v35 }
 0x2a3   :  { %8297 = vmatprep.subr.bf16.mxu1 %v11245_v3  ;;  %v1476_v24 = vmax.f32 %v1220_v58, %v1348_v52 }
 0x2a5   :  { %7760 = vmatmul.mubr.msk.f32.vlgmr.msra.gmra.mrb[52].mxu1 %vm634_vm0, %v1722_v33 }
 0x2a6   :  { %v10669_v47 = vpop.f32.mrb[64].mxu0  ;;  %8299 = vmatpush3.bf16.msra.mxu1 %v8298_v38  ;;  %7781 = vmatprep.mubr.msk.f32.mxu1 %vm8536_vm1, %v11244_v39  ;;  %v2077_v27 = vpop.f32.mrb[0].mxu1  ;;  %v1928_v38 = vld [vmem:[%s11060_s4 + $0x580] sm:$0xff] }
 0x2a7   :  { %v7596_v31 = vpop.f32.mrb[65].mxu0  ;;  %8300 = vmatprep.subr.bf16.mxu1 %v11245_v3  ;;  %v7387_v54 = vpop.f32.mrb[1].mxu1  ;;  %v6681_v62 = vsel %vm6680_vm2, %v2077_v27, 0.0  ;;  %v1931_v27 = vld [vmem:[%s11060_s4 + $0x598] sm:$0xff] }
 0x2a8   :  { %v8346_v31 = vpack.c.bf16 %v1929_v15, %v1928_v38  ;;  %v8349_v10 = vpack.c.bf16 %v1931_v27, %v1930_v21 }
 0x2aa   :  { %8302 = vmatpush3.bf16.msra.mxu1 %v8301_v34  ;;  %v11257_v34 = vld [vmem:[#allocation9_spill] sm:$0xff] }
 0x2ab   :  { %8309 = vmatprep.subr.bf16.mxu1 %v11245_v3  ;;  %v1222_v12 = vmax.f32 %v11257_v34, 0.0  ;;  %v1954_v34 = vld [vmem:[%s11060_s4 + $0x650] sm:$0xff] }
 0x2ad   :  { %7782 = vmatmul.mubr.msk.f32.vlgmr.msra.gmra.mrb[54].mxu1 %vm634_vm0, %v1724_v19  ;;  %v1350_v8 = vrot.slane %v1222_v12, 2  ;;  %v1604_v19 = vrot.slane %v1476_v24, 4 }
 0x2ae   :  { %v10689_v16 = vpop.f32.mrb[66].mxu0  ;;  %8311 = vmatpush3.bf16.msra.mxu1 %v8310_v44  ;;  %7803 = vmatprep.mubr.msk.f32.mxu1 %vm8536_vm1, %v11244_v39 }
 0x2af   :  { %v7618_v40 = vpop.f32.mrb[67].mxu0  ;;  %8312 = vmatprep.subr.bf16.mxu1 %v11245_v3 }
 0x2b0   :  { %v2150_v61 = vpop.f32.mrb[2].mxu1 }
 0x2b1   :  { %v6682_v56 = vsel %vm6680_vm2, %v2150_v61, 0.0  ;;  %v7398_v5 = vpop.f32.mrb[3].mxu1  ;;  %v1224_v61 = vmax.f32 %v11258_v4, 0.0 }
 0x2b2   :  { %v6683_v22 = vadd.f32 %v6682_v56, %v6681_v62  ;;  %8314 = vmatpush3.bf16.msra.mxu1 %v8313_v42  ;;  %v1478_v62 = vmax.f32 %v1222_v12, %v1350_v8  ;;  %v1732_v56 = vmax.f32 %v1476_v24, %v1604_v19  ;;  %v1938_v5 = vld [vmem:[%s11060_s4 + $0x5d0] sm:$0xff]  ;;  %v1955_v12 = vld [vmem:[%s11060_s4 + $0x658] sm:$0xff]  ;;  %v1961_v8 = vld [vmem:[%s11060_s4 + $0x688] sm:$0xff] }
 0x2b3   :  { %8321 = vmatprep.subr.bf16.mxu1 %v11245_v3  ;;  %v8385_v21 = vpack.c.bf16 %v1955_v12, %v1954_v34  ;;  %v1979_v34 = vld [vmem:[%s11060_s4 + $0x718] sm:$0xff] }
 0x2b4   :  { %v1606_v9 = vrot.slane %v1478_v62, 4 }
 0x2b5   :  { %7804 = vmatmul.mubr.msk.f32.vlgmr.msra.gmra.mrb[56].mxu1 %vm634_vm0, %v1726_v53  ;;  %v1352_v53 = vrot.slane %v1224_v61, 2 }
 0x2b6   :  { %v10711_v59 = vpop.f32.mrb[68].mxu0  ;;  %8323 = vmatpush3.bf16.msra.mxu1 %v8322_v46  ;;  %7825 = vmatprep.mubr.msk.f32.mxu1 %vm8536_vm1, %v11244_v39 }
 0x2b7   :  { %v7640_v11 = vpop.f32.mrb[69].mxu0  ;;  %8324 = vmatprep.subr.bf16.mxu1 %v11245_v3 }
 0x2b8   :  { %v2223_v25 = vpop.f32.mrb[4].mxu1  ;;  %v1945_v11 = vld [vmem:[%s11060_s4 + $0x608] sm:$0xff] }
 0x2b9   :  { %v6684_v28 = vsel %vm6680_vm2, %v2223_v25, 0.0  ;;  %v7409_v18 = vpop.f32.mrb[5].mxu1  ;;  %v8370_v6 = vpack.c.bf16 %v1945_v11, %v1944_v2  ;;  %v11259_v25 = vld [vmem:[#allocation8_spill] sm:$0xff] }
 0x2ba   :  { %v6685_v63 = vadd.f32 %v6684_v28, %v6683_v22  ;;  %8326 = vmatpush3.bf16.msra.mxu1 %v8325_v49  ;;  %v1939_v22 = vld [vmem:[%s11060_s4 + $0x5d8] sm:$0xff]  ;;  %v1226_v28 = vmax.f32 %v11259_v25, 0.0  ;;  %v1480_v18 = vmax.f32 %v1224_v61, %v1352_v53  ;;  %v1962_v61 = vld [vmem:[%s11060_s4 + $0x690] sm:$0xff]  ;;  %v1968_v53 = vld [vmem:[%s11060_s4 + $0x6c0] sm:$0xff] }
 0x2bb   :  { %8333 = vmatprep.subr.bf16.mxu1 %v11245_v3  ;;  %v8361_v20 = vpack.c.bf16 %v1939_v22, %v1938_v5 }
 0x2bc   :  { %v1354_v30 = vrot.slane %v1226_v28, 2  ;;  %v1608_v37 = vrot.slane %v1480_v18, 4 }
 0x2bd   :  { %7826 = vmatmul.mubr.msk.f32.vlgmr.msra.gmra.mrb[58].mxu1 %vm634_vm0, %v1728_v41 }
 0x2be   :  { %v10732_v35 = vpop.f32.mrb[70].mxu0  ;;  %8335 = vmatpush3.bf16.msra.mxu1 %v8334_v50  ;;  %7847 = vmatprep.mubr.msk.f32.mxu1 %vm8536_vm1, %v11244_v39  ;;  %v1946_v50 = vld [vmem:[%s11060_s4 + $0x610] sm:$0xff] }
 0x2bf   :  { %v7662_v48 = vpop.f32.mrb[71].mxu0  ;;  %8336 = vmatprep.subr.bf16.mxu1 %v11245_v3  ;;  %v8373_v41 = vpack.c.bf16 %v1947_v26, %v1946_v50 }
 0x2c0   :  { %v2296_v57 = vpop.f32.mrb[6].mxu1  ;;  %v1952_v48 = vld [vmem:[%s11060_s4 + $0x640] sm:$0xff] }
 0x2c1   :  { %v6686_v33 = vsel %vm6680_vm2, %v2296_v57, 0.0  ;;  %v7420_v7 = vpop.f32.mrb[7].mxu1 }
 0x2c2   :  { %v6687_v0 = vadd.f32 %v6686_v33, %v6685_v63  ;;  %8338 = vmatpush3.bf16.msra.mxu1 %v8337_v60  ;;  %v1734_v63 = vmax.f32 %v1478_v62, %v1606_v9  ;;  %v1953_v60 = vld [vmem:[%s11060_s4 + $0x648] sm:$0xff]  ;;  %v11260_v33 = vld [vmem:[#allocation11_spill] sm:$0xff] }
 0x2c3   :  { %8345 = vmatprep.subr.bf16.mxu1 %v11245_v3  ;;  %v8382_v57 = vpack.c.bf16 %v1953_v60, %v1952_v48  ;;  %v1228_v7 = vmax.f32 %v11260_v33, 0.0  ;;  %v1963_v62 = vld [vmem:[%s11060_s4 + $0x698] sm:$0xff]  ;;  %v1969_v9 = vld [vmem:[%s11060_s4 + $0x6c8] sm:$0xff] }
 0x2c4   :  { %v8397_v22 = vpack.c.bf16 %v1963_v62, %v1962_v61  ;;  %v1977_v48 = vld [vmem:[%s11060_s4 + $0x708] sm:$0xff]  ;;  %v1986_v61 = vld [vmem:[%s11060_s4 + $0x750] sm:$0xff]  ;;  %v1987_v62 = vld [vmem:[%s11060_s4 + $0x758] sm:$0xff] }
 0x2c5   :  { %7848 = vmatmul.mubr.msk.f32.vlgmr.msra.gmra.mrb[60].mxu1 %vm634_vm0, %v1730_v45  ;;  %v1356_v27 = vrot.slane %v1228_v7, 2 }
 0x2c6   :  { %v10753_v54 = vpop.f32.mrb[72].mxu0  ;;  %8347 = vmatpush3.bf16.msra.mxu1 %v8346_v31  ;;  %7869 = vmatprep.mubr.msk.f32.mxu1 %vm8536_vm1, %v11244_v39  ;;  %v1736_v31 = vmax.f32 %v1480_v18, %v1608_v37  ;;  %v1970_v18 = vld [vmem:[%s11060_s4 + $0x6d0] sm:$0xff]  ;;  %v1976_v37 = vld [vmem:[%s11060_s4 + $0x700] sm:$0xff] }
 0x2c7   :  { %v7684_v44 = vpop.f32.mrb[73].mxu0  ;;  %8348 = vmatprep.subr.bf16.mxu1 %v11245_v3 }
 0x2c8   :  { %v2369_v40 = vpop.f32.mrb[8].mxu1 }
 0x2c9   :  { %v6688_v42 = vsel %vm6680_vm2, %v2369_v40, 0.0  ;;  %v7431_v1 = vpop.f32.mrb[9].mxu1 }
 0x2ca   :  { %v6689_v23 = vadd.f32 %v6688_v42, %v6687_v0  ;;  %8350 = vmatpush3.bf16.msra.mxu1 %v8349_v10  ;;  %v1482_v0 = vmax.f32 %v1226_v28, %v1354_v30  ;;  %v1960_v10 = vld [vmem:[%s11060_s4 + $0x680] sm:$0xff] }
 0x2cb   :  { %8357 = vmatprep.subr.bf16.mxu1 %v11245_v3  ;;  %v8394_v42 = vpack.c.bf16 %v1961_v8, %v1960_v10  ;;  %v11261_v1 = vld [vmem:[#allocation13_spill] sm:$0xff] }
 0x2cc   :  { %v1610_v44 = vrot.slane %v1482_v0, 4  ;;  %v1984_v10 = vld [vmem:[%s11060_s4 + $0x740] sm:$0xff]  ;;  %v1985_v8 = vld [vmem:[%s11060_s4 + $0x748] sm:$0xff] }
 0x2cd   :  { %7870 = vmatmul.mubr.msk.f32.vlgmr.msra.gmra.mrb[62].mxu1 %vm634_vm0, %v1732_v56 }
 0x2ce   :  { %v10774_v46 = vpop.f32.mrb[74].mxu0  ;;  %8359 = vmatpush3.bf16.msra.mxu1 %v8358_v36  ;;  %7891 = vmatprep.mubr.msk.f32.mxu1 %vm8536_vm1, %v11244_v39  ;;  %v1484_v36 = vmax.f32 %v1228_v7, %v1356_v27  ;;  %v1738_v4 = vmax.f32 %v1482_v0, %v1610_v44 }
 0x2cf   :  { %v7706_v29 = vpop.f32.mrb[75].mxu0  ;;  %8360 = vmatprep.subr.bf16.mxu1 %v11245_v3 }
 0x2d0   :  { %v2442_v49 = vpop.f32.mrb[10].mxu1 }
 0x2d1   :  { %v6690_v14 = vsel %vm6680_vm2, %v2442_v49, 0.0  ;;  %v7442_v55 = vpop.f32.mrb[11].mxu1 }
 0x2d2   :  { %v6691_v51 = vadd.f32 %v6690_v14, %v6689_v23  ;;  %8362 = vmatpush3.bf16.msra.mxu1 %v8361_v20  ;;  %v1230_v23 = vmax.f32 %v11261_v1, 0.0  ;;  %v1612_v20 = vrot.slane %v1484_v36, 4  ;;  %v8406_v55 = vpack.c.bf16 %v1969_v9, %v1968_v53  ;;  %v11264_v1 = vld [vmem:[#allocation15_spill] sm:$0xff]  ;;  %v1992_v9 = vld [vmem:[%s11060_s4 + $0x780] sm:$0xff] }
 0x2d3   :  { %8369 = vmatprep.subr.bf16.mxu1 %v11245_v3 }
 0x2d4   :  { %v1358_v29 = vrot.slane %v1230_v23, 2  ;;  %v1740_v28 = vmax.f32 %v1484_v36, %v1612_v20 }
 0x2d5   :  { %7892 = vmatmul.mubr.msk.f32.vlgmr.msra.gmra.mrb[64].mxu1 %vm634_vm0, %v1734_v63  ;;  %v1971_v63 = vld [vmem:[%s11060_s4 + $0x6d8] sm:$0xff] }
 0x2d6   :  { %v10795_v58 = vpop.f32.mrb[76].mxu0  ;;  %8371 = vmatpush3.bf16.msra.mxu1 %v8370_v6  ;;  %7913 = vmatprep.mubr.msk.f32.mxu1 %vm8536_vm1, %v11244_v39  ;;  %v1486_v25 = vmax.f32 %v1230_v23, %v1358_v29  ;;  %v1236_v23 = vmax.f32 %v11264_v1, 0.0  ;;  %v8433_v29 = vpack.c.bf16 %v1987_v62, %v1986_v61 }
 0x2d7   :  { %v7728_v13 = vpop.f32.mrb[77].mxu0  ;;  %8372 = vmatprep.subr.bf16.mxu1 %v11245_v3 }
 0x2d8   :  { %v2515_v52 = vpop.f32.mrb[12].mxu1  ;;  %v8409_v13 = vpack.c.bf16 %v1971_v63, %v1970_v18  ;;  %v1614_v30 = vrot.slane %v1486_v25, 4  ;;  %v1364_v20 = vrot.slane %v1236_v23, 2  ;;  %v1994_v63 = vld [vmem:[%s11060_s4 + $0x790] sm:$0xff] }
 0x2d9   :  { %v6692_v17 = vsel %vm6680_vm2, %v2515_v52, 0.0  ;;  %v7453_v38 = vpop.f32.mrb[13].mxu1 }
 0x2da   :  { %v6693_v15 = vadd.f32 %v6692_v17, %v6691_v51  ;;  %8374 = vmatpush3.bf16.msra.mxu1 %v8373_v41  ;;  %v11262_v51 = vld [vmem:[#allocation10_spill] sm:$0xff]  ;;  %v1742_v0 = vmax.f32 %v1486_v25, %v1614_v30 }
 0x2db   :  { %8381 = vmatprep.subr.bf16.mxu1 %v11245_v3  ;;  %v1232_v6 = vmax.f32 %v11262_v51, 0.0 }
 0x2dd   :  { %7914 = vmatmul.mubr.msk.f32.vlgmr.msra.gmra.mrb[66].mxu1 %vm634_vm0, %v1736_v31  ;;  %v1360_v41 = vrot.slane %v1232_v6, 2  ;;  %v1978_v31 = vld [vmem:[%s11060_s4 + $0x710] sm:$0xff] }
 0x2de   :  { %v10816_v24 = vpop.f32.mrb[78].mxu0  ;;  %8383 = vmatpush3.bf16.msra.mxu1 %v8382_v57  ;;  %7935 = vmatprep.mubr.msk.f32.mxu1 %vm8536_vm1, %v11244_v39  ;;  %v11263_v57 = vld [vmem:[#allocation12_spill] sm:$0xff] }
 0x2df   :  { %v7750_v45 = vpop.f32.mrb[79].mxu0  ;;  %8384 = vmatprep.subr.bf16.mxu1 %v11245_v3  ;;  %v1234_v33 = vmax.f32 %v11263_v57, 0.0  ;;  %v1488_v7 = vmax.f32 %v1232_v6, %v1360_v41  ;;  %v11265_v6 = vld [vmem:[#allocation17_spill] sm:$0xff] }
 0x2e0   :  { %v2588_v19 = vpop.f32.mrb[14].mxu1  ;;  %v1238_v25 = vmax.f32 %v11265_v6, 0.0 }
 0x2e1   :  { %v6694_v43 = vsel %vm6680_vm2, %v2588_v19, 0.0  ;;  %v7464_v32 = vpop.f32.mrb[15].mxu1  ;;  %v1362_v27 = vrot.slane %v1234_v33, 2  ;;  %v1616_v44 = vrot.slane %v1488_v7, 4 }
 0x2e2   :  { %v6695_v40 = vadd.f32 %v6694_v43, %v6693_v15  ;;  %8386 = vmatpush3.bf16.msra.mxu1 %v8385_v21  ;;  %v8418_v15 = vpack.c.bf16 %v1977_v48, %v1976_v37  ;;  %v8421_v21 = vpack.c.bf16 %v1979_v34, %v1978_v31  ;;  %v1366_v37 = vrot.slane %v1238_v25, 2  ;;  %v2002_v31 = vld [vmem:[%s11060_s4 + $0x7d0] sm:$0xff]  ;;  %v2003_v34 = vld [vmem:[%s11060_s4 + $0x7d8] sm:$0xff] }
 0x2e3   :  { %8393 = vmatprep.subr.bf16.mxu1 %v11245_v3  ;;  %v1490_v36 = vmax.f32 %v1234_v33, %v1362_v27  ;;  %v8457_v27 = vpack.c.bf16 %v2003_v34, %v2002_v31 }
 0x2e5   :  { %7936 = vmatmul.mubr.msk.f32.vlgmr.msra.gmra.mrb[68].mxu1 %vm634_vm0, %v1738_v4  ;;  %v1744_v4 = vmax.f32 %v1488_v7, %v1616_v44  ;;  %v1618_v53 = vrot.slane %v1490_v36, 4  ;;  %v1494_v7 = vmax.f32 %v1238_v25, %v1366_v37 }
 0x2e6   :  { %v10837_v56 = vpop.f32.mrb[80].mxu0  ;;  %8395 = vmatpush3.bf16.msra.mxu1 %v8394_v42  ;;  %7957 = vmatprep.mubr.msk.f32.mxu1 %vm8536_vm1, %v11244_v39  ;;  %v8430_v42 = vpack.c.bf16 %v1985_v8, %v1984_v10 }
 0x2e7   :  { %v7772_v5 = vpop.f32.mrb[81].mxu0  ;;  %8396 = vmatprep.subr.bf16.mxu1 %v11245_v3  ;;  %v1746_v18 = vmax.f32 %v1490_v36, %v1618_v53  ;;  %v1622_v44 = vrot.slane %v1494_v7, 4 }
 0x2e8   :  { %v2661_v2 = vpop.f32.mrb[16].mxu1 }
 0x2e9   :  { %v6696_v11 = vsel %vm6680_vm2, %v2661_v2, 0.0  ;;  %v7475_v49 = vpop.f32.mrb[17].mxu1  ;;  %v1993_v2 = vld [vmem:[%s11060_s4 + $0x788] sm:$0xff] }
 0x2ea   :  { %v6697_v14 = vadd.f32 %v6696_v11, %v6695_v40  ;;  %8398 = vmatpush3.bf16.msra.mxu1 %v8397_v22  ;;  %v8442_v51 = vpack.c.bf16 %v1993_v2, %v1992_v9 }
 0x2eb   :  { %8405 = vmatprep.subr.bf16.mxu1 %v11245_v3 }
 0x2ed   :  { %7958 = vmatmul.mubr.msk.f32.vlgmr.msra.gmra.mrb[70].mxu1 %vm634_vm0, %v1740_v28  ;;  %v1492_v28 = vmax.f32 %v1236_v23, %v1364_v20 }
 0x2ee   :  { %v10858_v50 = vpop.f32.mrb[82].mxu0  ;;  %8407 = vmatpush3.bf16.msra.mxu1 %v8406_v55  ;;  %7979 = vmatprep.mubr.msk.f32.mxu1 %vm8536_vm1, %v11244_v39 }
 0x2ef   :  { %v7794_v26 = vpop.f32.mrb[83].mxu0  ;;  %8408 = vmatprep.subr.bf16.mxu1 %v11245_v3  ;;  %v1620_v48 = vrot.slane %v1492_v28, 4 }
 0x2f0   :  { %v2734_v60 = vpop.f32.mrb[18].mxu1  ;;  %v1995_v26 = vld [vmem:[%s11060_s4 + $0x798] sm:$0xff] }
 0x2f1   :  { %v6698_v52 = vsel %vm6680_vm2, %v2734_v60, 0.0  ;;  %v7486_v17 = vpop.f32.mrb[19].mxu1  ;;  %v8445_v30 = vpack.c.bf16 %v1995_v26, %v1994_v63  ;;  %v2000_v60 = vld [vmem:[%s11060_s4 + $0x7c0] sm:$0xff] }
 0x2f2   :  { %v6699_v38 = vadd.f32 %v6698_v52, %v6697_v14  ;;  %8410 = vmatpush3.bf16.msra.mxu1 %v8409_v13  ;;  %v2001_v52 = vld [vmem:[%s11060_s4 + $0x7c8] sm:$0xff] }
 0x2f3   :  { %8417 = vmatprep.subr.bf16.mxu1 %v11245_v3  ;;  %v8454_v33 = vpack.c.bf16 %v2001_v52, %v2000_v60 }
 0x2f5   :  { %7980 = vmatmul.mubr.msk.f32.vlgmr.msra.gmra.mrb[72].mxu1 %vm634_vm0, %v1742_v0  ;;  %v1748_v0 = vmax.f32 %v1492_v28, %v1620_v48  ;;  %v6718_v48 = vsel %vm6680_vm2, %v10669_v47, 0.0 }
 0x2f6   :  { %v10879_v12 = vpop.f32.mrb[84].mxu0  ;;  %8419 = vmatpush3.bf16.msra.mxu1 %v8418_v15  ;;  %8001 = vmatprep.mubr.msk.f32.mxu1 %vm8536_vm1, %v11244_v39 }
 0x2f7   :  { %v7816_v45 = vpop.f32.mrb[85].mxu0  ;;  %8420 = vmatprep.subr.bf16.mxu1 %v11245_v3 }
 0x2f8   :  { %v2807_v19 = vpop.f32.mrb[20].mxu1 }
 0x2f9   :  { %v6700_v43 = vsel %vm6680_vm2, %v2807_v19, 0.0  ;;  %v7497_v32 = vpop.f32.mrb[21].mxu1 }
 0x2fa   :  { %v6701_v40 = vadd.f32 %v6700_v43, %v6699_v38  ;;  %8422 = vmatpush3.bf16.msra.mxu1 %v8421_v21  ;;  %v1750_v32 = vmax.f32 %v1494_v7, %v1622_v44  ;;  %v6722_v7 = vsel %vm6680_vm2, %v10689_v16, 0.0 }
 0x2fb   :  { %8429 = vmatprep.subr.bf16.mxu1 %v11245_v3 }
 0x2fd   :  { %8002 = vmatmul.mubr.msk.f32.vlgmr.msra.gmra.mrb[74].mxu1 %vm634_vm0, %v1744_v4 }
 0x2fe   :  { %v10900_v5 = vpop.f32.mrb[86].mxu0  ;;  %8431 = vmatpush3.bf16.msra.mxu1 %v8430_v42  ;;  %8023 = vmatprep.mubr.msk.f32.mxu1 %vm8536_vm1, %v11244_v39 }
 0x2ff   :  { %v7838_v22 = vpop.f32.mrb[87].mxu0  ;;  %8432 = vmatprep.subr.bf16.mxu1 %v11245_v3 }
 0x300   :  { %v2880_v11 = vpop.f32.mrb[22].mxu1 }
 0x301   :  { %v6702_v49 = vsel %vm6680_vm2, %v2880_v11, 0.0  ;;  %v7508_v14 = vpop.f32.mrb[23].mxu1 }
 0x302   :  { %v6703_v55 = vadd.f32 %v6702_v49, %v6701_v40  ;;  %8434 = vmatpush3.bf16.msra.mxu1 %v8433_v29 }
 0x303   :  { %8441 = vmatprep.subr.bf16.mxu1 %v11245_v3 }
 0x305   :  { %8024 = vmatmul.mubr.msk.f32.vlgmr.msra.gmra.mrb[76].mxu1 %vm634_vm0, %v1746_v18 }
 0x306   :  { %v10921_v13 = vpop.f32.mrb[88].mxu0  ;;  %8443 = vmatpush3.bf16.msra.mxu1 %v8442_v51  ;;  %8045 = vmatprep.mubr.msk.f32.mxu1 %vm8536_vm1, %v11244_v39 }
 0x307   :  { %v7860_v41 = vpop.f32.mrb[89].mxu0  ;;  %8444 = vmatprep.subr.bf16.mxu1 %v11245_v3 }
 0x308   :  { %v2953_v17 = vpop.f32.mrb[24].mxu1 }
 0x309   :  { %v6704_v38 = vsel %vm6680_vm2, %v2953_v17, 0.0  ;;  %v7519_v15 = vpop.f32.mrb[25].mxu1 }
 0x30a   :  { %v6705_v57 = vadd.f32 %v6704_v38, %v6703_v55  ;;  %8446 = vmatpush3.bf16.msra.mxu1 %v8445_v30 }
 0x30b   :  { %8453 = vmatprep.subr.bf16.mxu1 %v11245_v3 }
 0x30d   :  { %8046 = vmatmul.mubr.msk.f32.vlgmr.msra.gmra.mrb[78].mxu1 %vm634_vm0, %v1748_v0 }
 0x30e   :  { %v10941_v45 = vpop.f32.mrb[90].mxu0  ;;  %8455 = vmatpush3.bf16.msra.mxu1 %v8454_v33  ;;  %8067 = vmatprep.mubr.msk.f32.mxu1 %vm8536_vm1, %v11244_v39 }
 0x30f   :  { %v7882_v21 = vpop.f32.mrb[91].mxu0  ;;  %8456 = vmatprep.subr.bf16.mxu1 %v11245_v3 }
 0x310   :  { %v3026_v10 = vpop.f32.mrb[26].mxu1 }
 0x311   :  { %v6706_v8 = vsel %vm6680_vm2, %v3026_v10, 0.0  ;;  %v7530_v19 = vpop.f32.mrb[27].mxu1  ;;  %v6726_v10 = vsel %vm6680_vm2, %v10711_v59, 0.0 }
 0x312   :  { %v6707_v43 = vadd.f32 %v6706_v8, %v6705_v57  ;;  %8458 = vmatpush3.bf16.msra.mxu1 %v8457_v27 }
 0x315   :  { %8068 = vmatmul.mubr.msk.f32.vlgmr.msra.gmra.mrb[80].mxu1 %vm634_vm0, %v1750_v32 }
 0x316   :  { %v10948_v40 = vpop.f32.mrb[92].mxu0 }
 0x317   :  { %v7904_v42 = vpop.f32.mrb[93].mxu0 }
 0x318   :  { %v3099_v1 = vpop.f32.mrb[28].mxu1 }
 0x319   :  { %v6708_v23 = vsel %vm6680_vm2, %v3099_v1, 0.0  ;;  %v7541_v36 = vpop.f32.mrb[29].mxu1 }
 0x31a   :  { %v6709_v39 = vadd.f32 %v6708_v23, %v6707_v43  ;;  %v6730_v23 = vsel %vm6680_vm2, %v10732_v35, 0.0  ;;  %v6738_v35 = vsel %vm6680_vm2, %v10774_v46, 0.0 }
 0x31e   :  { %v10952_v4 = vpop.f32.mrb[94].mxu0 }
 0x31f   :  { %v7926_v3 = vpop.f32.mrb[95].mxu0 }
 0x320   :  { %v3172_v61 = vpop.f32.mrb[30].mxu1 }
 0x321   :  { %v6710_v62 = vsel %vm6680_vm2, %v3172_v61, 0.0  ;;  %v7552_v22 = vpop.f32.mrb[31].mxu1 }
 0x322   :  { %v6711_v29 = vadd.f32 %v6710_v62, %v6709_v39 }
 0x326   :  { %v10955_v20 = vpop.f32.mrb[96].mxu0 }
 0x327   :  { %v7948_v53 = vpop.f32.mrb[97].mxu0 }
 0x328   :  { %v3245_v9 = vpop.f32.mrb[32].mxu1 }
 0x329   :  { %v6712_v2 = vsel %vm6680_vm2, %v3245_v9, 0.0  ;;  %v7563_v11 = vpop.f32.mrb[33].mxu1 }
 0x32a   :  { %v6713_v49 = vadd.f32 %v6712_v2, %v6711_v29  ;;  %v6734_v29 = vsel %vm6680_vm2, %v10753_v54, 0.0 }
 0x32e   :  { %v10958_v14 = vpop.f32.mrb[98].mxu0 }
 0x32f   :  { %v7970_v55 = vpop.f32.mrb[99].mxu0 }
 0x330   :  { %v3318_v51 = vpop.f32.mrb[34].mxu1 }
 0x331   :  { %v6714_v6 = vsel %vm6680_vm2, %v3318_v51, 0.0  ;;  %v7574_v25 = vpop.f32.mrb[35].mxu1 }
 0x332   :  { %v6715_v28 = vadd.f32 %v6714_v6, %v6713_v49 }
 0x336   :  { %v10961_v18 = vpop.f32.mrb[100].mxu0 }
 0x337   :  { %v7992_v63 = vpop.f32.mrb[101].mxu0 }
 0x338   :  { %v3391_v26 = vpop.f32.mrb[36].mxu1  ;;  %v6742_v63 = vsel %vm6680_vm2, %v10795_v58, 0.0 }
 0x339   :  { %v6716_v41 = vsel %vm6680_vm2, %v3391_v26, 0.0  ;;  %v7585_v30 = vpop.f32.mrb[37].mxu1 }
 0x33a   :  { %v6717_v37 = vadd.f32 %v6716_v41, %v6715_v28 }
 0x33c   :  { %v6719_v60 = vadd.f32 %v6718_v48, %v6717_v37  ;;  %v6746_v48 = vsel %vm6680_vm2, %v10816_v24, 0.0 }
 0x33e   :  { %v10966_v52 = vpop.f32.mrb[102].mxu0 }
 0x33f   :  { %v8014_v17 = vpop.f32.mrb[103].mxu0 }
 0x340   :  { %v3537_v38 = vpop.f32.mrb[38].mxu1 }
 0x341   :  { %v6720_v15 = vsel %vm6680_vm2, %v3537_v38, 0.0  ;;  %v7607_v57 = vpop.f32.mrb[39].mxu1 }
 0x342   :  { %v6721_v33 = vadd.f32 %v6720_v15, %v6719_v60  ;;  %v6750_v57 = vsel %vm6680_vm2, %v10837_v56, 0.0 }
 0x344   :  { %v6723_v0 = vadd.f32 %v6722_v7, %v6721_v33 }
 0x346   :  { %v10971_v31 = vpop.f32.mrb[104].mxu0 }
 0x347   :  { %v8036_v34 = vpop.f32.mrb[105].mxu0 }
 0x348   :  { %v3683_v21 = vpop.f32.mrb[40].mxu1 }
 0x349   :  { %v6724_v27 = vsel %vm6680_vm2, %v3683_v21, 0.0  ;;  %v7629_v47 = vpop.f32.mrb[41].mxu1  ;;  %v6754_v21 = vsel %vm6680_vm2, %v10858_v50, 0.0 }
 0x34a   :  { %v6725_v44 = vadd.f32 %v6724_v27, %v6723_v0 }
 0x34c   :  { %v6727_v8 = vadd.f32 %v6726_v10, %v6725_v44 }
 0x34e   :  { %v10976_v19 = vpop.f32.mrb[106].mxu0 }
 0x34f   :  { %v8058_v43 = vpop.f32.mrb[107].mxu0 }
 0x350   :  { %v3829_v32 = vpop.f32.mrb[42].mxu1 }
 0x351   :  { %v6728_v42 = vsel %vm6680_vm2, %v3829_v32, 0.0  ;;  %v7651_v16 = vpop.f32.mrb[43].mxu1 }
 0x352   :  { %v6729_v1 = vadd.f32 %v6728_v42, %v6727_v8  ;;  %v6758_v8 = vsel %vm6680_vm2, %v10879_v12, 0.0 }
 0x354   :  { %v6731_v36 = vadd.f32 %v6730_v23, %v6729_v1  ;;  %v6762_v1 = vsel %vm6680_vm2, %v10900_v5, 0.0 }
 0x356   :  { %v10981_v39 = vpop.f32.mrb[108].mxu0 }
 0x357   :  { %v8080_v3 = vpop.f32.mrb[109].mxu0 }
 0x358   :  { %v3975_v61 = vpop.f32.mrb[44].mxu1 }
 0x359   :  { %v6732_v62 = vsel %vm6680_vm2, %v3975_v61, 0.0  ;;  %v7673_v59 = vpop.f32.mrb[45].mxu1 }
 0x35a   :  { %v6733_v22 = vadd.f32 %v6732_v62, %v6731_v36  ;;  %v6766_v62 = vsel %vm6680_vm2, %v10921_v13, 0.0 }
 0x35c   :  { %v6735_v53 = vadd.f32 %v6734_v29, %v6733_v22 }
 0x360   :  { %v4121_v9 = vpop.f32.mrb[46].mxu1 }
 0x361   :  { %v6736_v2 = vsel %vm6680_vm2, %v4121_v9, 0.0  ;;  %v7695_v11 = vpop.f32.mrb[47].mxu1  ;;  %v6770_v9 = vsel %vm6680_vm2, %v10941_v45, 0.0 }
 0x362   :  { %v6737_v49 = vadd.f32 %v6736_v2, %v6735_v53 }
 0x364   :  { %v6739_v55 = vadd.f32 %v6738_v35, %v6737_v49 }
 0x368   :  { %v4267_v51 = vpop.f32.mrb[48].mxu1 }
 0x369   :  { %v6740_v6 = vsel %vm6680_vm2, %v4267_v51, 0.0  ;;  %v7717_v25 = vpop.f32.mrb[49].mxu1 }
 0x36a   :  { %v6741_v28 = vadd.f32 %v6740_v6, %v6739_v55  ;;  %v6774_v55 = vsel %vm6680_vm2, %v10948_v40, 0.0 }
 0x36c   :  { %v6743_v26 = vadd.f32 %v6742_v63, %v6741_v28  ;;  %v6778_v63 = vsel %vm6680_vm2, %v10952_v4, 0.0 }
 0x370   :  { %v4413_v54 = vpop.f32.mrb[50].mxu1 }
 0x371   :  { %v6744_v41 = vsel %vm6680_vm2, %v4413_v54, 0.0  ;;  %v7739_v30 = vpop.f32.mrb[51].mxu1 }
 0x372   :  { %v6745_v37 = vadd.f32 %v6744_v41, %v6743_v26 }
 0x374   :  { %v6747_v60 = vadd.f32 %v6746_v48, %v6745_v37  ;;  %v6782_v37 = vsel %vm6680_vm2, %v10955_v20, 0.0 }
 0x378   :  { %v4559_v46 = vpop.f32.mrb[52].mxu1 }
 0x379   :  { %v6748_v17 = vsel %vm6680_vm2, %v4559_v46, 0.0  ;;  %v7761_v38 = vpop.f32.mrb[53].mxu1 }
 0x37a   :  { %v6749_v15 = vadd.f32 %v6748_v17, %v6747_v60  ;;  %v6786_v38 = vsel %vm6680_vm2, %v10958_v14, 0.0 }
 0x37c   :  { %v6751_v33 = vadd.f32 %v6750_v57, %v6749_v15 }
 0x380   :  { %v4705_v58 = vpop.f32.mrb[54].mxu1 }
 0x381   :  { %v6752_v7 = vsel %vm6680_vm2, %v4705_v58, 0.0  ;;  %v7783_v0 = vpop.f32.mrb[55].mxu1 }
 0x382   :  { %v6753_v34 = vadd.f32 %v6752_v7, %v6751_v33  ;;  %v6790_v7 = vsel %vm6680_vm2, %v10961_v18, 0.0 }
 0x384   :  { %v6755_v27 = vadd.f32 %v6754_v21, %v6753_v34 }
 0x388   :  { %v4851_v24 = vpop.f32.mrb[56].mxu1 }
 0x389   :  { %v6756_v47 = vsel %vm6680_vm2, %v4851_v24, 0.0  ;;  %v7805_v44 = vpop.f32.mrb[57].mxu1  ;;  %v6794_v24 = vsel %vm6680_vm2, %v10966_v52, 0.0 }
 0x38a   :  { %v6757_v10 = vadd.f32 %v6756_v47, %v6755_v27 }
 0x38c   :  { %v6759_v43 = vadd.f32 %v6758_v8, %v6757_v10 }
 0x390   :  { %v4997_v56 = vpop.f32.mrb[58].mxu1 }
 0x391   :  { %v6760_v32 = vsel %vm6680_vm2, %v4997_v56, 0.0  ;;  %v7827_v42 = vpop.f32.mrb[59].mxu1 }
 0x392   :  { %v6761_v16 = vadd.f32 %v6760_v32, %v6759_v43  ;;  %v6798_v43 = vsel %vm6680_vm2, %v10971_v31, 0.0  ;;  %v6936_v31 = vld [vmem:[%s11061_s5] ss:$0 sm:$0xff] }
 0x394   :  { %v6763_v23 = vadd.f32 %v6762_v1, %v6761_v16  ;;  %v6802_v1 = vsel %vm6680_vm2, %v10976_v19, 0.0 }
 0x398   :  { %v5143_v50 = vpop.f32.mrb[60].mxu1 }
 0x399   :  { %v6764_v36 = vsel %vm6680_vm2, %v5143_v50, 0.0  ;;  %v7849_v3 = vpop.f32.mrb[61].mxu1 }
 0x39a   :  { %v6765_v61 = vadd.f32 %v6764_v36, %v6763_v23 }
 0x39c   :  { %v6767_v59 = vadd.f32 %v6766_v62, %v6765_v61  ;;  %v6806_v61 = vsel %vm6680_vm2, %v10981_v39, 0.0 }
 0x3a0   :  { %v5289_v12 = vpop.f32.mrb[62].mxu1 }
 0x3a1   :  { %v6768_v22 = vsel %vm6680_vm2, %v5289_v12, 0.0  ;;  %v7871_v29 = vpop.f32.mrb[63].mxu1 }
 0x3a2   :  { %v6769_v53 = vadd.f32 %v6768_v22, %v6767_v59 }
 0x3a4   :  { %v6771_v2 = vadd.f32 %v6770_v9, %v6769_v53 }
 0x3a8   :  { %v5435_v5 = vpop.f32.mrb[64].mxu1 }
 0x3a9   :  { %v6772_v11 = vsel %vm6680_vm2, %v5435_v5, 0.0  ;;  %v7893_v49 = vpop.f32.mrb[65].mxu1 }
 0x3aa   :  { %v6773_v35 = vadd.f32 %v6772_v11, %v6771_v2 }
 0x3ac   :  { %v6775_v51 = vadd.f32 %v6774_v55, %v6773_v35 }
 0x3b0   :  { %v5581_v13 = vpop.f32.mrb[66].mxu1 }
 0x3b1   :  { %v6776_v6 = vsel %vm6680_vm2, %v5581_v13, 0.0  ;;  %v7915_v25 = vpop.f32.mrb[67].mxu1 }
 0x3b2   :  { %v6777_v28 = vadd.f32 %v6776_v6, %v6775_v51 }
 0x3b4   :  { %v6779_v26 = vadd.f32 %v6778_v63, %v6777_v28 }
 0x3b8   :  { %v5727_v45 = vpop.f32.mrb[68].mxu1 }
 0x3b9   :  { %v6780_v54 = vsel %vm6680_vm2, %v5727_v45, 0.0  ;;  %v7937_v41 = vpop.f32.mrb[69].mxu1 }
 0x3ba   :  { %v6781_v30 = vadd.f32 %v6780_v54, %v6779_v26 }
 0x3bc   :  { %v6783_v48 = vadd.f32 %v6782_v37, %v6781_v30 }
 0x3c0   :  { %v5873_v40 = vpop.f32.mrb[70].mxu1 }
 0x3c1   :  { %v6784_v60 = vsel %vm6680_vm2, %v5873_v40, 0.0  ;;  %v7959_v46 = vpop.f32.mrb[71].mxu1 }
 0x3c2   :  { %v6785_v17 = vadd.f32 %v6784_v60, %v6783_v48 }
 0x3c4   :  { %v6787_v15 = vadd.f32 %v6786_v38, %v6785_v17 }
 0x3c8   :  { %v6019_v4 = vpop.f32.mrb[72].mxu1 }
 0x3c9   :  { %v6788_v57 = vsel %vm6680_vm2, %v6019_v4, 0.0  ;;  %v7981_v33 = vpop.f32.mrb[73].mxu1 }
 0x3ca   :  { %v6789_v58 = vadd.f32 %v6788_v57, %v6787_v15 }
 0x3cc   :  { %v6791_v0 = vadd.f32 %v6790_v7, %v6789_v58 }
 0x3d0   :  { %v6165_v20 = vpop.f32.mrb[74].mxu1 }
 0x3d1   :  { %v6792_v34 = vsel %vm6680_vm2, %v6165_v20, 0.0  ;;  %v8003_v21 = vpop.f32.mrb[75].mxu1 }
 0x3d2   :  { %v6793_v27 = vadd.f32 %v6792_v34, %v6791_v0 }
 0x3d4   :  { %v6795_v47 = vadd.f32 %v6794_v24, %v6793_v27 }
 0x3d8   :  { %v6311_v14 = vpop.f32.mrb[76].mxu1 }
 0x3d9   :  { %v6796_v44 = vsel %vm6680_vm2, %v6311_v14, 0.0  ;;  %v8025_v10 = vpop.f32.mrb[77].mxu1 }
 0x3da   :  { %v6797_v8 = vadd.f32 %v6796_v44, %v6795_v47 }
 0x3dc   :  { %v6799_v56 = vadd.f32 %v6798_v43, %v6797_v8 }
 0x3e0   :  { %v6457_v18 = vpop.f32.mrb[78].mxu1 }
 0x3e1   :  { %v6800_v32 = vsel %vm6680_vm2, %v6457_v18, 0.0  ;;  %v8047_v42 = vpop.f32.mrb[79].mxu1 }
 0x3e2   :  { %v6801_v16 = vadd.f32 %v6800_v32, %v6799_v56 }
 0x3e4   :  { %v6803_v23 = vadd.f32 %v6802_v1, %v6801_v16 }
 0x3e8   :  { %v6603_v52 = vpop.f32.mrb[80].mxu1 }
 0x3e9   :  { %v6804_v50 = vsel %vm6680_vm2, %v6603_v52, 0.0  ;;  %v8069_v36 = vpop.f32.mrb[81].mxu1 }
 0x3ea   :  { %v6805_v3 = vadd.f32 %v6804_v50, %v6803_v23 }
 0x3ec   :  { %v6807_v62 = vadd.f32 %v6806_v61, %v6805_v3 }
 0x3ee   :  { %v6815_v59 = vadd.f32 %v6936_v31, %v6807_v62 }
 0x3f0   :  { %6816 = vst.msk [vmem:[#allocation2] sm:$0x3] %vm6680_vm2, %v6815_v59 }
 0x3f1   :  { %8522 = shalt.err (!%p8519_p4)
}
 0x3f2   :  { %s8523_s2 = scalar_lea.hbm %s11062_s6, 32 }
 0x3f3   :  { %p8524_p5 = scmp.ne.s32.totalorder %s11062_s6, %s8523_s2  ;;  %p8527_p6 = scmp.lt.u32.totalorder %s8523_s2, %s11062_s6 }
 0x3f5   :  { %p8529_p7 = pnand %p8527_p6, %p8524_p5 }
 0x3f7   :  { %8532 = shalt.err (!%p8529_p7)
}
 0x3f8   :  { %6826 = dma.vmem_to_hbm [thread:$0]  %s6824_s15, 32, %s11062_s6, [#allocation3]  }
 0x3f9   :  { %8533 = dma.done.wait [#allocation3], 32  }
 0x3fa   :  { %8534 = vsyncadd [#allocation3], 4294967264 }
 0x3fb   :  { %6830 = vsyncpa [#allocation3], 1 }

</bundles_post_ra>
